<compile_context>
chip_gen: v7x
topology: tpu7x:2x2x1
jax: 0.10.0
libtpu: 0.0.40
codegen_flags: <defaults>
</compile_context>

<pallas_src>
import jax
import jax.numpy as jnp
from jax.experimental import pallas as pl
from jax.experimental.pallas import tpu as pltpu

BN_EPS = 1e-5
LANE = 128  # channel padding target -> lane-dense operands


def _default_vmem_limit():
    # ~75% of physical VMEM (v7x: 64 MiB -> 48 MiB; v5e/v6e: 128 MiB -> 96 MiB).
    try:
        return int(pltpu.get_tpu_info().vmem_capacity_bytes * 3 // 4)
    except Exception:  # conservative fallback, safe on every generation
        return 48 * 1024 * 1024


_VMEM_LIMIT = _default_vmem_limit()


def _bn_relu(y, gamma, beta, m):
    """Training-mode BatchNorm (batch mean, biased var) + ReLU, all in f32.

    Centered two-pass variance (avoids E[y^2]-E[y]^2 cancellation for large M).
    y: (M, Cp) f32; gamma/beta: (1, Cp) f32.
    """
    inv_m = 1.0 / m
    mean = jnp.sum(y, axis=0, keepdims=True) * inv_m
    d = y - mean
    var = jnp.sum(d * d, axis=0, keepdims=True) * inv_m
    scale = gamma * jax.lax.rsqrt(var + BN_EPS)
    return jnp.maximum(d * scale + beta, 0.0)


def _encoder_block_kernel(x1_ref, w1_ref, w2_ref, w3_ref, g_ref, b_ref,
                          o_ref, act_ref, col_ref):
    # x1_ref : (M, 128)            bf16  layer-1 im2col (9*Cin packed into K)
    # w1_ref : (128, 128)          bf16  layer-1 weight (9*Cin, Cout) padded
    # w2/w3  : (9*128, 128)        bf16  layer-2/3 weights, taps folded into K
    # g/b    : (3, 1, 128)         f32   BatchNorm gamma / beta per layer
    # o_ref  : (M, 128)            f32   final activation (lane-dense)
    # act_ref: (N, Ho+2, Wpad, 128) f32  zero-haloed activation scratch
    # col_ref: (M, 9*128)          bf16  stride-1 im2col scratch
    n, hp, wpad, cp = act_ref.shape
    ho = hp - 2
    m = col_ref.shape[0]
    wo = m // (n * ho)

    def store_interior(y):
        # Write y (M, Cp) into act rows 1..Ho at W offset 1 using an aligned
        # full-width store: right-pad W with zeros, roll by +1 (XLU), store.
        # The rolled-in columns are exactly the zero W halo.
        y3 = y.reshape(n * ho, wo, cp)
        ypad = jnp.concatenate(
            [y3, jnp.zeros((n * ho, wpad - wo, cp), y3.dtype)], axis=1)
        yrolled = pltpu.roll(ypad, shift=1, axis=1)
        act_ref[:, 1:ho + 1, :, :] = yrolled.reshape(n, ho, wpad, cp)

    # ---- layer 1: 3x3 stride-2 conv as ONE matmul (taps pre-folded into K) --
    y = jnp.dot(x1_ref[...], w1_ref[...], preferred_element_type=jnp.float32)
    y = _bn_relu(y, g_ref[0], b_ref[0], m)

    # Zero only the top/bottom halo rows, once; the W halo columns are written
    # by the rolled interior store, and interior rows are fully overwritten.
    act_ref[:, 0:1, :, :] = jnp.zeros((n, 1, wpad, cp), act_ref.dtype)
    act_ref[:, ho + 1:, :, :] = jnp.zeros((n, hp - ho - 1, wpad, cp),
                                          act_ref.dtype)
    store_interior(y)

    # ---- layers 2 & 3: 3x3 stride-1 convs, 9 taps folded into K = 9*128 -----
    for layer, w_ref in ((1, w2_ref), (2, w3_ref)):
        for kh in range(3):
            # Full-width row window: H is a major dim -> aligned load.
            rows = act_ref[:, kh:kh + ho, :, :].reshape(n * ho, wpad, cp)
            for kw in range(3):
                # kw shift via XLU sublane rotation instead of a misaligned
                # sublane slice; wrapped elements land past column wo-1 and
                # are discarded by the [:wo] slice.
                win = rows if kw == 0 else pltpu.roll(
                    rows, shift=wpad - kw, axis=1)
                tap = kh * 3 + kw
                col_ref[:, tap * cp:(tap + 1) * cp] = (
                    win[:, :wo, :].reshape(m, cp).astype(col_ref.dtype))
        y = jnp.dot(col_ref[...], w_ref[...],
                    preferred_element_type=jnp.float32)
        y = _bn_relu(y, g_ref[layer], b_ref[layer], m)
        if layer == 1:
            store_interior(y)
        else:
            o_ref[...] = y


def _pad_lane(x, cp):
    pad = cp - x.shape[-1]
    if pad:
        x = jnp.pad(x, [(0, 0)] * (x.ndim - 1) + [(0, pad)])
    return x


@jax.jit
def encoder_block_forward(x_nchw, params):
    """Fused EncoderBlock forward (train-mode BN), NCHW in / NCHW out.

    params: 3 tuples (w (3,3,Cin,Cout) f32, gamma (Cout,) f32, beta (Cout,) f32).
    """
    n, cin, h, w = x_nchw.shape
    assert h % 2 == 0 and w % 2 == 0, "spatial dims must be even for stride 2"
    cout = params[0][0].shape[-1]
    cp = LANE
    assert cin <= cp and cout <= cp, "channels must fit one 128-lane tile"
    # TODO(synk): for 9*Cin > 128 fall back to a K=9*Cp layer-1 path.
    assert 9 * cin <= cp, "layer-1 tap packing requires 9*Cin <= 128"
    ho, wo = h // 2, w // 2
    m = n * ho * wo
    assert m % 8 == 0, "N*Ho*Wo must be a multiple of 8"
    wpad = -((wo + 2) // -8) * 8            # scratch W dim, multiple of 8

    # ---- layer-1 im2col: pack 9 taps x Cin into one lane-dense K <= 128 -----
    x = jnp.transpose(x_nchw, (0, 2, 3, 1))                    # NHWC
    xp = jnp.pad(x, ((0, 0), (1, 1), (1, 1), (0, 0)))
    taps = [xp[:, kh:kh + h:2, kw:kw + w:2, :]
            for kh in range(3) for kw in range(3)]
    x1 = jnp.concatenate(taps, axis=-1).reshape(m, 9 * cin)
    x1 = _pad_lane(x1, cp).astype(jnp.bfloat16)

    # ---- weights: fold taps into K -------------------------------------------
    w1 = params[0][0].reshape(9 * cin, cout)                   # (9*Cin, Cout)
    w1 = jnp.pad(w1, ((0, cp - 9 * cin), (0, cp - cout))).astype(jnp.bfloat16)

    def fold_w(wk):                                            # -> (9*cp, cp)
        ci, co = wk.shape[2], wk.shape[3]
        wk = jnp.pad(wk, ((0, 0), (0, 0), (0, cp - ci), (0, cp - co)))
        return wk.reshape(9 * cp, cp).astype(jnp.bfloat16)

    w2, w3 = fold_w(params[1][0]), fold_w(params[2][0])
    gammas = jnp.stack([_pad_lane(g.reshape(1, -1).astype(jnp.float32), cp)
                        for _, g, _ in params])                # (3, 1, cp)
    betas = jnp.stack([_pad_lane(b.reshape(1, -1).astype(jnp.float32), cp)
                       for _, _, b in params])                 # (3, 1, cp)

    flops = 2 * m * cp * cp + 2 * (2 * m * 9 * cp * cp)
    bytes_accessed = ((x1.size + w1.size + w2.size + w3.size) * 2 +
                      (gammas.size + betas.size + m * cp) * 4)

    out = pl.pallas_call(
        _encoder_block_kernel,
        out_shape=jax.ShapeDtypeStruct((m, cp), jnp.float32),
        grid=(1,),
        in_specs=[
            pl.BlockSpec((m, cp), lambda i: (0, 0)),
            pl.BlockSpec((cp, cp), lambda i: (0, 0)),
            pl.BlockSpec((9 * cp, cp), lambda i: (0, 0)),
            pl.BlockSpec((9 * cp, cp), lambda i: (0, 0)),
            pl.BlockSpec((3, 1, cp), lambda i: (0, 0, 0)),
            pl.BlockSpec((3, 1, cp), lambda i: (0, 0, 0)),
        ],
        out_specs=pl.BlockSpec((m, cp), lambda i: (0, 0)),
        scratch_shapes=[
            pltpu.VMEM((n, ho + 2, wpad, cp), jnp.float32),    # haloed act
            pltpu.VMEM((m, 9 * cp), jnp.bfloat16),             # im2col slab
        ],
        compiler_params=pltpu.CompilerParams(
            dimension_semantics=("arbitrary",),
            vmem_limit_bytes=_VMEM_LIMIT,
        ),
        cost_estimate=pl.CostEstimate(
            flops=flops, transcendentals=3 * cp,
            bytes_accessed=bytes_accessed),
    )(x1, w1, w2, w3, gammas, betas)

    out = out.reshape(n, ho, wo, cp)[..., :cout]
    return jnp.transpose(out, (0, 3, 1, 2))                    # NHWC -> NCHW


def _reference_forward(x_nchw, params):
    """Pure-JAX f32 reference (Conv -> train-mode BN -> ReLU) x3."""
    x = x_nchw
    for (wk, gamma, beta), s in zip(params, (2, 1, 1)):
        y = jax.lax.conv_general_dilated(
            x, wk, (s, s), ((1, 1), (1, 1)),
            dimension_numbers=("NCHW", "HWIO", "NCHW"),
            precision=jax.lax.Precision.HIGHEST)
        mean = jnp.mean(y, axis=(0, 2, 3), keepdims=True)
        var = jnp.var(y, axis=(0, 2, 3), keepdims=True)        # biased
        y = (y - mean) * jax.lax.rsqrt(var + BN_EPS)
        y = y * gamma.reshape(1, -1, 1, 1) + beta.reshape(1, -1, 1, 1)
        x = jnp.maximum(y, 0.0)
    return x


def make_layer_params(key, cin, cout):
    # Conv2d weight in (KH, KW, Cin, Cout) layout, no bias; BatchNorm2d
    # default init gamma=1, beta=0. Running-stat momentum updates do not
    # affect the train-mode forward and are not tracked.
    w = jax.random.normal(key, (3, 3, cin, cout), jnp.float32) * 0.1
    gamma = jnp.ones((cout,), jnp.float32)
    beta = jnp.zeros((cout,), jnp.float32)
    return w, gamma, beta


if __name__ == "__main__":
    key = jax.random.PRNGKey(0)
    k0, k1, k2, kx = jax.random.split(key, 4)

    in_channel, out_channel = 4, 8
    params = [
        make_layer_params(k0, in_channel, out_channel),
        make_layer_params(k1, out_channel, out_channel),
        make_layer_params(k2, out_channel, out_channel),
    ]
    x = jax.random.normal(kx, (2, in_channel, 16, 16), jnp.float32)  # NCHW

    out = jax.block_until_ready(encoder_block_forward(x, params))
    assert out.shape == (2, out_channel, 8, 8), out.shape

    ref = jax.block_until_ready(_reference_forward(x, params))
    max_err = float(jnp.max(jnp.abs(out - ref)))
    assert max_err < 0.3, f"max abs err vs f32 reference: {max_err}"
    print("KERNEL_OK")
</pallas_src>

<mosaic_0001>
module attributes {stable_mosaic.version = 11 : i64} {
  func.func @_encoder_block_kernel(%arg0: i32, %arg1: memref<128x128xbf16, #tpu.memory_space<vmem>>, %arg2: memref<128x128xbf16, #tpu.memory_space<vmem>>, %arg3: memref<1152x128xbf16, #tpu.memory_space<vmem>>, %arg4: memref<1152x128xbf16, #tpu.memory_space<vmem>>, %arg5: memref<3x1x128xf32, #tpu.memory_space<vmem>>, %arg6: memref<3x1x128xf32, #tpu.memory_space<vmem>>, %arg7: memref<128x128xf32, #tpu.memory_space<vmem>>, %arg8: memref<2x10x16x128xf32, #tpu.memory_space<vmem>>, %arg9: memref<128x1152xbf16, #tpu.memory_space<vmem>>) attributes {dimension_semantics = [#tpu.dimension_semantics<arbitrary>], iteration_bounds = array<i64: 1>, scalar_prefetch = 0 : i64, scratch_operands = 2 : i64, tpu.core_type = #tpu.core_type<tc>, window_params = [{pipeline_mode = #tpu.pipeline_mode<synchronous>, transform_indices = @transform_0, window_bounds = array<i64: 128, 128>}, {pipeline_mode = #tpu.pipeline_mode<synchronous>, transform_indices = @transform_1, window_bounds = array<i64: 128, 128>}, {pipeline_mode = #tpu.pipeline_mode<synchronous>, transform_indices = @transform_2, window_bounds = array<i64: 1152, 128>}, {pipeline_mode = #tpu.pipeline_mode<synchronous>, transform_indices = @transform_3, window_bounds = array<i64: 1152, 128>}, {pipeline_mode = #tpu.pipeline_mode<synchronous>, transform_indices = @transform_4, window_bounds = array<i64: 3, 1, 128>}, {pipeline_mode = #tpu.pipeline_mode<synchronous>, transform_indices = @transform_5, window_bounds = array<i64: 3, 1, 128>}, {pipeline_mode = #tpu.pipeline_mode<synchronous>, transform_indices = @transform_6, window_bounds = array<i64: 128, 128>}]} {
    %c0 = arith.constant 0 : index
    %c0_0 = arith.constant 0 : index
    %0 = vector.load %arg1[%c0, %c0_0] : memref<128x128xbf16, #tpu.memory_space<vmem>>, vector<128x128xbf16>
    %c0_1 = arith.constant 0 : index
    %c0_2 = arith.constant 0 : index
    %1 = vector.load %arg2[%c0_1, %c0_2] : memref<128x128xbf16, #tpu.memory_space<vmem>>, vector<128x128xbf16>
    %cst = arith.constant dense<0.000000e+00> : vector<128x128xf32>
    %2 = tpu.matmul %0, %1, %cst {dimension_numbers = #tpu.dot_dimension_numbers<[1], [0], [0], [1], [0, 0, 1, 1], [], []>} : vector<128x128xbf16>, vector<128x128xbf16>, vector<128x128xf32> -> vector<128x128xf32>
    %c0_3 = arith.constant 0 : index
    %c0_4 = arith.constant 0 : index
    %c0_5 = arith.constant 0 : index
    %3 = vector.load %arg5[%c0_3, %c0_4, %c0_5] : memref<3x1x128xf32, #tpu.memory_space<vmem>>, vector<1x1x128xf32>
    %4 = vector.shape_cast %3 : vector<1x1x128xf32> to vector<1x128xf32>
    %c0_6 = arith.constant 0 : index
    %c0_7 = arith.constant 0 : index
    %c0_8 = arith.constant 0 : index
    %5 = vector.load %arg6[%c0_6, %c0_7, %c0_8] : memref<3x1x128xf32, #tpu.memory_space<vmem>>, vector<1x1x128xf32>
    %6 = vector.shape_cast %5 : vector<1x1x128xf32> to vector<1x128xf32>
    %cst_9 = arith.constant dense<0.000000e+00> : vector<128xf32>
    %7 = vector.multi_reduction <add>, %2, %cst_9 [0] : vector<128x128xf32> to vector<128xf32>
    %8 = vector.shape_cast %7 : vector<128xf32> to vector<1x128xf32>
    %cst_10 = arith.constant 7.812500e-03 : f32
    %9 = vector.broadcast %cst_10 : f32 to vector<1x128xf32>
    %10 = arith.mulf %8, %9 : vector<1x128xf32>
    %11 = vector.broadcast %10 : vector<1x128xf32> to vector<128x128xf32>
    %12 = arith.subf %2, %11 : vector<128x128xf32>
    %13 = arith.mulf %12, %12 : vector<128x128xf32>
    %cst_11 = arith.constant dense<0.000000e+00> : vector<128xf32>
    %14 = vector.multi_reduction <add>, %13, %cst_11 [0] : vector<128x128xf32> to vector<128xf32>
    %15 = vector.shape_cast %14 : vector<128xf32> to vector<1x128xf32>
    %cst_12 = arith.constant 7.812500e-03 : f32
    %16 = vector.broadcast %cst_12 : f32 to vector<1x128xf32>
    %17 = arith.mulf %15, %16 : vector<1x128xf32>
    %cst_13 = arith.constant 9.99999974E-6 : f32
    %18 = vector.broadcast %cst_13 : f32 to vector<1x128xf32>
    %19 = arith.addf %17, %18 : vector<1x128xf32>
    %20 = math.rsqrt %19 : vector<1x128xf32>
    %21 = arith.mulf %4, %20 : vector<1x128xf32>
    %22 = vector.broadcast %21 : vector<1x128xf32> to vector<128x128xf32>
    %23 = arith.mulf %12, %22 : vector<128x128xf32>
    %24 = vector.broadcast %6 : vector<1x128xf32> to vector<128x128xf32>
    %25 = arith.addf %23, %24 : vector<128x128xf32>
    %cst_14 = arith.constant 0.000000e+00 : f32
    %26 = vector.broadcast %cst_14 : f32 to vector<128x128xf32>
    %27 = arith.maximumf %25, %26 : vector<128x128xf32>
    %cst_15 = arith.constant 0.000000e+00 : f32
    %28 = vector.broadcast %cst_15 : f32 to vector<2x1x16x128xf32>
    %c0_16 = arith.constant 0 : index
    %c0_17 = arith.constant 0 : index
    %c0_18 = arith.constant 0 : index
    %c0_19 = arith.constant 0 : index
    %29 = vector.load %arg8[%c0_16, %c0_17, %c0_18, %c0_19] : memref<2x10x16x128xf32, #tpu.memory_space<vmem>>, vector<2x1x16x128xf32>
    tpu.vector_store %arg8[%c0_16, %c0_17, %c0_18, %c0_19], %28 {strides = array<i32>} : memref<2x10x16x128xf32, #tpu.memory_space<vmem>>, vector<2x1x16x128xf32>,
    %cst_20 = arith.constant 0.000000e+00 : f32
    %30 = vector.broadcast %cst_20 : f32 to vector<2x1x16x128xf32>
    %c0_21 = arith.constant 0 : index
    %c9 = arith.constant 9 : index
    %c0_22 = arith.constant 0 : index
    %c0_23 = arith.constant 0 : index
    %31 = vector.load %arg8[%c0_21, %c9, %c0_22, %c0_23] : memref<2x10x16x128xf32, #tpu.memory_space<vmem>>, vector<2x1x16x128xf32>
    tpu.vector_store %arg8[%c0_21, %c9, %c0_22, %c0_23], %30 {strides = array<i32>} : memref<2x10x16x128xf32, #tpu.memory_space<vmem>>, vector<2x1x16x128xf32>,
    %32 = vector.shape_cast %27 : vector<128x128xf32> to vector<16x8x128xf32>
    %cst_24 = arith.constant 0.000000e+00 : f32
    %33 = vector.broadcast %cst_24 : f32 to vector<16x8x128xf32>
    %34 = tpu.concatenate %32, %33 in 1 : vector<16x8x128xf32>, vector<16x8x128xf32> -> vector<16x16x128xf32>
    %c1_i32 = arith.constant 1 : i32
    %35 = tpu.dynamic_rotate %34 by %c1_i32 dim 1 : vector<16x16x128xf32>, i32 -> vector<16x16x128xf32>
    %36 = vector.shape_cast %35 : vector<16x16x128xf32> to vector<2x8x16x128xf32>
    %c0_25 = arith.constant 0 : index
    %c1 = arith.constant 1 : index
    %c0_26 = arith.constant 0 : index
    %c0_27 = arith.constant 0 : index
    %37 = vector.load %arg8[%c0_25, %c1, %c0_26, %c0_27] : memref<2x10x16x128xf32, #tpu.memory_space<vmem>>, vector<2x8x16x128xf32>
    tpu.vector_store %arg8[%c0_25, %c1, %c0_26, %c0_27], %36 {strides = array<i32>} : memref<2x10x16x128xf32, #tpu.memory_space<vmem>>, vector<2x8x16x128xf32>,
    %c0_28 = arith.constant 0 : index
    %c0_29 = arith.constant 0 : index
    %c0_30 = arith.constant 0 : index
    %c0_31 = arith.constant 0 : index
    %38 = vector.load %arg8[%c0_28, %c0_29, %c0_30, %c0_31] : memref<2x10x16x128xf32, #tpu.memory_space<vmem>>, vector<2x8x16x128xf32>
    %39 = vector.shape_cast %38 : vector<2x8x16x128xf32> to vector<16x16x128xf32>
    %40 = vector.extract_strided_slice %39 {offsets = [0, 0, 0], sizes = [16, 8, 128], strides = [1, 1, 1]} : vector<16x16x128xf32> to vector<16x8x128xf32>
    %41 = vector.shape_cast %40 : vector<16x8x128xf32> to vector<128x128xf32>
    %42 = arith.truncf %41 : vector<128x128xf32> to vector<128x128xbf16>
    %c0_32 = arith.constant 0 : index
    %c0_33 = arith.constant 0 : index
    %43 = vector.load %arg9[%c0_32, %c0_33] : memref<128x1152xbf16, #tpu.memory_space<vmem>>, vector<128x128xbf16>
    tpu.vector_store %arg9[%c0_32, %c0_33], %42 {strides = array<i32>} : memref<128x1152xbf16, #tpu.memory_space<vmem>>, vector<128x128xbf16>,
    %c15_i32 = arith.constant 15 : i32
    %44 = tpu.dynamic_rotate %39 by %c15_i32 dim 1 : vector<16x16x128xf32>, i32 -> vector<16x16x128xf32>
    %45 = vector.extract_strided_slice %44 {offsets = [0, 0, 0], sizes = [16, 8, 128], strides = [1, 1, 1]} : vector<16x16x128xf32> to vector<16x8x128xf32>
    %46 = vector.shape_cast %45 : vector<16x8x128xf32> to vector<128x128xf32>
    %47 = arith.truncf %46 : vector<128x128xf32> to vector<128x128xbf16>
    %c0_34 = arith.constant 0 : index
    %c128 = arith.constant 128 : index
    %48 = vector.load %arg9[%c0_34, %c128] : memref<128x1152xbf16, #tpu.memory_space<vmem>>, vector<128x128xbf16>
    tpu.vector_store %arg9[%c0_34, %c128], %47 {strides = array<i32>} : memref<128x1152xbf16, #tpu.memory_space<vmem>>, vector<128x128xbf16>,
    %c14_i32 = arith.constant 14 : i32
    %49 = tpu.dynamic_rotate %39 by %c14_i32 dim 1 : vector<16x16x128xf32>, i32 -> vector<16x16x128xf32>
    %50 = vector.extract_strided_slice %49 {offsets = [0, 0, 0], sizes = [16, 8, 128], strides = [1, 1, 1]} : vector<16x16x128xf32> to vector<16x8x128xf32>
    %51 = vector.shape_cast %50 : vector<16x8x128xf32> to vector<128x128xf32>
    %52 = arith.truncf %51 : vector<128x128xf32> to vector<128x128xbf16>
    %c0_35 = arith.constant 0 : index
    %c256 = arith.constant 256 : index
    %53 = vector.load %arg9[%c0_35, %c256] : memref<128x1152xbf16, #tpu.memory_space<vmem>>, vector<128x128xbf16>
    tpu.vector_store %arg9[%c0_35, %c256], %52 {strides = array<i32>} : memref<128x1152xbf16, #tpu.memory_space<vmem>>, vector<128x128xbf16>,
    %c0_36 = arith.constant 0 : index
    %c1_37 = arith.constant 1 : index
    %c0_38 = arith.constant 0 : index
    %c0_39 = arith.constant 0 : index
    %54 = vector.load %arg8[%c0_36, %c1_37, %c0_38, %c0_39] : memref<2x10x16x128xf32, #tpu.memory_space<vmem>>, vector<2x8x16x128xf32>
    %55 = vector.shape_cast %54 : vector<2x8x16x128xf32> to vector<16x16x128xf32>
    %56 = vector.extract_strided_slice %55 {offsets = [0, 0, 0], sizes = [16, 8, 128], strides = [1, 1, 1]} : vector<16x16x128xf32> to vector<16x8x128xf32>
    %57 = vector.shape_cast %56 : vector<16x8x128xf32> to vector<128x128xf32>
    %58 = arith.truncf %57 : vector<128x128xf32> to vector<128x128xbf16>
    %c0_40 = arith.constant 0 : index
    %c384 = arith.constant 384 : index
    %59 = vector.load %arg9[%c0_40, %c384] : memref<128x1152xbf16, #tpu.memory_space<vmem>>, vector<128x128xbf16>
    tpu.vector_store %arg9[%c0_40, %c384], %58 {strides = array<i32>} : memref<128x1152xbf16, #tpu.memory_space<vmem>>, vector<128x128xbf16>,
    %c15_i32_41 = arith.constant 15 : i32
    %60 = tpu.dynamic_rotate %55 by %c15_i32_41 dim 1 : vector<16x16x128xf32>, i32 -> vector<16x16x128xf32>
    %61 = vector.extract_strided_slice %60 {offsets = [0, 0, 0], sizes = [16, 8, 128], strides = [1, 1, 1]} : vector<16x16x128xf32> to vector<16x8x128xf32>
    %62 = vector.shape_cast %61 : vector<16x8x128xf32> to vector<128x128xf32>
    %63 = arith.truncf %62 : vector<128x128xf32> to vector<128x128xbf16>
    %c0_42 = arith.constant 0 : index
    %c512 = arith.constant 512 : index
    %64 = vector.load %arg9[%c0_42, %c512] : memref<128x1152xbf16, #tpu.memory_space<vmem>>, vector<128x128xbf16>
    tpu.vector_store %arg9[%c0_42, %c512], %63 {strides = array<i32>} : memref<128x1152xbf16, #tpu.memory_space<vmem>>, vector<128x128xbf16>,
    %c14_i32_43 = arith.constant 14 : i32
    %65 = tpu.dynamic_rotate %55 by %c14_i32_43 dim 1 : vector<16x16x128xf32>, i32 -> vector<16x16x128xf32>
    %66 = vector.extract_strided_slice %65 {offsets = [0, 0, 0], sizes = [16, 8, 128], strides = [1, 1, 1]} : vector<16x16x128xf32> to vector<16x8x128xf32>
    %67 = vector.shape_cast %66 : vector<16x8x128xf32> to vector<128x128xf32>
    %68 = arith.truncf %67 : vector<128x128xf32> to vector<128x128xbf16>
    %c0_44 = arith.constant 0 : index
    %c640 = arith.constant 640 : index
    %69 = vector.load %arg9[%c0_44, %c640] : memref<128x1152xbf16, #tpu.memory_space<vmem>>, vector<128x128xbf16>
    tpu.vector_store %arg9[%c0_44, %c640], %68 {strides = array<i32>} : memref<128x1152xbf16, #tpu.memory_space<vmem>>, vector<128x128xbf16>,
    %c0_45 = arith.constant 0 : index
    %c2 = arith.constant 2 : index
    %c0_46 = arith.constant 0 : index
    %c0_47 = arith.constant 0 : index
    %70 = vector.load %arg8[%c0_45, %c2, %c0_46, %c0_47] : memref<2x10x16x128xf32, #tpu.memory_space<vmem>>, vector<2x8x16x128xf32>
    %71 = vector.shape_cast %70 : vector<2x8x16x128xf32> to vector<16x16x128xf32>
    %72 = vector.extract_strided_slice %71 {offsets = [0, 0, 0], sizes = [16, 8, 128], strides = [1, 1, 1]} : vector<16x16x128xf32> to vector<16x8x128xf32>
    %73 = vector.shape_cast %72 : vector<16x8x128xf32> to vector<128x128xf32>
    %74 = arith.truncf %73 : vector<128x128xf32> to vector<128x128xbf16>
    %c0_48 = arith.constant 0 : index
    %c768 = arith.constant 768 : index
    %75 = vector.load %arg9[%c0_48, %c768] : memref<128x1152xbf16, #tpu.memory_space<vmem>>, vector<128x128xbf16>
    tpu.vector_store %arg9[%c0_48, %c768], %74 {strides = array<i32>} : memref<128x1152xbf16, #tpu.memory_space<vmem>>, vector<128x128xbf16>,
    %c15_i32_49 = arith.constant 15 : i32
    %76 = tpu.dynamic_rotate %71 by %c15_i32_49 dim 1 : vector<16x16x128xf32>, i32 -> vector<16x16x128xf32>
    %77 = vector.extract_strided_slice %76 {offsets = [0, 0, 0], sizes = [16, 8, 128], strides = [1, 1, 1]} : vector<16x16x128xf32> to vector<16x8x128xf32>
    %78 = vector.shape_cast %77 : vector<16x8x128xf32> to vector<128x128xf32>
    %79 = arith.truncf %78 : vector<128x128xf32> to vector<128x128xbf16>
    %c0_50 = arith.constant 0 : index
    %c896 = arith.constant 896 : index
    %80 = vector.load %arg9[%c0_50, %c896] : memref<128x1152xbf16, #tpu.memory_space<vmem>>, vector<128x128xbf16>
    tpu.vector_store %arg9[%c0_50, %c896], %79 {strides = array<i32>} : memref<128x1152xbf16, #tpu.memory_space<vmem>>, vector<128x128xbf16>,
    %c14_i32_51 = arith.constant 14 : i32
    %81 = tpu.dynamic_rotate %71 by %c14_i32_51 dim 1 : vector<16x16x128xf32>, i32 -> vector<16x16x128xf32>
    %82 = vector.extract_strided_slice %81 {offsets = [0, 0, 0], sizes = [16, 8, 128], strides = [1, 1, 1]} : vector<16x16x128xf32> to vector<16x8x128xf32>
    %83 = vector.shape_cast %82 : vector<16x8x128xf32> to vector<128x128xf32>
    %84 = arith.truncf %83 : vector<128x128xf32> to vector<128x128xbf16>
    %c0_52 = arith.constant 0 : index
    %c1024 = arith.constant 1024 : index
    %85 = vector.load %arg9[%c0_52, %c1024] : memref<128x1152xbf16, #tpu.memory_space<vmem>>, vector<128x128xbf16>
    tpu.vector_store %arg9[%c0_52, %c1024], %84 {strides = array<i32>} : memref<128x1152xbf16, #tpu.memory_space<vmem>>, vector<128x128xbf16>,
    %c0_53 = arith.constant 0 : index
    %c0_54 = arith.constant 0 : index
    %86 = vector.load %arg9[%c0_53, %c0_54] : memref<128x1152xbf16, #tpu.memory_space<vmem>>, vector<128x1152xbf16>
    %c0_55 = arith.constant 0 : index
    %c0_56 = arith.constant 0 : index
    %87 = vector.load %arg3[%c0_55, %c0_56] : memref<1152x128xbf16, #tpu.memory_space<vmem>>, vector<1152x128xbf16>
    %cst_57 = arith.constant dense<0.000000e+00> : vector<128x128xf32>
    %88 = tpu.matmul %86, %87, %cst_57 {dimension_numbers = #tpu.dot_dimension_numbers<[1], [0], [0], [1], [0, 0, 1, 1], [], []>} : vector<128x1152xbf16>, vector<1152x128xbf16>, vector<128x128xf32> -> vector<128x128xf32>
    %c1_58 = arith.constant 1 : index
    %c0_59 = arith.constant 0 : index
    %c0_60 = arith.constant 0 : index
    %89 = vector.load %arg5[%c1_58, %c0_59, %c0_60] : memref<3x1x128xf32, #tpu.memory_space<vmem>>, vector<1x1x128xf32>
    %90 = vector.shape_cast %89 : vector<1x1x128xf32> to vector<1x128xf32>
    %c1_61 = arith.constant 1 : index
    %c0_62 = arith.constant 0 : index
    %c0_63 = arith.constant 0 : index
    %91 = vector.load %arg6[%c1_61, %c0_62, %c0_63] : memref<3x1x128xf32, #tpu.memory_space<vmem>>, vector<1x1x128xf32>
    %92 = vector.shape_cast %91 : vector<1x1x128xf32> to vector<1x128xf32>
    %cst_64 = arith.constant dense<0.000000e+00> : vector<128xf32>
    %93 = vector.multi_reduction <add>, %88, %cst_64 [0] : vector<128x128xf32> to vector<128xf32>
    %94 = vector.shape_cast %93 : vector<128xf32> to vector<1x128xf32>
    %cst_65 = arith.constant 7.812500e-03 : f32
    %95 = vector.broadcast %cst_65 : f32 to vector<1x128xf32>
    %96 = arith.mulf %94, %95 : vector<1x128xf32>
    %97 = vector.broadcast %96 : vector<1x128xf32> to vector<128x128xf32>
    %98 = arith.subf %88, %97 : vector<128x128xf32>
    %99 = arith.mulf %98, %98 : vector<128x128xf32>
    %cst_66 = arith.constant dense<0.000000e+00> : vector<128xf32>
    %100 = vector.multi_reduction <add>, %99, %cst_66 [0] : vector<128x128xf32> to vector<128xf32>
    %101 = vector.shape_cast %100 : vector<128xf32> to vector<1x128xf32>
    %cst_67 = arith.constant 7.812500e-03 : f32
    %102 = vector.broadcast %cst_67 : f32 to vector<1x128xf32>
    %103 = arith.mulf %101, %102 : vector<1x128xf32>
    %cst_68 = arith.constant 9.99999974E-6 : f32
    %104 = vector.broadcast %cst_68 : f32 to vector<1x128xf32>
    %105 = arith.addf %103, %104 : vector<1x128xf32>
    %106 = math.rsqrt %105 : vector<1x128xf32>
    %107 = arith.mulf %90, %106 : vector<1x128xf32>
    %108 = vector.broadcast %107 : vector<1x128xf32> to vector<128x128xf32>
    %109 = arith.mulf %98, %108 : vector<128x128xf32>
    %110 = vector.broadcast %92 : vector<1x128xf32> to vector<128x128xf32>
    %111 = arith.addf %109, %110 : vector<128x128xf32>
    %cst_69 = arith.constant 0.000000e+00 : f32
    %112 = vector.broadcast %cst_69 : f32 to vector<128x128xf32>
    %113 = arith.maximumf %111, %112 : vector<128x128xf32>
    %114 = vector.shape_cast %113 : vector<128x128xf32> to vector<16x8x128xf32>
    %cst_70 = arith.constant 0.000000e+00 : f32
    %115 = vector.broadcast %cst_70 : f32 to vector<16x8x128xf32>
    %116 = tpu.concatenate %114, %115 in 1 : vector<16x8x128xf32>, vector<16x8x128xf32> -> vector<16x16x128xf32>
    %c1_i32_71 = arith.constant 1 : i32
    %117 = tpu.dynamic_rotate %116 by %c1_i32_71 dim 1 : vector<16x16x128xf32>, i32 -> vector<16x16x128xf32>
    %118 = vector.shape_cast %117 : vector<16x16x128xf32> to vector<2x8x16x128xf32>
    %c0_72 = arith.constant 0 : index
    %c1_73 = arith.constant 1 : index
    %c0_74 = arith.constant 0 : index
    %c0_75 = arith.constant 0 : index
    %119 = vector.load %arg8[%c0_72, %c1_73, %c0_74, %c0_75] : memref<2x10x16x128xf32, #tpu.memory_space<vmem>>, vector<2x8x16x128xf32>
    tpu.vector_store %arg8[%c0_72, %c1_73, %c0_74, %c0_75], %118 {strides = array<i32>} : memref<2x10x16x128xf32, #tpu.memory_space<vmem>>, vector<2x8x16x128xf32>,
    %c0_76 = arith.constant 0 : index
    %c0_77 = arith.constant 0 : index
    %c0_78 = arith.constant 0 : index
    %c0_79 = arith.constant 0 : index
    %120 = vector.load %arg8[%c0_76, %c0_77, %c0_78, %c0_79] : memref<2x10x16x128xf32, #tpu.memory_space<vmem>>, vector<2x8x16x128xf32>
    %121 = vector.shape_cast %120 : vector<2x8x16x128xf32> to vector<16x16x128xf32>
    %122 = vector.extract_strided_slice %121 {offsets = [0, 0, 0], sizes = [16, 8, 128], strides = [1, 1, 1]} : vector<16x16x128xf32> to vector<16x8x128xf32>
    %123 = vector.shape_cast %122 : vector<16x8x128xf32> to vector<128x128xf32>
    %124 = arith.truncf %123 : vector<128x128xf32> to vector<128x128xbf16>
    %c0_80 = arith.constant 0 : index
    %c0_81 = arith.constant 0 : index
    %125 = vector.load %arg9[%c0_80, %c0_81] : memref<128x1152xbf16, #tpu.memory_space<vmem>>, vector<128x128xbf16>
    tpu.vector_store %arg9[%c0_80, %c0_81], %124 {strides = array<i32>} : memref<128x1152xbf16, #tpu.memory_space<vmem>>, vector<128x128xbf16>,
    %c15_i32_82 = arith.constant 15 : i32
    %126 = tpu.dynamic_rotate %121 by %c15_i32_82 dim 1 : vector<16x16x128xf32>, i32 -> vector<16x16x128xf32>
    %127 = vector.extract_strided_slice %126 {offsets = [0, 0, 0], sizes = [16, 8, 128], strides = [1, 1, 1]} : vector<16x16x128xf32> to vector<16x8x128xf32>
    %128 = vector.shape_cast %127 : vector<16x8x128xf32> to vector<128x128xf32>
    %129 = arith.truncf %128 : vector<128x128xf32> to vector<128x128xbf16>
    %c0_83 = arith.constant 0 : index
    %c128_84 = arith.constant 128 : index
    %130 = vector.load %arg9[%c0_83, %c128_84] : memref<128x1152xbf16, #tpu.memory_space<vmem>>, vector<128x128xbf16>
    tpu.vector_store %arg9[%c0_83, %c128_84], %129 {strides = array<i32>} : memref<128x1152xbf16, #tpu.memory_space<vmem>>, vector<128x128xbf16>,
    %c14_i32_85 = arith.constant 14 : i32
    %131 = tpu.dynamic_rotate %121 by %c14_i32_85 dim 1 : vector<16x16x128xf32>, i32 -> vector<16x16x128xf32>
    %132 = vector.extract_strided_slice %131 {offsets = [0, 0, 0], sizes = [16, 8, 128], strides = [1, 1, 1]} : vector<16x16x128xf32> to vector<16x8x128xf32>
    %133 = vector.shape_cast %132 : vector<16x8x128xf32> to vector<128x128xf32>
    %134 = arith.truncf %133 : vector<128x128xf32> to vector<128x128xbf16>
    %c0_86 = arith.constant 0 : index
    %c256_87 = arith.constant 256 : index
    %135 = vector.load %arg9[%c0_86, %c256_87] : memref<128x1152xbf16, #tpu.memory_space<vmem>>, vector<128x128xbf16>
    tpu.vector_store %arg9[%c0_86, %c256_87], %134 {strides = array<i32>} : memref<128x1152xbf16, #tpu.memory_space<vmem>>, vector<128x128xbf16>,
    %c0_88 = arith.constant 0 : index
    %c1_89 = arith.constant 1 : index
    %c0_90 = arith.constant 0 : index
    %c0_91 = arith.constant 0 : index
    %136 = vector.load %arg8[%c0_88, %c1_89, %c0_90, %c0_91] : memref<2x10x16x128xf32, #tpu.memory_space<vmem>>, vector<2x8x16x128xf32>
    %137 = vector.shape_cast %136 : vector<2x8x16x128xf32> to vector<16x16x128xf32>
    %138 = vector.extract_strided_slice %137 {offsets = [0, 0, 0], sizes = [16, 8, 128], strides = [1, 1, 1]} : vector<16x16x128xf32> to vector<16x8x128xf32>
    %139 = vector.shape_cast %138 : vector<16x8x128xf32> to vector<128x128xf32>
    %140 = arith.truncf %139 : vector<128x128xf32> to vector<128x128xbf16>
    %c0_92 = arith.constant 0 : index
    %c384_93 = arith.constant 384 : index
    %141 = vector.load %arg9[%c0_92, %c384_93] : memref<128x1152xbf16, #tpu.memory_space<vmem>>, vector<128x128xbf16>
    tpu.vector_store %arg9[%c0_92, %c384_93], %140 {strides = array<i32>} : memref<128x1152xbf16, #tpu.memory_space<vmem>>, vector<128x128xbf16>,
    %c15_i32_94 = arith.constant 15 : i32
    %142 = tpu.dynamic_rotate %137 by %c15_i32_94 dim 1 : vector<16x16x128xf32>, i32 -> vector<16x16x128xf32>
    %143 = vector.extract_strided_slice %142 {offsets = [0, 0, 0], sizes = [16, 8, 128], strides = [1, 1, 1]} : vector<16x16x128xf32> to vector<16x8x128xf32>
    %144 = vector.shape_cast %143 : vector<16x8x128xf32> to vector<128x128xf32>
    %145 = arith.truncf %144 : vector<128x128xf32> to vector<128x128xbf16>
    %c0_95 = arith.constant 0 : index
    %c512_96 = arith.constant 512 : index
    %146 = vector.load %arg9[%c0_95, %c512_96] : memref<128x1152xbf16, #tpu.memory_space<vmem>>, vector<128x128xbf16>
    tpu.vector_store %arg9[%c0_95, %c512_96], %145 {strides = array<i32>} : memref<128x1152xbf16, #tpu.memory_space<vmem>>, vector<128x128xbf16>,
    %c14_i32_97 = arith.constant 14 : i32
    %147 = tpu.dynamic_rotate %137 by %c14_i32_97 dim 1 : vector<16x16x128xf32>, i32 -> vector<16x16x128xf32>
    %148 = vector.extract_strided_slice %147 {offsets = [0, 0, 0], sizes = [16, 8, 128], strides = [1, 1, 1]} : vector<16x16x128xf32> to vector<16x8x128xf32>
    %149 = vector.shape_cast %148 : vector<16x8x128xf32> to vector<128x128xf32>
    %150 = arith.truncf %149 : vector<128x128xf32> to vector<128x128xbf16>
    %c0_98 = arith.constant 0 : index
    %c640_99 = arith.constant 640 : index
    %151 = vector.load %arg9[%c0_98, %c640_99] : memref<128x1152xbf16, #tpu.memory_space<vmem>>, vector<128x128xbf16>
    tpu.vector_store %arg9[%c0_98, %c640_99], %150 {strides = array<i32>} : memref<128x1152xbf16, #tpu.memory_space<vmem>>, vector<128x128xbf16>,
    %c0_100 = arith.constant 0 : index
    %c2_101 = arith.constant 2 : index
    %c0_102 = arith.constant 0 : index
    %c0_103 = arith.constant 0 : index
    %152 = vector.load %arg8[%c0_100, %c2_101, %c0_102, %c0_103] : memref<2x10x16x128xf32, #tpu.memory_space<vmem>>, vector<2x8x16x128xf32>
    %153 = vector.shape_cast %152 : vector<2x8x16x128xf32> to vector<16x16x128xf32>
    %154 = vector.extract_strided_slice %153 {offsets = [0, 0, 0], sizes = [16, 8, 128], strides = [1, 1, 1]} : vector<16x16x128xf32> to vector<16x8x128xf32>
    %155 = vector.shape_cast %154 : vector<16x8x128xf32> to vector<128x128xf32>
    %156 = arith.truncf %155 : vector<128x128xf32> to vector<128x128xbf16>
    %c0_104 = arith.constant 0 : index
    %c768_105 = arith.constant 768 : index
    %157 = vector.load %arg9[%c0_104, %c768_105] : memref<128x1152xbf16, #tpu.memory_space<vmem>>, vector<128x128xbf16>
    tpu.vector_store %arg9[%c0_104, %c768_105], %156 {strides = array<i32>} : memref<128x1152xbf16, #tpu.memory_space<vmem>>, vector<128x128xbf16>,
    %c15_i32_106 = arith.constant 15 : i32
    %158 = tpu.dynamic_rotate %153 by %c15_i32_106 dim 1 : vector<16x16x128xf32>, i32 -> vector<16x16x128xf32>
    %159 = vector.extract_strided_slice %158 {offsets = [0, 0, 0], sizes = [16, 8, 128], strides = [1, 1, 1]} : vector<16x16x128xf32> to vector<16x8x128xf32>
    %160 = vector.shape_cast %159 : vector<16x8x128xf32> to vector<128x128xf32>
    %161 = arith.truncf %160 : vector<128x128xf32> to vector<128x128xbf16>
    %c0_107 = arith.constant 0 : index
    %c896_108 = arith.constant 896 : index
    %162 = vector.load %arg9[%c0_107, %c896_108] : memref<128x1152xbf16, #tpu.memory_space<vmem>>, vector<128x128xbf16>
    tpu.vector_store %arg9[%c0_107, %c896_108], %161 {strides = array<i32>} : memref<128x1152xbf16, #tpu.memory_space<vmem>>, vector<128x128xbf16>,
    %c14_i32_109 = arith.constant 14 : i32
    %163 = tpu.dynamic_rotate %153 by %c14_i32_109 dim 1 : vector<16x16x128xf32>, i32 -> vector<16x16x128xf32>
    %164 = vector.extract_strided_slice %163 {offsets = [0, 0, 0], sizes = [16, 8, 128], strides = [1, 1, 1]} : vector<16x16x128xf32> to vector<16x8x128xf32>
    %165 = vector.shape_cast %164 : vector<16x8x128xf32> to vector<128x128xf32>
    %166 = arith.truncf %165 : vector<128x128xf32> to vector<128x128xbf16>
    %c0_110 = arith.constant 0 : index
    %c1024_111 = arith.constant 1024 : index
    %167 = vector.load %arg9[%c0_110, %c1024_111] : memref<128x1152xbf16, #tpu.memory_space<vmem>>, vector<128x128xbf16>
    tpu.vector_store %arg9[%c0_110, %c1024_111], %166 {strides = array<i32>} : memref<128x1152xbf16, #tpu.memory_space<vmem>>, vector<128x128xbf16>,
    %c0_112 = arith.constant 0 : index
    %c0_113 = arith.constant 0 : index
    %168 = vector.load %arg9[%c0_112, %c0_113] : memref<128x1152xbf16, #tpu.memory_space<vmem>>, vector<128x1152xbf16>
    %c0_114 = arith.constant 0 : index
    %c0_115 = arith.constant 0 : index
    %169 = vector.load %arg4[%c0_114, %c0_115] : memref<1152x128xbf16, #tpu.memory_space<vmem>>, vector<1152x128xbf16>
    %cst_116 = arith.constant dense<0.000000e+00> : vector<128x128xf32>
    %170 = tpu.matmul %168, %169, %cst_116 {dimension_numbers = #tpu.dot_dimension_numbers<[1], [0], [0], [1], [0, 0, 1, 1], [], []>} : vector<128x1152xbf16>, vector<1152x128xbf16>, vector<128x128xf32> -> vector<128x128xf32>
    %c2_117 = arith.constant 2 : index
    %c0_118 = arith.constant 0 : index
    %c0_119 = arith.constant 0 : index
    %171 = vector.load %arg5[%c2_117, %c0_118, %c0_119] : memref<3x1x128xf32, #tpu.memory_space<vmem>>, vector<1x1x128xf32>
    %172 = vector.shape_cast %171 : vector<1x1x128xf32> to vector<1x128xf32>
    %c2_120 = arith.constant 2 : index
    %c0_121 = arith.constant 0 : index
    %c0_122 = arith.constant 0 : index
    %173 = vector.load %arg6[%c2_120, %c0_121, %c0_122] : memref<3x1x128xf32, #tpu.memory_space<vmem>>, vector<1x1x128xf32>
    %174 = vector.shape_cast %173 : vector<1x1x128xf32> to vector<1x128xf32>
    %cst_123 = arith.constant dense<0.000000e+00> : vector<128xf32>
    %175 = vector.multi_reduction <add>, %170, %cst_123 [0] : vector<128x128xf32> to vector<128xf32>
    %176 = vector.shape_cast %175 : vector<128xf32> to vector<1x128xf32>
    %cst_124 = arith.constant 7.812500e-03 : f32
    %177 = vector.broadcast %cst_124 : f32 to vector<1x128xf32>
    %178 = arith.mulf %176, %177 : vector<1x128xf32>
    %179 = vector.broadcast %178 : vector<1x128xf32> to vector<128x128xf32>
    %180 = arith.subf %170, %179 : vector<128x128xf32>
    %181 = arith.mulf %180, %180 : vector<128x128xf32>
    %cst_125 = arith.constant dense<0.000000e+00> : vector<128xf32>
    %182 = vector.multi_reduction <add>, %181, %cst_125 [0] : vector<128x128xf32> to vector<128xf32>
    %183 = vector.shape_cast %182 : vector<128xf32> to vector<1x128xf32>
    %cst_126 = arith.constant 7.812500e-03 : f32
    %184 = vector.broadcast %cst_126 : f32 to vector<1x128xf32>
    %185 = arith.mulf %183, %184 : vector<1x128xf32>
    %cst_127 = arith.constant 9.99999974E-6 : f32
    %186 = vector.broadcast %cst_127 : f32 to vector<1x128xf32>
    %187 = arith.addf %185, %186 : vector<1x128xf32>
    %188 = math.rsqrt %187 : vector<1x128xf32>
    %189 = arith.mulf %172, %188 : vector<1x128xf32>
    %190 = vector.broadcast %189 : vector<1x128xf32> to vector<128x128xf32>
    %191 = arith.mulf %180, %190 : vector<128x128xf32>
    %192 = vector.broadcast %174 : vector<1x128xf32> to vector<128x128xf32>
    %193 = arith.addf %191, %192 : vector<128x128xf32>
    %cst_128 = arith.constant 0.000000e+00 : f32
    %194 = vector.broadcast %cst_128 : f32 to vector<128x128xf32>
    %195 = arith.maximumf %193, %194 : vector<128x128xf32>
    %c0_129 = arith.constant 0 : index
    %c0_130 = arith.constant 0 : index
    %196 = vector.load %arg7[%c0_129, %c0_130] : memref<128x128xf32, #tpu.memory_space<vmem>>, vector<128x128xf32>
    tpu.vector_store %arg7[%c0_129, %c0_130], %195 {strides = array<i32>} : memref<128x128xf32, #tpu.memory_space<vmem>>, vector<128x128xf32>,
    return
  }
  func.func @transform_0(%arg0: i32) -> (i32, i32) {
    %c0_i32 = arith.constant 0 : i32
    %c0_i32_0 = arith.constant 0 : i32
    %c0_i32_1 = arith.constant 0 : i32
    return %c0_i32, %c0_i32_0 : i32, i32
  }
  func.func @transform_1(%arg0: i32) -> (i32, i32) {
    %c0_i32 = arith.constant 0 : i32
    %c0_i32_0 = arith.constant 0 : i32
    %c0_i32_1 = arith.constant 0 : i32
    return %c0_i32, %c0_i32_0 : i32, i32
  }
  func.func @transform_2(%arg0: i32) -> (i32, i32) {
    %c0_i32 = arith.constant 0 : i32
    %c0_i32_0 = arith.constant 0 : i32
    %c0_i32_1 = arith.constant 0 : i32
    return %c0_i32, %c0_i32_0 : i32, i32
  }
  func.func @transform_3(%arg0: i32) -> (i32, i32) {
    %c0_i32 = arith.constant 0 : i32
    %c0_i32_0 = arith.constant 0 : i32
    %c0_i32_1 = arith.constant 0 : i32
    return %c0_i32, %c0_i32_0 : i32, i32
  }
  func.func @transform_4(%arg0: i32) -> (i32, i32, i32) {
    %c0_i32 = arith.constant 0 : i32
    %c0_i32_0 = arith.constant 0 : i32
    %c0_i32_1 = arith.constant 0 : i32
    %c0_i32_2 = arith.constant 0 : i32
    return %c0_i32, %c0_i32_0, %c0_i32_1 : i32, i32, i32
  }
  func.func @transform_5(%arg0: i32) -> (i32, i32, i32) {
    %c0_i32 = arith.constant 0 : i32
    %c0_i32_0 = arith.constant 0 : i32
    %c0_i32_1 = arith.constant 0 : i32
    %c0_i32_2 = arith.constant 0 : i32
    return %c0_i32, %c0_i32_0, %c0_i32_1 : i32, i32, i32
  }
  func.func @transform_6(%arg0: i32) -> (i32, i32) {
    %c0_i32 = arith.constant 0 : i32
    %c0_i32_0 = arith.constant 0 : i32
    %c0_i32_1 = arith.constant 0 : i32
    return %c0_i32, %c0_i32_0 : i32, i32
  }
}

</mosaic_0001>

<bundles_post_ra>
// kernel: encoder_block_forward.1
= control target key start
LH: loop header
LB: loop body
LE: loop exit
PB: predicated region body
PF: predicated region fallthrough
CT: control target
= control target key end

     0   :  { %vm5434_vm5 = vmmov 1   ;;  %s7488_s1 = inlined_call_operand.vmem [shape: bf16[128,128], index: 1, kind: input, shape index: {}]   ;;  %s7489_s0 = inlined_call_operand.vmem [shape: bf16[128,128], index: 0, kind: input, shape index: {}]   ;;  %s7490_s2 = inlined_call_operand.vmem [shape: bf16[1152,128], index: 2, kind: input, shape index: {}]   ;;  %s7491_s4 = inlined_call_operand.vmem [shape: f32[3,1,128], index: 4, kind: input, shape index: {}]   ;;  %s7492_s5 = inlined_call_operand.vmem [shape: f32[3,1,128], index: 5, kind: input, shape index: {}]   ;;  %s7493_s3 = inlined_call_operand.vmem [shape: bf16[1152,128], index: 3, kind: input, shape index: {}]   ;;  %s7494_s6 = inlined_call_operand.vmem [shape: f32[128,128], index: 6, kind: output, shape index: {}]  }
   0x1   :  { %v5267_v0 = vld [vmem:[%s7488_s1] sm:$0xff]   ;;  %v5268_v1 = vld [vmem:[%s7488_s1 + $0x8] sm:$0xff]   ;;  %v5269_v2 = vld [vmem:[%s7488_s1 + $0x10] sm:$0xff]  }
   0x2   :  { %5153 = vmatprep.subr.bf16.mxu0 %v5267_v0  ;;  %v5270_v3 = vld [vmem:[%s7488_s1 + $0x18] sm:$0xff]   ;;  %v5275_v4 = vld [vmem:[%s7489_s0] sm:$0xff]   ;;  %v5272_v6 = vld [vmem:[%s7488_s1 + $0x28] sm:$0xff]  }
   0x3   :  { %5154 = vmatpush3.bf16.msra.mxu0 %v5267_v0  ;;  %5169 = vmatprep.mubr.bf16.mxu0 %v5275_v4  ;;  %v5271_v5 = vld [vmem:[%s7488_s1 + $0x20] sm:$0xff]   ;;  %v5273_v7 = vld [vmem:[%s7488_s1 + $0x30] sm:$0xff]   ;;  %v5274_v8 = vld [vmem:[%s7488_s1 + $0x38] sm:$0xff]  }
   0x4   :  { %5155 = vmatprep.subr.bf16.mxu0 %v5268_v1  ;;  %v5276_v9 = vld [vmem:[%s7489_s0 + $0x8] sm:$0xff]   ;;  %v5277_v10 = vld [vmem:[%s7489_s0 + $0x10] sm:$0xff]   ;;  %v5278_v11 = vld [vmem:[%s7489_s0 + $0x18] sm:$0xff]  }
   0x5   :  { %v5279_v12 = vld [vmem:[%s7489_s0 + $0x20] sm:$0xff]   ;;  %v5280_v13 = vld [vmem:[%s7489_s0 + $0x28] sm:$0xff]   ;;  %v5281_v14 = vld [vmem:[%s7489_s0 + $0x30] sm:$0xff]  }
   0x6   :  { %v5282_v15 = vld [vmem:[%s7489_s0 + $0x38] sm:$0xff]   ;;  %v5283_v16 = vld [vmem:[%s7490_s2 + $0x40] sm:$0xff]   ;;  %v5287_v20 = vld [vmem:[%s7490_s2 + $0x48] sm:$0xff]  }
   0x7   :  { %5156 = vmatpush3.bf16.msra.mxu0 %v5268_v1  ;;  %v5284_v17 = vld [vmem:[%s7490_s2 + $0xc0] sm:$0xff]   ;;  %4609 = vmatprep.subr.bf16.mxu1 %v5283_v16  ;;  %v5288_v21 = vld [vmem:[%s7490_s2 + $0xc8] sm:$0xff]   ;;  %v5291_v24 = vld [vmem:[%s7490_s2 + $0x50] sm:$0xff]  }
   0x8   :  { %5157 = vmatprep.subr.bf16.mxu0 %v5269_v2  ;;  %v5285_v18 = vld [vmem:[%s7490_s2] sm:$0xff]   ;;  %v5289_v22 = vld [vmem:[%s7490_s2 + $0x8] sm:$0xff]   ;;  %v5292_v25 = vld [vmem:[%s7490_s2 + $0xd0] sm:$0xff]  }
   0x9   :  { %v5286_v19 = vld [vmem:[%s7490_s2 + $0x80] sm:$0xff]   ;;  %4610 = vmatpush3.bf16.msra.mxu1 %v5285_v18  ;;  %v5290_v23 = vld [vmem:[%s7490_s2 + $0x88] sm:$0xff]   ;;  %v5293_v26 = vld [vmem:[%s7490_s2 + $0x10] sm:$0xff]  }
   0xa   :  { %4611 = vmatprep.subr.bf16.mxu1 %v5287_v20  ;;  %v5294_v27 = vld [vmem:[%s7490_s2 + $0x90] sm:$0xff]   ;;  %v5295_v28 = vld [vmem:[%s7490_s2 + $0x58] sm:$0xff]   ;;  %v5300_v32 = vld [vmem:[%s7490_s2 + $0xe0] sm:$0xff]  }
   0xb   :  { %5158 = vmatpush3.bf16.msra.mxu0 %v5269_v2  ;;  %v5296_v29 = vld [vmem:[%s7490_s2 + $0xd8] sm:$0xff]   ;;  %v5299_v33 = vld [vmem:[%s7490_s2 + $0x60] sm:$0xff]   ;;  %v5303_v36 = vld [vmem:[%s7490_s2 + $0x68] sm:$0xff]  }
   0xc   :  { %5159 = vmatprep.subr.bf16.mxu0 %v5270_v3  ;;  %v5297_v30 = vld [vmem:[%s7490_s2 + $0x18] sm:$0xff]   ;;  %v5301_v34 = vld [vmem:[%s7490_s2 + $0x20] sm:$0xff]   ;;  %v5304_v37 = vld [vmem:[%s7490_s2 + $0xe8] sm:$0xff]  }
   0xd   :  { %4612 = vmatpush3.bf16.msra.mxu1 %v5289_v22  ;;  %v5298_v31 = vld [vmem:[%s7490_s2 + $0x98] sm:$0xff]   ;;  %v5302_v35 = vld [vmem:[%s7490_s2 + $0xa0] sm:$0xff]   ;;  %v5305_v38 = vld [vmem:[%s7490_s2 + $0x28] sm:$0xff]  }
   0xe   :  { %4613 = vmatprep.subr.bf16.mxu1 %v5291_v24  ;;  %v5306_v39 = vld [vmem:[%s7490_s2 + $0xa8] sm:$0xff]   ;;  %v5307_v40 = vld [vmem:[%s7490_s2 + $0x70] sm:$0xff]   ;;  %v5311_v44 = vld [vmem:[%s7490_s2 + $0x78] sm:$0xff]  }
   0xf   :  { %5160 = vmatpush3.bf16.msra.mxu0 %v5270_v3  ;;  %v5308_v41 = vld [vmem:[%s7490_s2 + $0xf0] sm:$0xff]   ;;  %v5312_v46 = vld [vmem:[%s7490_s2 + $0xf8] sm:$0xff]   ;;  %v5315_v53 = vld [vmem:[%s7490_s2 + $0x140] sm:$0xff]  }
  0x10   :  { %5161 = vmatprep.subr.bf16.mxu0 %v5271_v5  ;;  %v5309_v42 = vld [vmem:[%s7490_s2 + $0x30] sm:$0xff]   ;;  %v5313_v49 = vld [vmem:[%s7490_s2 + $0x38] sm:$0xff]   ;;  %v5324_v18 = vld [vmem:[%s7490_s2 + $0x1c0] sm:$0xff]  }
  0x11   :  { %4614 = vmatpush3.bf16.msra.mxu1 %v5293_v26  ;;  %v5310_v43 = vld [vmem:[%s7490_s2 + $0xb0] sm:$0xff]   ;;  %v5314_v51 = vld [vmem:[%s7490_s2 + $0xb8] sm:$0xff]  }
  0x12   :  { %4615 = vmatprep.subr.bf16.mxu1 %v5295_v28 }
  0x13   :  { %5162 = vmatpush3.bf16.msra.mxu0 %v5271_v5 }
  0x14   :  { %5163 = vmatprep.subr.bf16.mxu0 %v5272_v6 }
  0x15   :  { %4616 = vmatpush3.bf16.msra.mxu1 %v5297_v30 }
  0x16   :  { %4617 = vmatprep.subr.bf16.mxu1 %v5299_v33 }
  0x17   :  { %5164 = vmatpush3.bf16.msra.mxu0 %v5272_v6 }
  0x18   :  { %5165 = vmatprep.subr.bf16.mxu0 %v5273_v7 }
  0x19   :  { %4618 = vmatpush3.bf16.msra.mxu1 %v5301_v34 }
  0x1a   :  { %4619 = vmatprep.subr.bf16.mxu1 %v5303_v36 }
  0x1b   :  { %5166 = vmatpush3.bf16.msra.mxu0 %v5273_v7 }
  0x1c   :  { %5167 = vmatprep.subr.bf16.mxu0 %v5274_v8 }
  0x1d   :  { %4620 = vmatpush3.bf16.msra.mxu1 %v5305_v38 }
  0x1e   :  { %4621 = vmatprep.subr.bf16.mxu1 %v5307_v40 }
  0x1f   :  { %5168 = vmatpush3.bf16.msra.mxu0 %v5274_v8 }
  0x20   :  { %4673 = vmatprep.subr.bf16.mxu0 %v5284_v17 }
  0x21   :  { %4622 = vmatpush3.bf16.msra.mxu1 %v5309_v42 }
  0x22   :  { %5170 = vmatmul.mubr.bf16.vlgmr.msra.gmra.mrb[0].mxu0 %v5276_v9  ;;  %4623 = vmatprep.subr.bf16.mxu1 %v5311_v44 }
  0x23   :  { %5173 = vmatprep.mubr.bf16.mxu0 %v5277_v10  ;;  %4674 = vmatpush3.bf16.msra.mxu0 %v5286_v19 }
  0x24   :  { %4675 = vmatprep.subr.bf16.mxu0 %v5288_v21 }
  0x25   :  { %4624 = vmatpush3.bf16.msra.mxu1 %v5313_v49 }
  0x26   :  { %4737 = vmatprep.subr.bf16.mxu1 %v5315_v53 }
  0x27   :  { %4676 = vmatpush3.bf16.msra.mxu0 %v5290_v23 }
  0x28   :  { %4677 = vmatprep.subr.bf16.mxu0 %v5292_v25 }
  0x2a   :  { %5174 = vmatmul.mubr.bf16.gmra.mrb[4].mxu0 %v5278_v11 }
  0x2b   :  { %5177 = vmatprep.mubr.bf16.mxu0 %v5279_v12  ;;  %4678 = vmatpush3.bf16.msra.mxu0 %v5294_v27 }
  0x2c   :  { %4679 = vmatprep.subr.bf16.mxu0 %v5296_v29 }
  0x2f   :  { %4680 = vmatpush3.bf16.msra.mxu0 %v5298_v31 }
  0x30   :  { %4681 = vmatprep.subr.bf16.mxu0 %v5300_v32 }
  0x32   :  { %5178 = vmatmul.mubr.bf16.gmra.mrb[8].mxu0 %v5280_v13 }
  0x33   :  { %5181 = vmatprep.mubr.bf16.mxu0 %v5281_v14  ;;  %4682 = vmatpush3.bf16.msra.mxu0 %v5302_v35 }
  0x34   :  { %4683 = vmatprep.subr.bf16.mxu0 %v5304_v37 }
  0x37   :  { %4684 = vmatpush3.bf16.msra.mxu0 %v5306_v39 }
  0x38   :  { %4685 = vmatprep.subr.bf16.mxu0 %v5308_v41 }
  0x3a   :  { %5182 = vmatmul.mubr.bf16.gmra.mrb[12].mxu0 %v5282_v15 }
  0x3b   :  { %4686 = vmatpush3.bf16.msra.mxu0 %v5310_v43 }
  0x3c   :  { %4687 = vmatprep.subr.bf16.mxu0 %v5312_v46 }
  0x3f   :  { %4688 = vmatpush3.bf16.msra.mxu0 %v5314_v51 }
  0x40   :  { %4801 = vmatprep.subr.bf16.mxu0 %v5324_v18 }
  0xf5   :  { %v5171_v45 = vpop.f32.mrb[0].mxu0 }
  0xf6   :  { %v186_v47 = vpop.f32.mrb[1].mxu0 }
  0xf7   :  { %v5172_v48 = vpop.f32.mrb[2].mxu0 }
  0xf8   :  { %v189_v50 = vpop.f32.mrb[3].mxu0 }
  0xf9   :  { %v251_v52 = vadd.f32 %v189_v50, %v186_v47 }
  0xfb   :  { %v252_v54 = vadd.f32 %v5171_v45, %v251_v52 }
  0xfd   :  { %v5175_v55 = vpop.f32.mrb[4].mxu0  ;;  %v253_v56 = vadd.f32 %v5172_v48, %v252_v54 }
  0xfe   :  { %v202_v57 = vpop.f32.mrb[5].mxu0 }
  0xff   :  { %v254_v58 = vadd.f32 %v253_v56, %v202_v57  ;;  %v5176_v59 = vpop.f32.mrb[6].mxu0 }
 0x100   :  { %v205_v60 = vpop.f32.mrb[7].mxu0 }
 0x101   :  { %v255_v61 = vadd.f32 %v254_v58, %v205_v60 }
 0x103   :  { %v256_v62 = vadd.f32 %v5175_v55, %v255_v61 }
 0x105   :  { %v5179_v63 = vpop.f32.mrb[8].mxu0  ;;  %v257_v0 = vadd.f32 %v5176_v59, %v256_v62 }
 0x106   :  { %v218_v1 = vpop.f32.mrb[9].mxu0 }
 0x107   :  { %v258_v2 = vadd.f32 %v257_v0, %v218_v1  ;;  %v5180_v3 = vpop.f32.mrb[10].mxu0 }
 0x108   :  { %v221_v4 = vpop.f32.mrb[11].mxu0 }
 0x109   :  { %v259_v5 = vadd.f32 %v258_v2, %v221_v4 }
 0x10b   :  { %v260_v6 = vadd.f32 %v5179_v63, %v259_v5 }
 0x10d   :  { %v5183_v7 = vpop.f32.mrb[12].mxu0  ;;  %v261_v8 = vadd.f32 %v5180_v3, %v260_v6 }
 0x10e   :  { %v234_v9 = vpop.f32.mrb[13].mxu0 }
 0x10f   :  { %v262_v10 = vadd.f32 %v261_v8, %v234_v9  ;;  %v5184_v11 = vpop.f32.mrb[14].mxu0 }
 0x110   :  { %v237_v12 = vpop.f32.mrb[15].mxu0 }
 0x111   :  { %v263_v13 = vadd.f32 %v262_v10, %v237_v12 }
 0x113   :  { %v264_v14 = vadd.f32 %v5183_v7, %v263_v13 }
 0x115   :  { %v265_v15 = vadd.f32 %v5184_v11, %v264_v14 }
 0x117   :  { %v266_v16 = vrot.slane %v265_v15, 4 }
 0x119   :  { %v267_v17 = vadd.f32 %v266_v16, %v265_v15  ;;  %v331_v15 = vlaneseq }
 0x11b   :  { %v268_v19 = vrot.slane %v267_v17, 2  ;;  %v5660_v16 = vshrl.u32 %v331_v15, 7 }
 0x11d   :  { %v269_v20 = vadd.f32 %v268_v19, %v267_v17  ;;  %v249_v17 = vld [vmem:[%s7491_s4] sm:$0x1]  ;;  %v5666_v18 = vsub.s32 0, %v5660_v16  ;;  %vm417_vm0 = vcmp.lt.s32.totalorder %v5660_v16, 1  ;;  %vm563_vm1 = vcmp.lt.s32.totalorder %v5660_v16, 7 }
 0x11e   :  { %vm628_vm2 = vcmp.lt.s32.totalorder %v5660_v16, 6  ;;  %vm5722_vm3 = vmneg %vm417_vm0  ;;  %v5425_v16 = vld [vmem:[%s7493_s3 + $0x230] sm:$0xff]  }
 0x11f   :  { %v270_v21 = vrot.slane %v269_v20, 1  ;;  %7509 = vst [vmem:[#allocation4_spill] sm:$0xff] %v5666_v18  ;;  %vm5739_vm4 = vmpackc.low %vm5722_vm3, %vm5722_vm3 }
 0x120   :  { %vm5781_vm6 = vmpackc.low %vm5722_vm3, %vm5434_vm5 }
 0x121   :  { %v271_v22 = vadd.f32 %v270_v21, %v269_v20  ;;  %vm6315_vm7 = vmpackc.low %vm5434_vm5, %vm5722_vm3 }
 0x123   :  { %v272_v23 = vmul.f32 0.0078125, %v271_v22  ;;  %v5674_v22 = vld [vmem:[%s7492_s5] ss:$0 sm:$0xff] }
 0x125   :  { %v5620_v24 = vsub.f32 %v186_v47, %v272_v23  ;;  %v5622_v25 = vsub.f32 %v189_v50, %v272_v23  ;;  %v5624_v26 = vsub.f32 %v5171_v45, %v272_v23  ;;  %v5626_v27 = vsub.f32 %v5172_v48, %v272_v23 }
 0x126   :  { %v5628_v28 = vsub.f32 %v202_v57, %v272_v23  ;;  %v5630_v29 = vsub.f32 %v205_v60, %v272_v23  ;;  %v5632_v30 = vsub.f32 %v5175_v55, %v272_v23  ;;  %v5634_v31 = vsub.f32 %v5176_v59, %v272_v23 }
 0x127   :  { %v5636_v32 = vsub.f32 %v218_v1, %v272_v23  ;;  %v5638_v33 = vsub.f32 %v221_v4, %v272_v23  ;;  %v283_v34 = vsub.f32 %v5179_v63, %v272_v23  ;;  %v284_v35 = vsub.f32 %v5180_v3, %v272_v23 }
 0x128   :  { %v285_v36 = vsub.f32 %v234_v9, %v272_v23  ;;  %v286_v37 = vsub.f32 %v237_v12, %v272_v23  ;;  %v287_v38 = vsub.f32 %v5183_v7, %v272_v23  ;;  %v288_v39 = vsub.f32 %v5184_v11, %v272_v23 }
 0x129   :  { %v289_v40 = vmul.f32 %v5620_v24, %v5620_v24  ;;  %v290_v41 = vmul.f32 %v5622_v25, %v5622_v25  ;;  %v291_v42 = vmul.f32 %v5624_v26, %v5624_v26  ;;  %v292_v44 = vmul.f32 %v5626_v27, %v5626_v27 }
 0x12a   :  { %v293_v46 = vmul.f32 %v5628_v28, %v5628_v28  ;;  %v294_v48 = vmul.f32 %v5630_v29, %v5630_v29  ;;  %v295_v50 = vmul.f32 %v5632_v30, %v5632_v30  ;;  %v296_v52 = vmul.f32 %v5634_v31, %v5634_v31 }
 0x12b   :  { %v305_v43 = vadd.f32 %v290_v41, %v289_v40  ;;  %v297_v54 = vmul.f32 %v5636_v32, %v5636_v32  ;;  %v298_v56 = vmul.f32 %v5638_v33, %v5638_v33  ;;  %v299_v58 = vmul.f32 %v283_v34, %v283_v34 }
 0x12c   :  { %v300_v60 = vmul.f32 %v284_v35, %v284_v35  ;;  %v301_v62 = vmul.f32 %v285_v36, %v285_v36  ;;  %v302_v0 = vmul.f32 %v286_v37, %v286_v37  ;;  %v303_v2 = vmul.f32 %v287_v38, %v287_v38 }
 0x12d   :  { %v306_v45 = vadd.f32 %v305_v43, %v291_v42  ;;  %v304_v4 = vmul.f32 %v288_v39, %v288_v39  ;;  %v7495_v23 = vmov 0.0  }
 0x12e   :  { %v5678_v40 = vrot.slane %v7495_v23, 1  ;;  %v5681_v41 = vrot.slane %v7495_v23, 2 }
 0x12f   :  { %v307_v47 = vadd.f32 %v306_v45, %v292_v44 }
 0x130   :  { %7510 = vst [vmem:[#allocation5_spill] sm:$0xff] %v5681_v41 }
 0x131   :  { %v308_v49 = vadd.f32 %v307_v47, %v293_v46 }
 0x133   :  { %v309_v51 = vadd.f32 %v308_v49, %v294_v48 }
 0x135   :  { %v310_v53 = vadd.f32 %v309_v51, %v295_v50 }
 0x137   :  { %v311_v55 = vadd.f32 %v310_v53, %v296_v52 }
 0x139   :  { %v312_v57 = vadd.f32 %v311_v55, %v297_v54 }
 0x13b   :  { %v313_v59 = vadd.f32 %v312_v57, %v298_v56 }
 0x13d   :  { %v314_v61 = vadd.f32 %v313_v59, %v299_v58 }
 0x13f   :  { %v315_v63 = vadd.f32 %v314_v61, %v300_v60 }
 0x141   :  { %v316_v1 = vadd.f32 %v315_v63, %v301_v62 }
 0x143   :  { %v317_v3 = vadd.f32 %v316_v1, %v302_v0 }
 0x145   :  { %v318_v5 = vadd.f32 %v317_v3, %v303_v2 }
 0x147   :  { %v319_v6 = vadd.f32 %v318_v5, %v304_v4 }
 0x149   :  { %v320_v7 = vrot.slane %v319_v6, 4 }
 0x14b   :  { %v321_v8 = vadd.f32 %v320_v7, %v319_v6 }
 0x14d   :  { %v322_v9 = vrot.slane %v321_v8, 2 }
 0x14f   :  { %v323_v10 = vadd.f32 %v322_v9, %v321_v8 }
 0x151   :  { %v324_v11 = vrot.slane %v323_v10, 1 }
 0x153   :  { %v325_v12 = vadd.f32 %v324_v11, %v323_v10 }
 0x155   :  { %v326_v13 = vmul.f32 0.0078125, %v325_v12 }
 0x157   :  { %v327_v14 = vadd.f32 1e-05, %v326_v13 }
 0x159   :  { %5427 = vrsqrt.f32 %v327_v14 }
 0x163   :  { %v5428_v19 = vpop.eup %5427 }
 0x164   :  { %v329_v20 = vmul.f32 %v5428_v19, %v249_v17 }
 0x166   :  { %v5669_v21 = vrot.slane %v329_v20, %v5666_v18 }
 0x168   :  { %v5684_v42 = vmul.f32 %v5669_v21, %v283_v34  ;;  %v5687_v43 = vmul.f32 %v5669_v21, %v284_v35  ;;  %v348_v44 = vmul.f32 %v5669_v21, %v285_v36  ;;  %v349_v45 = vmul.f32 %v5669_v21, %v286_v37 }
 0x169   :  { %v350_v46 = vmul.f32 %v5669_v21, %v287_v38  ;;  %v5693_v47 = vmul.f32 %v5669_v21, %v288_v39  ;;  %v336_v48 = vmul.f32 %v5669_v21, %v5620_v24  ;;  %v337_v34 = vmul.f32 %v5669_v21, %v5622_v25 }
 0x16a   :  { %v5701_v35 = vadd.f32 %v5674_v22, %v348_v44  ;;  %v371_v36 = vadd.f32 %v5674_v22, %v349_v45  ;;  %v338_v37 = vmul.f32 %v5669_v21, %v5624_v26  ;;  %v339_v38 = vmul.f32 %v5669_v21, %v5626_v27 }
 0x16b   :  { %v5710_v39 = vadd.f32 %v5674_v22, %v350_v46  ;;  %v358_v24 = vadd.f32 %v5674_v22, %v336_v48  ;;  %v359_v25 = vadd.f32 %v5674_v22, %v337_v34  ;;  %v340_v49 = vmul.f32 %v5669_v21, %v5628_v28  ;;  %v5316_v48 = vld [vmem:[%s7490_s2 + $0x100] sm:$0xff]  }
 0x16c   :  { %v387_v50 = vmax.f32 %v371_v36, 0.0  ;;  %v360_v51 = vadd.f32 %v5674_v22, %v338_v37  ;;  %v361_v52 = vadd.f32 %v5674_v22, %v339_v38  ;;  %v341_v26 = vmul.f32 %v5669_v21, %v5630_v29 }
 0x16d   :  { %v374_v53 = vmax.f32 %v358_v24, 0.0  ;;  %v375_v27 = vmax.f32 %v359_v25, 0.0  ;;  %v362_v55 = vadd.f32 %v5674_v22, %v340_v49  ;;  %v342_v28 = vmul.f32 %v5669_v21, %v5632_v30  ;;  %v5317_v25 = vld [vmem:[%s7490_s2 + $0x148] sm:$0xff]   ;;  %v5326_v49 = vld [vmem:[%s7490_s2 + $0x180] sm:$0xff]  }
 0x16e   :  { %v5729_v56 = vrot.slane %v387_v50, 7  ;;  %v376_v57 = vmax.f32 %v360_v51, 0.0  ;;  %v377_v58 = vmax.f32 %v361_v52, 0.0  ;;  %v363_v59 = vadd.f32 %v5674_v22, %v341_v26 }
 0x16f   :  { %v399_v29 = vrot.slane %v374_v53, 7  ;;  %v400_v60 = vrot.slane %v375_v27, 7  ;;  %v378_v61 = vmax.f32 %v362_v55, 0.0  ;;  %v5734_v62 = vmul.f32 %v5669_v21, %v5634_v31  ;;  %v5327_v53 = vld [vmem:[%s7490_s2 + $0x1c8] sm:$0xff]  }
 0x170   :  { %v401_v30 = vrot.slane %v376_v57, 7  ;;  %v5743_v0 = vrot.slane %v377_v58, 7  ;;  %v379_v1 = vmax.f32 %v363_v59, 0.0  ;;  %v5746_v2 = vadd.f32 %v5674_v22, %v342_v28 }
 0x171   :  { %v4402_v3 = vpack.c.bf16 %v400_v60, %v399_v29  ;;  %v418_v4 = vsel %vm417_vm0, %v399_v29, 0.0  ;;  %v419_v31 = vsel %vm417_vm0, %v400_v60, 0.0  ;;  %v434_v5 = vsel %vm417_vm0, 0.0, %v399_v29 }
 0x172   :  { %v435_v6 = vsel %vm417_vm0, 0.0, %v400_v60  ;;  %v532_v7 = vrot.slane %v434_v5, 1  ;;  %v548_v8 = vrot.slane %v418_v4, 1  ;;  %v549_v9 = vrot.slane %v419_v31, 1 }
 0x173   :  { %4403 = vmatprep.mubr.msk.bf16.mxu0 %vm5739_vm4, %v4402_v3  ;;  %v533_v10 = vrot.slane %v435_v6, 1  ;;  %v597_v11 = vrot.slane %v434_v5, 2  ;;  %v613_v12 = vrot.slane %v418_v4, 2  ;;  %v4363_v13 = vpack.c.bf16 %v399_v29, %v7495_v23  ;;  %v5328_v5 = vld [vmem:[%s7490_s2 + $0x188] sm:$0xff]  }
 0x174   :  { %v5761_v14 = vsel %vm563_vm1, %v532_v7, %v548_v8  ;;  %v4407_v15 = vpack.c.bf16 %v5743_v0, %v401_v30  ;;  %v420_v17 = vsel %vm417_vm0, %v401_v30, 0.0  ;;  %v436_v19 = vsel %vm417_vm0, 0.0, %v401_v30 }
 0x175   :  { %v5770_v20 = vsel %vm563_vm1, %v533_v10, %v549_v9  ;;  %v580_v44 = vpack.c.bf16 %v5761_v14, %v5678_v40  ;;  %v5776_v45 = vsel %vm628_vm2, %v597_v11, %v613_v12  ;;  %v7515_v46 = vmov 0  ;;  %v5330_v10 = vld [vmem:[%s7490_s2 + $0x1d0] sm:$0xff]  }
 0x176   :  { %v7516_v46 = vsel %vm5781_vm6, 4294967295, %v7515_v46  ;;  %v534_v34 = vrot.slane %v436_v19, 1  ;;  %v645_v37 = vpack.c.bf16 %v5776_v45, %v5681_v41  ;;  %v550_v38 = vrot.slane %v420_v17, 1 }
 0x177   :  { %7517 = vst [vmem:[#allocation6_spill] sm:$0xff] %v7516_v46  ;;  %v598_v24 = vrot.slane %v435_v6, 2  ;;  %1694 = vmatprep.mubr.bf16.mxu1 %v580_v44  ;;  %v599_v50 = vrot.slane %v436_v19, 2  ;;  %v614_v51 = vrot.slane %v419_v31, 2  ;;  %v615_v52 = vrot.slane %v420_v17, 2  ;;  %v5319_v31 = vld [vmem:[%s7490_s2 + $0x150] sm:$0xff]  }
 0x178   :  { %v5798_v26 = vpack.c.bf16 %v401_v30, %v400_v60  ;;  %1792 = vmatmul.mubr.bf16.vlgmr.msra.gmra.mrb[16].mxu0 %v645_v37  ;;  %4364 = vmatmul.mubr.msk.bf16.vlgmr.msra.gmra.mrb[0].mxu1 %vm5781_vm6, %v4363_v13  ;;  %v5807_v27 = vsel %vm563_vm1, %v534_v34, %v550_v38  ;;  %v403_v55 = vrot.slane %v378_v61, 7  ;;  %v5809_v28 = vrot.slane %v379_v1, 7  ;;  %v5318_v60 = vld [vmem:[%s7490_s2 + $0x108] sm:$0xff]  }
 0x179   :  { %v421_v57 = vsel %vm417_vm0, %v5743_v0, 0.0  ;;  %4408 = vmatprep.mubr.msk.bf16.mxu0 %vm5739_vm4, %v4407_v15  ;;  %4738 = vmatpush3.bf16.msra.mxu1 %v5316_v48  ;;  %v5818_v58 = vpack.c.bf16 %v5807_v27, %v5770_v20  ;;  %v5822_v59 = vsel %vm628_vm2, %v598_v24, %v614_v51  ;;  %v5826_v29 = vsel %vm628_vm2, %v599_v50, %v615_v52  ;;  %v5321_v51 = vld [vmem:[%s7490_s2 + $0x158] sm:$0xff]  }
 0x17a   :  { %v437_v61 = vsel %vm417_vm0, 0.0, %v5743_v0  ;;  %v5836_v30 = vpack.c.bf16 %v5826_v29, %v5822_v59  ;;  %4739 = vmatprep.subr.bf16.mxu1 %v5317_v25  ;;  %v4412_v1 = vpack.c.bf16 %v5809_v28, %v403_v55  ;;  %v422_v3 = vsel %vm417_vm0, %v403_v55, 0.0  ;;  %4802 = vmatpush3.bf16.msra.mxu0 %v5326_v49  ;;  %v5333_v52 = vld [vmem:[%s7490_s2 + $0x1d8] sm:$0xff]  }
 0x17b   :  { %v438_v4 = vsel %vm417_vm0, 0.0, %v403_v55  ;;  %1702 = vmatprep.mubr.bf16.mxu1 %v5818_v58  ;;  %v535_v6 = vrot.slane %v437_v61, 1  ;;  %v551_v8 = vrot.slane %v421_v57, 1  ;;  %v552_v9 = vrot.slane %v422_v3, 1  ;;  %4803 = vmatprep.subr.bf16.mxu0 %v5327_v53 }
 0x17c   :  { %v536_v7 = vrot.slane %v438_v4, 1  ;;  %v600_v11 = vrot.slane %v437_v61, 2  ;;  %v601_v12 = vrot.slane %v438_v4, 2  ;;  %v616_v13 = vrot.slane %v421_v57, 2 }
 0x17d   :  { %v617_v15 = vrot.slane %v422_v3, 2  ;;  %4740 = vmatpush3.bf16.msra.mxu1 %v5318_v60  ;;  %v5855_v17 = vsel %vm563_vm1, %v535_v6, %v551_v8  ;;  %v5862_v44 = vpack.c.bf16 %v403_v55, %v5743_v0  ;;  %v365_v48 = vadd.f32 %v5674_v22, %v5734_v62  ;;  %v5320_v0 = vld [vmem:[%s7490_s2 + $0x110] sm:$0xff]  }
 0x17e   :  { %v5859_v19 = vsel %vm563_vm1, %v536_v7, %v552_v9  ;;  %v5872_v37 = vsel %vm628_vm2, %v600_v11, %v616_v13  ;;  %4741 = vmatprep.subr.bf16.mxu1 %v5319_v31  ;;  %v380_v24 = vmax.f32 %v5746_v2, 0.0  ;;  %4804 = vmatpush3.bf16.msra.mxu0 %v5328_v5  ;;  %v5332_v62 = vld [vmem:[%s7490_s2 + $0x190] sm:$0xff]   ;;  %v423_v50 = vsel %vm417_vm0, %v5809_v28, 0.0  ;;  %v5336_v11 = vld [vmem:[%s7490_s2 + $0x1e0] sm:$0xff]  }
 0x17f   :  { %v5868_v34 = vpack.c.bf16 %v5859_v19, %v5855_v17  ;;  %v5876_v38 = vsel %vm628_vm2, %v601_v12, %v617_v15  ;;  %v381_v49 = vmax.f32 %v365_v48, 0.0  ;;  %v439_v2 = vsel %vm417_vm0, 0.0, %v5809_v28  ;;  %4805 = vmatprep.subr.bf16.mxu0 %v5330_v10 }
 0x180   :  { %v5887_v25 = vpack.c.bf16 %v5876_v38, %v5872_v37  ;;  %1800 = vmatmul.mubr.bf16.gmra.mrb[20].mxu0 %v5836_v30  ;;  %4369 = vmatmul.mubr.msk.bf16.gmra.mrb[4].mxu1 %vm5739_vm4, %v5798_v26  ;;  %v405_v53 = vrot.slane %v380_v24, 7  ;;  %v537_v55 = vrot.slane %v439_v2, 1  ;;  %v553_v57 = vrot.slane %v423_v50, 1 }
 0x181   :  { %v602_v60 = vrot.slane %v439_v2, 2  ;;  %4413 = vmatprep.mubr.msk.bf16.mxu0 %vm5739_vm4, %v4412_v1  ;;  %1710 = vmatprep.mubr.bf16.mxu1 %v5868_v34  ;;  %v5908_v61 = vrot.slane %v381_v49, 7  ;;  %v618_v3 = vrot.slane %v423_v50, 2  ;;  %v344_v4 = vmul.f32 %v5669_v21, %v5636_v32  ;;  %v5322_v32 = vld [vmem:[%s7490_s2 + $0x118] sm:$0xff]  }
 0x182   :  { %7518 = vst [vmem:[#allocation7_spill] sm:$0xff] %v5887_v25  ;;  %v345_v31 = vmul.f32 %v5669_v21, %v5638_v33  ;;  %4742 = vmatpush3.bf16.msra.mxu1 %v5320_v0  ;;  %v424_v5 = vsel %vm417_vm0, %v405_v53, 0.0  ;;  %v440_v6 = vsel %vm417_vm0, 0.0, %v405_v53  ;;  %v5920_v1 = vsel %vm563_vm1, %v537_v55, %v553_v57  ;;  %4806 = vmatpush3.bf16.msra.mxu0 %v5332_v62  ;;  %v5334_v33 = vld [vmem:[%s7490_s2 + $0x198] sm:$0xff]   ;;  %v5329_v57 = vld [vmem:[%s7490_s2 + $0x168] sm:$0xff]  }
 0x183   :  { %v5923_v7 = vpack.c.bf16 %v405_v53, %v5809_v28  ;;  %v4417_v21 = vpack.c.bf16 %v5908_v61, %v405_v53  ;;  %v538_v8 = vrot.slane %v440_v6, 1  ;;  %v554_v9 = vrot.slane %v424_v5, 1  ;;  %4743 = vmatprep.subr.bf16.mxu1 %v5321_v51  ;;  %v5323_v28 = vld [vmem:[%s7490_s2 + $0x160] sm:$0xff]   ;;  %4807 = vmatprep.subr.bf16.mxu0 %v5333_v52 }
 0x184   :  { %v603_v10 = vrot.slane %v440_v6, 2  ;;  %v619_v12 = vrot.slane %v424_v5, 2  ;;  %v5940_v13 = vsel %vm628_vm2, %v602_v60, %v618_v3  ;;  %v366_v15 = vadd.f32 %v5674_v22, %v344_v4  ;;  %v5339_v3 = vld [vmem:[%s7490_s2 + $0x1e8] sm:$0xff]  }
 0x185   :  { %v367_v48 = vadd.f32 %v5674_v22, %v345_v31  ;;  %v5946_v24 = vsel %vm563_vm1, %v538_v8, %v554_v9  ;;  %v368_v0 = vadd.f32 %v5674_v22, %v5684_v42  ;;  %v369_v62 = vadd.f32 %v5674_v22, %v5687_v43  ;;  %v5325_v42 = vld [vmem:[%s7490_s2 + $0x120] sm:$0xff]  }
 0x186   :  { %v386_v49 = vmax.f32 %v5701_v35, 0.0  ;;  %v5955_v50 = vpack.c.bf16 %v5946_v24, %v5920_v1  ;;  %v5959_v2 = vsel %vm628_vm2, %v603_v10, %v619_v12  ;;  %v382_v51 = vmax.f32 %v366_v15, 0.0  ;;  %4744 = vmatpush3.bf16.msra.mxu1 %v5322_v32  ;;  %4808 = vmatpush3.bf16.msra.mxu0 %v5334_v33  ;;  %v5338_v43 = vld [vmem:[%s7490_s2 + $0x1a0] sm:$0xff]  }
 0x187   :  { %v383_v52 = vmax.f32 %v367_v48, 0.0  ;;  %v5969_v35 = vpack.c.bf16 %v5959_v2, %v5940_v13  ;;  %4745 = vmatprep.subr.bf16.mxu1 %v5323_v28  ;;  %v384_v53 = vmax.f32 %v368_v0, 0.0  ;;  %v385_v55 = vmax.f32 %v369_v62, 0.0  ;;  %4809 = vmatprep.subr.bf16.mxu0 %v5336_v11  ;;  %v5331_v28 = vld [vmem:[%s7490_s2 + $0x128] sm:$0xff]   ;;  %v5335_v62 = vld [vmem:[%s7490_s2 + $0x170] sm:$0xff]  }
 0x188   :  { %v5974_v60 = vrot.slane %v386_v49, 7  ;;  %1808 = vmatmul.mubr.bf16.gmra.mrb[24].mxu0 %v5887_v25  ;;  %4374 = vmatmul.mubr.msk.bf16.gmra.mrb[8].mxu1 %vm5739_vm4, %v5862_v44  ;;  %v407_v4 = vrot.slane %v382_v51, 7  ;;  %v5985_v5 = vadd.f32 %v5674_v22, %v5693_v47  ;;  %v5340_v11 = vld [vmem:[%s7490_s2 + $0x1a8] sm:$0xff]   ;;  %v5342_v49 = vld [vmem:[%s7490_s2 + $0x1f0] sm:$0xff]   ;;  %v5341_v51 = vld [vmem:[%s7490_s2 + $0x178] sm:$0xff]  }
 0x189   :  { %7519 = vst [vmem:[#allocation8_spill] sm:$0xff] %v5969_v35  ;;  %v408_v31 = vrot.slane %v383_v52, 7  ;;  %4418 = vmatprep.mubr.msk.bf16.mxu0 %vm5739_vm4, %v4417_v21  ;;  %1718 = vmatprep.mubr.bf16.mxu1 %v5955_v50  ;;  %v5991_v32 = vrot.slane %v384_v53, 7  ;;  %v5993_v33 = vrot.slane %v385_v55, 7 }
 0x18a   :  { %v6000_v9 = vsel %vm417_vm0, %v5974_v60, 0.0  ;;  %v426_v47 = vsel %vm417_vm0, %v407_v4, 0.0  ;;  %v442_v21 = vsel %vm417_vm0, 0.0, %v407_v4  ;;  %v6007_v10 = vpack.c.bf16 %v407_v4, %v7495_v23  ;;  %4746 = vmatpush3.bf16.msra.mxu1 %v5325_v42  ;;  %4810 = vmatpush3.bf16.msra.mxu0 %v5338_v43 }
 0x18b   :  { %v4422_v22 = vpack.c.bf16 %v408_v31, %v407_v4  ;;  %v540_v12 = vrot.slane %v442_v21, 1  ;;  %v556_v15 = vrot.slane %v426_v47, 1  ;;  %v605_v48 = vrot.slane %v442_v21, 2  ;;  %4747 = vmatprep.subr.bf16.mxu1 %v5329_v57  ;;  %4811 = vmatprep.subr.bf16.mxu0 %v5339_v3 }
 0x18c   :  { %v621_v0 = vrot.slane %v426_v47, 2  ;;  %v427_v52 = vsel %vm417_vm0, %v408_v31, 0.0  ;;  %v428_v42 = vsel %vm417_vm0, %v5991_v32, 0.0  ;;  %v443_v43 = vsel %vm417_vm0, 0.0, %v408_v31 }
 0x18d   :  { %v6032_v53 = vsel %vm563_vm1, %v540_v12, %v556_v15  ;;  %v444_v57 = vsel %vm417_vm0, 0.0, %v5991_v32  ;;  %v541_v3 = vrot.slane %v443_v43, 1  ;;  %v557_v23 = vrot.slane %v427_v52, 1  ;;  %v5337_v12 = vld [vmem:[%s7490_s2 + $0x130] sm:$0xff]  }
 0x18e   :  { %v6036_v55 = vsel %vm628_vm2, %v605_v48, %v621_v0  ;;  %v584_v4 = vpack.c.bf16 %v6032_v53, %v5678_v40  ;;  %v542_v21 = vrot.slane %v444_v57, 1  ;;  %4748 = vmatpush3.bf16.msra.mxu1 %v5331_v28  ;;  %4812 = vmatpush3.bf16.msra.mxu0 %v5340_v11  ;;  %v5344_v15 = vld [vmem:[%s7490_s2 + $0x1b0] sm:$0xff]   ;;  %v558_v48 = vrot.slane %v428_v42, 1  ;;  %v5345_v28 = vld [vmem:[%s7490_s2 + $0x1f8] sm:$0xff]  }
 0x18f   :  { %v649_v47 = vpack.c.bf16 %v6036_v55, %v5681_v41  ;;  %v606_v0 = vrot.slane %v443_v43, 2  ;;  %v607_v36 = vrot.slane %v444_v57, 2  ;;  %v622_v8 = vrot.slane %v427_v52, 2  ;;  %4749 = vmatprep.subr.bf16.mxu1 %v5335_v62  ;;  %4813 = vmatprep.subr.bf16.mxu0 %v5342_v49 }
 0x190   :  { %1816 = vmatmul.mubr.bf16.gmra.mrb[28].mxu0 %v5969_v35  ;;  %4379 = vmatmul.mubr.msk.bf16.gmra.mrb[12].mxu1 %vm5739_vm4, %v5923_v7  ;;  %v6063_v11 = vsel %vm563_vm1, %v541_v3, %v557_v23  ;;  %v623_v62 = vrot.slane %v428_v42, 2  ;;  %v6066_v52 = vpack.c.bf16 %v5991_v32, %v408_v31  ;;  %v429_v49 = vsel %vm417_vm0, %v5993_v33, 0.0 }
 0x191   :  { %4423 = vmatprep.mubr.msk.bf16.mxu0 %vm5739_vm4, %v4422_v22  ;;  %1726 = vmatprep.mubr.bf16.mxu1 %v584_v4  ;;  %v6075_v43 = vsel %vm563_vm1, %v542_v21, %v558_v48  ;;  %v6079_v23 = vsel %vm628_vm2, %v606_v0, %v622_v8  ;;  %v445_v31 = vsel %vm417_vm0, 0.0, %v5993_v33  ;;  %v446_v42 = vsel %vm417_vm0, 0.0, %v5974_v60  ;;  %v5343_v8 = vld [vmem:[%s7490_s2 + $0x138] sm:$0xff]  }
 0x192   :  { %v6089_v22 = vpack.c.bf16 %v6075_v43, %v6063_v11  ;;  %v6093_v57 = vsel %vm628_vm2, %v607_v36, %v623_v62  ;;  %v543_v3 = vrot.slane %v445_v31, 1  ;;  %v544_v4 = vrot.slane %v446_v42, 1  ;;  %4750 = vmatpush3.bf16.msra.mxu1 %v5337_v12  ;;  %4814 = vmatpush3.bf16.msra.mxu0 %v5344_v15  ;;  %v5346_v21 = vld [vmem:[%s7490_s2 + $0x1b8] sm:$0xff]   ;;  %v6109_v12 = vld [vmem:[%s7490_s2 + $0x200] sm:$0xff]  }
 0x193   :  { %v6103_v48 = vpack.c.bf16 %v6093_v57, %v6079_v23  ;;  %v559_v0 = vrot.slane %v429_v49, 1  ;;  %v560_v36 = vrot.slane %v6000_v9, 1  ;;  %v608_v62 = vrot.slane %v445_v31, 2  ;;  %4751 = vmatprep.subr.bf16.mxu1 %v5341_v51  ;;  %4815 = vmatprep.subr.bf16.mxu0 %v5345_v28 }
 0x194   :  { %v609_v15 = vrot.slane %v446_v42, 2  ;;  %v624_v6 = vrot.slane %v429_v49, 2  ;;  %v625_v18 = vrot.slane %v6000_v9, 2  ;;  %v6114_v41 = vpack.c.bf16 %v5974_v60, %v5993_v33 }
 0x195   :  { %v6118_v35 = vsel %vm563_vm1, %v543_v3, %v559_v0  ;;  %v6122_v51 = vsel %vm563_vm1, %v544_v4, %v560_v36  ;;  %v389_v28 = vmax.f32 %v5985_v5, 0.0  ;;  %v7520_v31 = vmax.f32 %v5710_v39, 0.0 }
 0x196   :  { %v6131_v9 = vpack.c.bf16 %v6122_v51, %v6118_v35  ;;  %v6135_v49 = vsel %vm628_vm2, %v608_v62, %v624_v6  ;;  %v6139_v3 = vsel %vm628_vm2, %v609_v15, %v625_v18  ;;  %v431_v5 = vsel %vm417_vm0, %v5729_v56, 0.0  ;;  %4752 = vmatpush3.bf16.msra.mxu1 %v5343_v8  ;;  %4816 = vmatpush3.bf16.msra.mxu0 %v5346_v21 }
 0x197   :  { %v6127_v42 = vrot.slane %v7520_v31, 7  ;;  %v6146_v39 = vpack.c.bf16 %v6139_v3, %v6135_v49  ;;  %v6148_v4 = vrot.slane %v389_v28, 7  ;;  %v447_v18 = vsel %vm417_vm0, 0.0, %v5729_v56  ;;  %5185 = vmatprep.subr.bf16.mxu1 %v6109_v12 }
 0x198   :  { %1824 = vmatmul.mubr.bf16.gmra.mrb[32].mxu0 %v649_v47  ;;  %4383 = vmatmul.mubr.msk.bf16.gmra.mrb[16].mxu1 %vm5781_vm6, %v6007_v10  ;;  %v545_v21 = vrot.slane %v447_v18, 1  ;;  %v561_v0 = vrot.slane %v431_v5, 1  ;;  %v7521_v62 = vpack.c.bf16 %v5993_v33, %v5991_v32  ;;  %v610_v10 = vrot.slane %v447_v18, 2 }
 0x199   :  { %v432_v6 = vsel %vm417_vm0, %v6127_v42, 0.0  ;;  %v448_v8 = vsel %vm417_vm0, 0.0, %v6127_v42  ;;  %1734 = vmatprep.mubr.bf16.mxu1 %v6089_v22  ;;  %v4437_v47 = vpack.c.bf16 %v6148_v4, %v6127_v42  ;;  %v626_v46 = vrot.slane %v431_v5, 2 }
 0x19a   :  { %v562_v36 = vrot.slane %v432_v6, 1  ;;  %4428 = vmatprep.mubr.msk.bf16.mxu0 %vm5739_vm4, %v7521_v62  ;;  %v546_v15 = vrot.slane %v448_v8, 1  ;;  %v611_v28 = vrot.slane %v448_v8, 2  ;;  %v6173_v31 = vsel %vm563_vm1, %v545_v21, %v561_v0 }
 0x19b   :  { %v627_v25 = vrot.slane %v432_v6, 2  ;;  %v6177_v32 = vpack.c.bf16 %v6127_v42, %v5729_v56  ;;  %v821_v62 = vpack.c.bf16 %v5822_v59, %v5776_v45  ;;  %v758_v18 = vpack.c.bf16 %v5855_v17, %v5807_v27 }
 0x19c   :  { %v6181_v33 = vsel %vm563_vm1, %v546_v15, %v562_v36  ;;  %v6193_v5 = vsel %vm628_vm2, %v610_v10, %v626_v46  ;;  %v425_v27 = vsel %vm417_vm0, %v5908_v61, 0.0  ;;  %v441_v46 = vsel %vm417_vm0, 0.0, %v5908_v61 }
 0x19d   :  { %v6189_v8 = vpack.c.bf16 %v6181_v33, %v6173_v31  ;;  %v6197_v42 = vsel %vm628_vm2, %v611_v28, %v627_v25  ;;  %v716_v59 = vrot.slane %v441_v46, 1  ;;  %v732_v17 = vrot.slane %v425_v27, 1 }
 0x19e   :  { %v6201_v6 = vpack.c.bf16 %v6197_v42, %v6193_v5  ;;  %v433_v15 = vsel %vm417_vm0, %v6148_v4, 0.0  ;;  %v7522_v10 = vpack.c.bf16 %v5729_v56, %v5974_v60  ;;  %v763_v36 = vpack.c.bf16 %v6173_v31, %v6122_v51 }
 0x19f   :  { %v6221_v0 = vsel %vm563_vm1, %v716_v59, %v732_v17  ;;  %v449_v59 = vsel %vm417_vm0, 0.0, %v6148_v4  ;;  %v740_v56 = vrot.slane %v433_v15, 1  ;;  %v804_v25 = vrot.slane %v433_v15, 2 }
 0x1a0   :  { %1832 = vmatmul.mubr.bf16.gmra.mrb[36].mxu0 %v6103_v48  ;;  %4388 = vmatmul.mubr.msk.bf16.gmra.mrb[20].mxu1 %vm5739_vm4, %v6066_v52  ;;  %v760_v28 = vpack.c.bf16 %v6221_v0, %v5946_v24  ;;  %v724_v21 = vrot.slane %v449_v59, 1  ;;  %v788_v60 = vrot.slane %v449_v59, 2  ;;  %v7528_v54 = vpack.c.bf16 %v6063_v11, %v6032_v53 }
 0x1a1   :  { %4433 = vmatprep.mubr.msk.bf16.mxu0 %vm5739_vm4, %v7522_v10  ;;  %1742 = vmatprep.mubr.bf16.mxu1 %v6131_v9  ;;  %v7531_v53 = vpack.c.bf16 %v6193_v5, %v6139_v3 }
 0x1a2   :  { %v6245_v10 = vsel %vm563_vm1, %v724_v21, %v740_v56  ;;  %v6249_v24 = vsel %vm628_vm2, %v788_v60, %v804_v25  ;;  %v5348_v25 = vld [vmem:[%s7490_s2 + $0x208] sm:$0xff]   ;;  %v822_v21 = vpack.c.bf16 %v5872_v37, %v5826_v29  ;;  %v796_v29 = vrot.slane %v425_v27, 2 }
 0x1a3   :  { %v764_v45 = vpack.c.bf16 %v6245_v10, %v6181_v33  ;;  %v828_v17 = vpack.c.bf16 %v6249_v24, %v6197_v42  ;;  %v941_v11 = vpack.c.bf16 %v5678_v40, %v6245_v10 }
 0x1a8   :  { %1840 = vmatmul.mubr.bf16.gmra.mrb[40].mxu0 %v6146_v39  ;;  %4393 = vmatmul.mubr.msk.bf16.gmra.mrb[24].mxu1 %vm5739_vm4, %v6114_v41 }
 0x1a9   :  { %4438 = vmatprep.mubr.msk.bf16.mxu0 %vm5739_vm4, %v4437_v47  ;;  %1750 = vmatprep.mubr.bf16.mxu1 %v6189_v8  ;;  %v7523_v47 = vpack.c.bf16 %v5770_v20, %v5761_v14  ;;  %v5350_v14 = vld [vmem:[%s7490_s2 + $0x218] sm:$0xff]   ;;  %v780_v20 = vrot.slane %v441_v46, 2 }
 0x1ab   :  { %v812_v37 = vsel %vm628_vm2, %v780_v20, %v796_v29 }
 0x1b0   :  { %1848 = vmatmul.mubr.bf16.gmra.mrb[44].mxu0 %v6201_v6  ;;  %4398 = vmatmul.mubr.msk.bf16.gmra.mrb[28].mxu1 %vm5739_vm4, %v6177_v32 }
 0x1b1   :  { %1985 = vmatprep.mubr.bf16.mxu0 %v5818_v58  ;;  %1888 = vmatprep.mubr.bf16.mxu1 %v821_v62  ;;  %v5349_v58 = vld [vmem:[%s7490_s2 + $0x210] sm:$0xff]  }
 0x1b8   :  { %4443 = vmatmul.mubr.msk.bf16.vlgmr.msra.gmra.mrb[48].mxu0 %vm5739_vm4, %v5798_v26  ;;  %1889 = vmatmul.mubr.bf16.vlgmr.msra.gmra.mrb[32].mxu1 %v7523_v47  ;;  %v823_v26 = vpack.c.bf16 %v5940_v13, %v5876_v38  ;;  %v937_v38 = vpack.c.bf16 %v5678_v40, %v6221_v0  ;;  %v5352_v13 = vld [vmem:[%s7490_s2 + $0x228] sm:$0xff]  }
 0x1b9   :  { %1993 = vmatprep.mubr.bf16.mxu0 %v5868_v34  ;;  %5186 = vmatpush3.bf16.msra.mxu1 %v6109_v12  ;;  %v5351_v34 = vld [vmem:[%s7490_s2 + $0x220] sm:$0xff]  }
 0x1ba   :  { %1896 = vmatprep.mubr.bf16.mxu1 %v822_v21  ;;  %5187 = vmatprep.subr.bf16.mxu1 %v5348_v25 }
 0x1bd   :  { %5188 = vmatpush3.bf16.msra.mxu1 %v5348_v25 }
 0x1be   :  { %5189 = vmatprep.subr.bf16.mxu1 %v5349_v58 }
 0x1c0   :  { %4448 = vmatmul.mubr.msk.bf16.gmra.mrb[52].mxu0 %vm5739_vm4, %v5862_v44  ;;  %1897 = vmatmul.mubr.bf16.gmra.mrb[36].mxu1 %v758_v18  ;;  %v824_v44 = vpack.c.bf16 %v812_v37, %v5959_v2  ;;  %v5353_v2 = vld [vmem:[%s7490_s2 + $0x230] sm:$0xff]  }
 0x1c1   :  { %2001 = vmatprep.mubr.bf16.mxu0 %v5955_v50  ;;  %1904 = vmatprep.mubr.bf16.mxu1 %v823_v26  ;;  %v7524_v50 = vpack.c.bf16 %v5920_v1, %v5859_v19  ;;  %v825_v19 = vpack.c.bf16 %v6079_v23, %v6036_v55  ;;  %v5354_v1 = vld [vmem:[%s7490_s2 + $0x238] sm:$0xff]   ;;  %v7530_v55 = vpack.c.bf16 %v6118_v35, %v6075_v43  ;;  %v7534_v43 = vld [vmem:[#allocation5_spill] sm:$0xff] }
 0x1c2   :  { %5190 = vmatpush3.bf16.msra.mxu1 %v5349_v58  ;;  %v7532_v35 = vld [vmem:[#allocation7_spill] sm:$0xff]  ;;  %v1001_v23 = vpack.c.bf16 %v7534_v43, %v812_v37 }
 0x1c3   :  { %5191 = vmatprep.subr.bf16.mxu1 %v5350_v14 }
 0x1c6   :  { %5192 = vmatpush3.bf16.msra.mxu1 %v5350_v14 }
 0x1c7   :  { %5193 = vmatprep.subr.bf16.mxu1 %v5351_v34 }
 0x1c8   :  { %4453 = vmatmul.mubr.msk.bf16.gmra.mrb[56].mxu0 %vm5739_vm4, %v5923_v7  ;;  %1905 = vmatmul.mubr.bf16.gmra.mrb[40].mxu1 %v7524_v50  ;;  %v7527_v7 = vmov 0.0  }
 0x1c9   :  { %2009 = vmatprep.mubr.bf16.mxu0 %v937_v38  ;;  %1912 = vmatprep.mubr.bf16.mxu1 %v824_v44  ;;  %v4456_v62 = vpack.c.bf16 %v7527_v7, %v5908_v61  ;;  %v7529_v61 = vpack.c.bf16 %v6135_v49, %v6093_v57 }
 0x1ca   :  { %5194 = vmatpush3.bf16.msra.mxu1 %v5351_v34 }
 0x1cb   :  { %5195 = vmatprep.subr.bf16.mxu1 %v5352_v13 }
 0x1ce   :  { %5196 = vmatpush3.bf16.msra.mxu1 %v5352_v13 }
 0x1cf   :  { %5197 = vmatprep.subr.bf16.mxu1 %v5353_v2 }
 0x1d0   :  { %4457 = vmatmul.mubr.msk.bf16.gmra.mrb[60].mxu0 %vm6315_vm7, %v4456_v62  ;;  %1913 = vmatmul.mubr.bf16.gmra.mrb[44].mxu1 %v760_v28 }
 0x1d1   :  { %2017 = vmatprep.mubr.bf16.mxu0 %v6089_v22  ;;  %1920 = vmatprep.mubr.bf16.mxu1 %v825_v19  ;;  %v1005_v22 = vpack.c.bf16 %v7534_v43, %v6249_v24 }
 0x1d2   :  { %5198 = vmatpush3.bf16.msra.mxu1 %v5353_v2 }
 0x1d3   :  { %5199 = vmatprep.subr.bf16.mxu1 %v5354_v1 }
 0x1d6   :  { %5200 = vmatpush3.bf16.msra.mxu1 %v5354_v1 }
 0x1d8   :  { %4462 = vmatmul.mubr.msk.bf16.gmra.mrb[64].mxu0 %vm5739_vm4, %v6066_v52  ;;  %1921 = vmatmul.mubr.bf16.gmra.mrb[48].mxu1 %v7528_v54  ;;  %v7533_v52 = vld [vmem:[#allocation8_spill] sm:$0xff] }
 0x1d9   :  { %2025 = vmatprep.mubr.bf16.mxu0 %v6131_v9  ;;  %1928 = vmatprep.mubr.bf16.mxu1 %v7529_v61 }
 0x1e0   :  { %4467 = vmatmul.mubr.msk.bf16.gmra.mrb[68].mxu0 %vm5739_vm4, %v6114_v41  ;;  %1929 = vmatmul.mubr.bf16.gmra.mrb[52].mxu1 %v7530_v55  ;;  %v4475_v41 = vpack.c.bf16 %v7527_v7, %v6148_v4 }
 0x1e1   :  { %2033 = vmatprep.mubr.bf16.mxu0 %v6189_v8  ;;  %1936 = vmatprep.mubr.bf16.mxu1 %v7531_v53 }
 0x1e8   :  { %4472 = vmatmul.mubr.msk.bf16.gmra.mrb[72].mxu0 %vm5739_vm4, %v6177_v32  ;;  %1937 = vmatmul.mubr.bf16.gmra.mrb[56].mxu1 %v763_v36 }
 0x1e9   :  { %2041 = vmatprep.mubr.bf16.mxu0 %v941_v11  ;;  %1944 = vmatprep.mubr.bf16.mxu1 %v828_v17 }
 0x1f0   :  { %4476 = vmatmul.mubr.msk.bf16.gmra.mrb[76].mxu0 %vm6315_vm7, %v4475_v41  ;;  %1945 = vmatmul.mubr.bf16.gmra.mrb[60].mxu1 %v764_v45 }
 0x1f1   :  { %5201 = vmatprep.mubr.bf16.mxu1 %v5836_v30 }
 0x1f8   :  { %5202 = vmatmul.mubr.bf16.vlgmr.msra.gmra.mrb[64].mxu1 %v7532_v35 }
 0x1f9   :  { %5205 = vmatprep.mubr.bf16.mxu1 %v7533_v52 }
 0x200   :  { %5206 = vmatmul.mubr.bf16.gmra.mrb[68].mxu1 %v1001_v23 }
 0x201   :  { %5209 = vmatprep.mubr.bf16.mxu1 %v6103_v48 }
 0x208   :  { %5210 = vmatmul.mubr.bf16.gmra.mrb[72].mxu1 %v6146_v39 }
 0x209   :  { %5213 = vmatprep.mubr.bf16.mxu1 %v6201_v6 }
 0x210   :  { %5214 = vmatmul.mubr.bf16.gmra.mrb[76].mxu1 %v1005_v22 }
 0x24b   :  { %v4689_v57 = vpop.f32.mrb[16].mxu0  ;;  %v4625_v51 = vpop.f32.mrb[0].mxu1 }
 0x24c   :  { %v4690_v30 = vpop.f32.mrb[17].mxu0  ;;  %v4626_v9 = vpop.f32.mrb[1].mxu1 }
 0x24d   :  { %v4691_v49 = vadd.f32 %v4690_v30, %v4689_v57  ;;  %v4627_v3 = vadd.f32 %v4626_v9, %v4625_v51  ;;  %v4692_v4 = vpop.f32.mrb[18].mxu0  ;;  %v4628_v31 = vpop.f32.mrb[2].mxu1 }
 0x24e   :  { %v4693_v32 = vpop.f32.mrb[19].mxu0  ;;  %v4629_v33 = vpop.f32.mrb[3].mxu1 }
 0x24f   :  { %v6376_v18 = vadd.f32 %v4691_v49, %v4627_v3  ;;  %v4694_v48 = vadd.f32 %v4693_v32, %v4692_v4  ;;  %v4630_v39 = vadd.f32 %v4629_v33, %v4628_v31 }
 0x251   :  { %v6378_v8 = vadd.f32 %v4694_v48, %v4630_v39 }
 0x253   :  { %v4695_v5 = vpop.f32.mrb[20].mxu0  ;;  %v4631_v42 = vpop.f32.mrb[4].mxu1 }
 0x254   :  { %v4696_v6 = vpop.f32.mrb[21].mxu0  ;;  %v4632_v45 = vpop.f32.mrb[5].mxu1 }
 0x255   :  { %v4697_v27 = vadd.f32 %v4696_v6, %v4695_v5  ;;  %v4633_v46 = vadd.f32 %v4632_v45, %v4631_v42  ;;  %v4698_v0 = vpop.f32.mrb[22].mxu0  ;;  %v4634_v36 = vpop.f32.mrb[6].mxu1 }
 0x256   :  { %v4699_v15 = vpop.f32.mrb[23].mxu0  ;;  %v4635_v28 = vpop.f32.mrb[7].mxu1 }
 0x257   :  { %v6380_v59 = vadd.f32 %v4697_v27, %v4633_v46  ;;  %v4700_v17 = vadd.f32 %v4699_v15, %v4698_v0  ;;  %v4636_v56 = vadd.f32 %v4635_v28, %v4634_v36 }
 0x259   :  { %v6382_v60 = vadd.f32 %v4700_v17, %v4636_v56 }
 0x25b   :  { %v4701_v10 = vpop.f32.mrb[24].mxu0  ;;  %v4637_v24 = vpop.f32.mrb[8].mxu1 }
 0x25c   :  { %v4702_v25 = vpop.f32.mrb[25].mxu0  ;;  %v4638_v47 = vpop.f32.mrb[9].mxu1 }
 0x25d   :  { %v4703_v21 = vadd.f32 %v4702_v25, %v4701_v10  ;;  %v4639_v58 = vadd.f32 %v4638_v47, %v4637_v24  ;;  %v4704_v26 = vpop.f32.mrb[26].mxu0  ;;  %v4640_v14 = vpop.f32.mrb[10].mxu1 }
 0x25e   :  { %v4705_v20 = vpop.f32.mrb[27].mxu0  ;;  %v4641_v29 = vpop.f32.mrb[11].mxu1 }
 0x25f   :  { %v6384_v34 = vadd.f32 %v4703_v21, %v4639_v58  ;;  %v4706_v37 = vadd.f32 %v4705_v20, %v4704_v26  ;;  %v4642_v38 = vadd.f32 %v4641_v29, %v4640_v14 }
 0x261   :  { %v6386_v44 = vadd.f32 %v4706_v37, %v4642_v38 }
 0x263   :  { %v4707_v13 = vpop.f32.mrb[28].mxu0  ;;  %v4643_v50 = vpop.f32.mrb[12].mxu1 }
 0x264   :  { %v4708_v2 = vpop.f32.mrb[29].mxu0  ;;  %v4644_v62 = vpop.f32.mrb[13].mxu1 }
 0x265   :  { %v4709_v19 = vadd.f32 %v4708_v2, %v4707_v13  ;;  %v4645_v1 = vadd.f32 %v4644_v62, %v4643_v50  ;;  %v4710_v54 = vpop.f32.mrb[30].mxu0  ;;  %v4646_v61 = vpop.f32.mrb[14].mxu1 }
 0x266   :  { %v4711_v55 = vpop.f32.mrb[31].mxu0  ;;  %v4647_v53 = vpop.f32.mrb[15].mxu1 }
 0x267   :  { %v6388_v11 = vadd.f32 %v4709_v19, %v4645_v1  ;;  %v4712_v41 = vadd.f32 %v4711_v55, %v4710_v54  ;;  %v4648_v35 = vadd.f32 %v4647_v53, %v4646_v61 }
 0x269   :  { %v6390_v52 = vadd.f32 %v4712_v41, %v4648_v35 }
 0x26b   :  { %v4713_v23 = vpop.f32.mrb[32].mxu0  ;;  %v4649_v22 = vpop.f32.mrb[16].mxu1 }
 0x26c   :  { %v4714_v57 = vpop.f32.mrb[33].mxu0  ;;  %v4650_v51 = vpop.f32.mrb[17].mxu1 }
 0x26d   :  { %v4715_v30 = vadd.f32 %v4714_v57, %v4713_v23  ;;  %v4651_v9 = vadd.f32 %v4650_v51, %v4649_v22  ;;  %v4716_v49 = vpop.f32.mrb[34].mxu0  ;;  %v4652_v3 = vpop.f32.mrb[18].mxu1 }
 0x26e   :  { %v4717_v4 = vpop.f32.mrb[35].mxu0  ;;  %v4653_v31 = vpop.f32.mrb[19].mxu1 }
 0x26f   :  { %v6392_v32 = vadd.f32 %v4715_v30, %v4651_v9  ;;  %v4718_v33 = vadd.f32 %v4717_v4, %v4716_v49  ;;  %v4654_v48 = vadd.f32 %v4653_v31, %v4652_v3 }
 0x271   :  { %v6394_v39 = vadd.f32 %v4718_v33, %v4654_v48 }
 0x273   :  { %v4719_v5 = vpop.f32.mrb[36].mxu0  ;;  %v4655_v42 = vpop.f32.mrb[20].mxu1 }
 0x274   :  { %v4720_v6 = vpop.f32.mrb[37].mxu0  ;;  %v4656_v45 = vpop.f32.mrb[21].mxu1 }
 0x275   :  { %v4721_v27 = vadd.f32 %v4720_v6, %v4719_v5  ;;  %v4657_v46 = vadd.f32 %v4656_v45, %v4655_v42  ;;  %v4722_v0 = vpop.f32.mrb[38].mxu0  ;;  %v4658_v36 = vpop.f32.mrb[22].mxu1 }
 0x276   :  { %v4723_v15 = vpop.f32.mrb[39].mxu0  ;;  %v4659_v28 = vpop.f32.mrb[23].mxu1 }
 0x277   :  { %v6396_v17 = vadd.f32 %v4721_v27, %v4657_v46  ;;  %v4724_v56 = vadd.f32 %v4723_v15, %v4722_v0  ;;  %v4660_v10 = vadd.f32 %v4659_v28, %v4658_v36 }
 0x279   :  { %v6398_v24 = vadd.f32 %v4724_v56, %v4660_v10 }
 0x27b   :  { %v4725_v25 = vpop.f32.mrb[40].mxu0  ;;  %v4661_v47 = vpop.f32.mrb[24].mxu1 }
 0x27c   :  { %v4726_v21 = vpop.f32.mrb[41].mxu0  ;;  %v4662_v58 = vpop.f32.mrb[25].mxu1 }
 0x27d   :  { %v4727_v26 = vadd.f32 %v4726_v21, %v4725_v25  ;;  %v4663_v14 = vadd.f32 %v4662_v58, %v4661_v47  ;;  %v4728_v20 = vpop.f32.mrb[42].mxu0  ;;  %v4664_v29 = vpop.f32.mrb[26].mxu1 }
 0x27e   :  { %v4729_v37 = vpop.f32.mrb[43].mxu0  ;;  %v4665_v38 = vpop.f32.mrb[27].mxu1 }
 0x27f   :  { %v6400_v13 = vadd.f32 %v4727_v26, %v4663_v14  ;;  %v4730_v50 = vadd.f32 %v4729_v37, %v4728_v20  ;;  %v4666_v2 = vadd.f32 %v4665_v38, %v4664_v29 }
 0x281   :  { %v6402_v62 = vadd.f32 %v4730_v50, %v4666_v2 }
 0x283   :  { %v4731_v19 = vpop.f32.mrb[44].mxu0  ;;  %v4667_v1 = vpop.f32.mrb[28].mxu1 }
 0x284   :  { %v4732_v54 = vpop.f32.mrb[45].mxu0  ;;  %v4668_v61 = vpop.f32.mrb[29].mxu1 }
 0x285   :  { %v4733_v55 = vadd.f32 %v4732_v54, %v4731_v19  ;;  %v4669_v53 = vadd.f32 %v4668_v61, %v4667_v1  ;;  %v4734_v41 = vpop.f32.mrb[46].mxu0  ;;  %v4670_v35 = vpop.f32.mrb[30].mxu1 }
 0x286   :  { %v4735_v23 = vpop.f32.mrb[47].mxu0  ;;  %v4671_v22 = vpop.f32.mrb[31].mxu1 }
 0x287   :  { %v6404_v57 = vadd.f32 %v4733_v55, %v4669_v53  ;;  %v4736_v51 = vadd.f32 %v4735_v23, %v4734_v41  ;;  %v4672_v30 = vadd.f32 %v4671_v22, %v4670_v35 }
 0x289   :  { %v6406_v9 = vadd.f32 %v4736_v51, %v4672_v30 }
 0x28b   :  { %v4817_v49 = vpop.f32.mrb[48].mxu0  ;;  %v4753_v3 = vpop.f32.mrb[32].mxu1 }
 0x28c   :  { %v4818_v4 = vpop.f32.mrb[49].mxu0  ;;  %v4754_v31 = vpop.f32.mrb[33].mxu1 }
 0x28d   :  { %v4819_v33 = vadd.f32 %v4818_v4, %v4817_v49  ;;  %v4755_v48 = vadd.f32 %v4754_v31, %v4753_v3  ;;  %v4820_v5 = vpop.f32.mrb[50].mxu0  ;;  %v4756_v42 = vpop.f32.mrb[34].mxu1 }
 0x28e   :  { %v4821_v6 = vpop.f32.mrb[51].mxu0  ;;  %v4757_v45 = vpop.f32.mrb[35].mxu1 }
 0x28f   :  { %v1891_v27 = vadd.f32 %v4755_v48, %v6376_v18  ;;  %v4822_v46 = vadd.f32 %v4821_v6, %v4820_v5  ;;  %v4758_v0 = vadd.f32 %v4757_v45, %v4756_v42 }
 0x291   :  { %v1894_v36 = vadd.f32 %v4758_v0, %v6378_v8  ;;  %v6410_v15 = vadd.f32 %v4819_v33, %v1891_v27 }
 0x293   :  { %v4823_v28 = vpop.f32.mrb[52].mxu0  ;;  %v4759_v56 = vpop.f32.mrb[36].mxu1  ;;  %v6412_v10 = vadd.f32 %v4822_v46, %v1894_v36 }
 0x294   :  { %v4824_v25 = vpop.f32.mrb[53].mxu0  ;;  %v4760_v47 = vpop.f32.mrb[37].mxu1 }
 0x295   :  { %v4825_v21 = vadd.f32 %v4824_v25, %v4823_v28  ;;  %v4761_v58 = vadd.f32 %v4760_v47, %v4759_v56  ;;  %v4826_v26 = vpop.f32.mrb[54].mxu0  ;;  %v4762_v14 = vpop.f32.mrb[38].mxu1 }
 0x296   :  { %v4827_v20 = vpop.f32.mrb[55].mxu0  ;;  %v4763_v29 = vpop.f32.mrb[39].mxu1 }
 0x297   :  { %v1899_v18 = vadd.f32 %v4761_v58, %v6380_v59  ;;  %v4828_v37 = vadd.f32 %v4827_v20, %v4826_v26  ;;  %v4764_v38 = vadd.f32 %v4763_v29, %v4762_v14 }
 0x299   :  { %v1902_v8 = vadd.f32 %v4764_v38, %v6382_v60  ;;  %v6416_v50 = vadd.f32 %v4825_v21, %v1899_v18 }
 0x29b   :  { %v4829_v2 = vpop.f32.mrb[56].mxu0  ;;  %v4765_v19 = vpop.f32.mrb[40].mxu1  ;;  %v6418_v1 = vadd.f32 %v4828_v37, %v1902_v8 }
 0x29c   :  { %v4830_v54 = vpop.f32.mrb[57].mxu0  ;;  %v4766_v61 = vpop.f32.mrb[41].mxu1 }
 0x29d   :  { %v4831_v55 = vadd.f32 %v4830_v54, %v4829_v2  ;;  %v4767_v53 = vadd.f32 %v4766_v61, %v4765_v19  ;;  %v4832_v41 = vpop.f32.mrb[58].mxu0  ;;  %v4768_v35 = vpop.f32.mrb[42].mxu1 }
 0x29e   :  { %v4833_v23 = vpop.f32.mrb[59].mxu0  ;;  %v4769_v22 = vpop.f32.mrb[43].mxu1 }
 0x29f   :  { %v1907_v59 = vadd.f32 %v4767_v53, %v6384_v34  ;;  %v4834_v51 = vadd.f32 %v4833_v23, %v4832_v41  ;;  %v4770_v30 = vadd.f32 %v4769_v22, %v4768_v35 }
 0x2a1   :  { %v1910_v60 = vadd.f32 %v4770_v30, %v6386_v44  ;;  %v6422_v49 = vadd.f32 %v4831_v55, %v1907_v59 }
 0x2a3   :  { %v4835_v3 = vpop.f32.mrb[60].mxu0  ;;  %v4771_v4 = vpop.f32.mrb[44].mxu1  ;;  %v6424_v31 = vadd.f32 %v4834_v51, %v1910_v60 }
 0x2a4   :  { %v4836_v33 = vpop.f32.mrb[61].mxu0  ;;  %v4772_v48 = vpop.f32.mrb[45].mxu1 }
 0x2a5   :  { %v4837_v5 = vadd.f32 %v4836_v33, %v4835_v3  ;;  %v4773_v42 = vadd.f32 %v4772_v48, %v4771_v4  ;;  %v4838_v6 = vpop.f32.mrb[62].mxu0  ;;  %v4774_v45 = vpop.f32.mrb[46].mxu1 }
 0x2a6   :  { %v4839_v27 = vpop.f32.mrb[63].mxu0  ;;  %v4775_v46 = vpop.f32.mrb[47].mxu1 }
 0x2a7   :  { %v1915_v34 = vadd.f32 %v4773_v42, %v6388_v11  ;;  %v4840_v0 = vadd.f32 %v4839_v27, %v4838_v6  ;;  %v4776_v36 = vadd.f32 %v4775_v46, %v4774_v45 }
 0x2a9   :  { %v1918_v44 = vadd.f32 %v4776_v36, %v6390_v52  ;;  %v6428_v28 = vadd.f32 %v4837_v5, %v1915_v34 }
 0x2ab   :  { %v4841_v56 = vpop.f32.mrb[64].mxu0  ;;  %v4777_v25 = vpop.f32.mrb[48].mxu1  ;;  %v6430_v47 = vadd.f32 %v4840_v0, %v1918_v44 }
 0x2ac   :  { %v4842_v21 = vpop.f32.mrb[65].mxu0  ;;  %v4778_v58 = vpop.f32.mrb[49].mxu1 }
 0x2ad   :  { %v4843_v26 = vadd.f32 %v4842_v21, %v4841_v56  ;;  %v4779_v14 = vadd.f32 %v4778_v58, %v4777_v25  ;;  %v4844_v20 = vpop.f32.mrb[66].mxu0  ;;  %v4780_v29 = vpop.f32.mrb[50].mxu1 }
 0x2ae   :  { %v4845_v18 = vpop.f32.mrb[67].mxu0  ;;  %v4781_v37 = vpop.f32.mrb[51].mxu1 }
 0x2af   :  { %v1923_v11 = vadd.f32 %v4779_v14, %v6392_v32  ;;  %v4846_v38 = vadd.f32 %v4845_v18, %v4844_v20  ;;  %v4782_v8 = vadd.f32 %v4781_v37, %v4780_v29 }
 0x2b1   :  { %v1926_v52 = vadd.f32 %v4782_v8, %v6394_v39  ;;  %v6434_v2 = vadd.f32 %v4843_v26, %v1923_v11 }
 0x2b3   :  { %v4847_v19 = vpop.f32.mrb[68].mxu0  ;;  %v4783_v54 = vpop.f32.mrb[52].mxu1  ;;  %v6436_v61 = vadd.f32 %v4846_v38, %v1926_v52 }
 0x2b4   :  { %v4848_v55 = vpop.f32.mrb[69].mxu0  ;;  %v4784_v53 = vpop.f32.mrb[53].mxu1 }
 0x2b5   :  { %v4849_v41 = vadd.f32 %v4848_v55, %v4847_v19  ;;  %v4785_v35 = vadd.f32 %v4784_v53, %v4783_v54  ;;  %v4850_v23 = vpop.f32.mrb[70].mxu0  ;;  %v4786_v22 = vpop.f32.mrb[54].mxu1  ;;  %v5355_v54 = vld [vmem:[%s7493_s3 + $0x40] sm:$0xff]  }
 0x2b6   :  { %v4851_v59 = vpop.f32.mrb[71].mxu0  ;;  %v4787_v51 = vpop.f32.mrb[55].mxu1  ;;  %v5356_v55 = vld [vmem:[%s7493_s3] sm:$0xff]   ;;  %4881 = vmatprep.subr.bf16.mxu0 %v5355_v54 }
 0x2b7   :  { %v1931_v32 = vadd.f32 %v4785_v35, %v6396_v17  ;;  %v4852_v30 = vadd.f32 %v4851_v59, %v4850_v23  ;;  %v4788_v60 = vadd.f32 %v4787_v51, %v4786_v22  ;;  %4882 = vmatpush3.bf16.msra.mxu0 %v5356_v55  ;;  %v5358_v23 = vld [vmem:[%s7493_s3 + $0x8] sm:$0xff]   ;;  %v5359_v51 = vld [vmem:[%s7493_s3 + $0x50] sm:$0xff]   ;;  %v5376_v55 = vld [vmem:[%s7493_s3 + $0xe0] sm:$0xff]  }
 0x2b9   :  { %v1934_v39 = vadd.f32 %v4788_v60, %v6398_v24  ;;  %v6440_v3 = vadd.f32 %v4849_v41, %v1931_v32  ;;  %v5360_v60 = vld [vmem:[%s7493_s3 + $0x10] sm:$0xff]  }
 0x2bb   :  { %v4853_v4 = vpop.f32.mrb[72].mxu0  ;;  %v4789_v33 = vpop.f32.mrb[56].mxu1  ;;  %v6442_v48 = vadd.f32 %v4852_v30, %v1934_v39  ;;  %v5361_v39 = vld [vmem:[%s7493_s3 + $0x58] sm:$0xff]  }
 0x2bc   :  { %v4854_v5 = vpop.f32.mrb[73].mxu0  ;;  %v4790_v42 = vpop.f32.mrb[57].mxu1 }
 0x2bd   :  { %v4855_v6 = vadd.f32 %v4854_v5, %v4853_v4  ;;  %v4791_v45 = vadd.f32 %v4790_v42, %v4789_v33  ;;  %v4856_v27 = vpop.f32.mrb[74].mxu0  ;;  %v4792_v46 = vpop.f32.mrb[58].mxu1  ;;  %v5363_v5 = vld [vmem:[%s7493_s3 + $0x60] sm:$0xff]  }
 0x2be   :  { %v4857_v34 = vpop.f32.mrb[75].mxu0  ;;  %v4793_v0 = vpop.f32.mrb[59].mxu1 }
 0x2bf   :  { %v1939_v17 = vadd.f32 %v4791_v45, %v6400_v13  ;;  %v4858_v36 = vadd.f32 %v4857_v34, %v4856_v27  ;;  %v4794_v44 = vadd.f32 %v4793_v0, %v4792_v46  ;;  %v5366_v45 = vld [vmem:[%s7493_s3 + $0x80] sm:$0xff]   ;;  %v5367_v0 = vld [vmem:[%s7493_s3 + $0xc8] sm:$0xff]  }
 0x2c1   :  { %v1942_v24 = vadd.f32 %v4794_v44, %v6402_v62  ;;  %v6446_v56 = vadd.f32 %v4855_v6, %v1939_v17 }
 0x2c3   :  { %v4859_v25 = vpop.f32.mrb[76].mxu0  ;;  %v4795_v21 = vpop.f32.mrb[60].mxu1  ;;  %v6448_v58 = vadd.f32 %v4858_v36, %v1942_v24  ;;  %v5368_v36 = vld [vmem:[%s7493_s3 + $0x88] sm:$0xff]   ;;  %v5365_v24 = vld [vmem:[%s7493_s3 + $0x20] sm:$0xff]  }
 0x2c4   :  { %v4860_v26 = vpop.f32.mrb[77].mxu0  ;;  %v4796_v14 = vpop.f32.mrb[61].mxu1 }
 0x2c5   :  { %v4861_v20 = vadd.f32 %v4860_v26, %v4859_v25  ;;  %v4797_v29 = vadd.f32 %v4796_v14, %v4795_v21  ;;  %v4862_v18 = vpop.f32.mrb[78].mxu0  ;;  %v4798_v37 = vpop.f32.mrb[62].mxu1  ;;  %v5369_v21 = vld [vmem:[%s7493_s3 + $0x68] sm:$0xff]  }
 0x2c6   :  { %v4863_v11 = vpop.f32.mrb[79].mxu0  ;;  %v4799_v38 = vpop.f32.mrb[63].mxu1 }
 0x2c7   :  { %v1947_v13 = vadd.f32 %v4797_v29, %v6404_v57  ;;  %v4864_v8 = vadd.f32 %v4863_v11, %v4862_v18  ;;  %v4800_v52 = vadd.f32 %v4799_v38, %v4798_v37  ;;  %v5357_v57 = vld [vmem:[%s7493_s3 + $0x48] sm:$0xff]  }
 0x2c8   :  { %4883 = vmatprep.subr.bf16.mxu0 %v5357_v57  ;;  %v5371_v37 = vld [vmem:[%s7493_s3 + $0x28] sm:$0xff]   ;;  %v5378_v57 = vld [vmem:[%s7493_s3 + $0xa0] sm:$0xff]  }
 0x2c9   :  { %v1950_v62 = vadd.f32 %v4800_v52, %v6406_v9  ;;  %v6452_v19 = vadd.f32 %v4861_v20, %v1947_v13  ;;  %4884 = vmatpush3.bf16.msra.mxu0 %v5358_v23  ;;  %v5373_v20 = vld [vmem:[%s7493_s3 + $0xd8] sm:$0xff]  }
 0x2ca   :  { %4885 = vmatprep.subr.bf16.mxu0 %v5359_v51 }
 0x2cb   :  { %v5203_v53 = vpop.f32.mrb[64].mxu1  ;;  %v6460_v41 = vadd.f32 %v4864_v8, %v1950_v62  ;;  %v5375_v8 = vld [vmem:[%s7493_s3 + $0x70] sm:$0xff]   ;;  %v5374_v62 = vld [vmem:[%s7493_s3 + $0x98] sm:$0xff]  }
 0x2cc   :  { %v6466_v9 = vadd.f32 %v5203_v53, %v6416_v50  ;;  %v2084_v35 = vpop.f32.mrb[65].mxu1 }
 0x2cd   :  { %v6472_v22 = vadd.f32 %v2084_v35, %v6410_v15  ;;  %v5204_v59 = vpop.f32.mrb[66].mxu1  ;;  %4886 = vmatpush3.bf16.msra.mxu0 %v5360_v60 }
 0x2ce   :  { %v6478_v32 = vadd.f32 %v5204_v59, %v6418_v1  ;;  %v2087_v50 = vpop.f32.mrb[67].mxu1  ;;  %v5362_v1 = vld [vmem:[%s7493_s3 + $0x18] sm:$0xff]   ;;  %4887 = vmatprep.subr.bf16.mxu0 %v5361_v39 }
 0x2cf   :  { %v6481_v30 = vadd.f32 %v2087_v50, %v6412_v10  ;;  %v5364_v10 = vld [vmem:[%s7493_s3 + $0xc0] sm:$0xff]   ;;  %v5381_v59 = vld [vmem:[%s7493_s3 + $0x78] sm:$0xff]  }
 0x2d0   :  { %4945 = vmatprep.subr.bf16.mxu1 %v5364_v10 }
 0x2d1   :  { %v2151_v15 = vadd.f32 %v6481_v30, %v6472_v22  ;;  %4946 = vmatpush3.bf16.msra.mxu1 %v5366_v45  ;;  %4888 = vmatpush3.bf16.msra.mxu0 %v5362_v1  ;;  %v5383_v1 = vld [vmem:[%s7493_s3 + $0x38] sm:$0xff]   ;;  %v5384_v45 = vld [vmem:[%s7493_s3 + $0xb0] sm:$0xff]  }
 0x2d2   :  { %4947 = vmatprep.subr.bf16.mxu1 %v5367_v0  ;;  %4889 = vmatprep.subr.bf16.mxu0 %v5363_v5  ;;  %v5386_v0 = vld [vmem:[%s7493_s3 + $0xb8] sm:$0xff]  }
 0x2d3   :  { %v2152_v4 = vadd.f32 %v2151_v15, %v6466_v9  ;;  %v5207_v33 = vpop.f32.mrb[68].mxu1 }
 0x2d4   :  { %v6502_v42 = vadd.f32 %v5207_v33, %v6428_v28  ;;  %v2100_v6 = vpop.f32.mrb[69].mxu1 }
 0x2d5   :  { %v6508_v27 = vadd.f32 %v2100_v6, %v6422_v49  ;;  %v2153_v46 = vadd.f32 %v2152_v4, %v6478_v32  ;;  %v5208_v34 = vpop.f32.mrb[70].mxu1  ;;  %4948 = vmatpush3.bf16.msra.mxu1 %v5368_v36  ;;  %4890 = vmatpush3.bf16.msra.mxu0 %v5365_v24  ;;  %v5392_v36 = vld [vmem:[%s7493_s3 + $0x1c0] sm:$0xff]  }
 0x2d6   :  { %v6515_v28 = vadd.f32 %v5208_v34, %v6430_v47  ;;  %v2103_v17 = vpop.f32.mrb[71].mxu1  ;;  %v5370_v47 = vld [vmem:[%s7493_s3 + $0xd0] sm:$0xff]   ;;  %4891 = vmatprep.subr.bf16.mxu0 %v5369_v21 }
 0x2d7   :  { %v2154_v49 = vadd.f32 %v2153_v46, %v6508_v27  ;;  %v6522_v44 = vadd.f32 %v2103_v17, %v6424_v31  ;;  %v5372_v31 = vld [vmem:[%s7493_s3 + $0x90] sm:$0xff]   ;;  %4949 = vmatprep.subr.bf16.mxu1 %v5370_v47 }
 0x2d9   :  { %v2155_v25 = vadd.f32 %v2154_v49, %v6522_v44  ;;  %4950 = vmatpush3.bf16.msra.mxu1 %v5372_v31  ;;  %4892 = vmatpush3.bf16.msra.mxu0 %v5371_v37 }
 0x2da   :  { %4951 = vmatprep.subr.bf16.mxu1 %v5373_v20  ;;  %4893 = vmatprep.subr.bf16.mxu0 %v5375_v8 }
 0x2db   :  { %v2156_v26 = vadd.f32 %v2155_v25, %v6502_v42  ;;  %v5211_v14 = vpop.f32.mrb[72].mxu1 }
 0x2dc   :  { %v6542_v29 = vadd.f32 %v5211_v14, %v6440_v3  ;;  %v2116_v18 = vpop.f32.mrb[73].mxu1 }
 0x2dd   :  { %v6548_v11 = vadd.f32 %v2116_v18, %v6434_v2  ;;  %v2157_v38 = vadd.f32 %v2156_v26, %v6515_v28  ;;  %v5212_v13 = vpop.f32.mrb[74].mxu1  ;;  %4952 = vmatpush3.bf16.msra.mxu1 %v5374_v62 }
 0x2de   :  { %v6555_v3 = vadd.f32 %v5212_v13, %v6442_v48  ;;  %v2119_v52 = vpop.f32.mrb[75].mxu1  ;;  %v5377_v48 = vld [vmem:[%s7493_s3 + $0x30] sm:$0xff]   ;;  %4953 = vmatprep.subr.bf16.mxu1 %v5376_v55 }
 0x2df   :  { %v2158_v2 = vadd.f32 %v2157_v38, %v6548_v11  ;;  %v2120_v54 = vadd.f32 %v2119_v52, %v6436_v61  ;;  %v5379_v61 = vld [vmem:[%s7493_s3 + $0xe8] sm:$0xff]   ;;  %4894 = vmatpush3.bf16.msra.mxu0 %v5377_v48 }
 0x2e0   :  { %4895 = vmatprep.subr.bf16.mxu0 %v5381_v59 }
 0x2e1   :  { %v2159_v53 = vadd.f32 %v2158_v2, %v2120_v54  ;;  %4954 = vmatpush3.bf16.msra.mxu1 %v5378_v57 }
 0x2e2   :  { %4955 = vmatprep.subr.bf16.mxu1 %v5379_v61 }
 0x2e3   :  { %v2160_v35 = vadd.f32 %v2159_v53, %v6542_v29  ;;  %v5215_v23 = vpop.f32.mrb[76].mxu1  ;;  %4896 = vmatpush3.bf16.msra.mxu0 %v5383_v1 }
 0x2e4   :  { %v2141_v51 = vadd.f32 %v5215_v23, %v6452_v19  ;;  %v2132_v50 = vpop.f32.mrb[77].mxu1  ;;  %v5380_v19 = vld [vmem:[%s7493_s3 + $0xa8] sm:$0xff]  }
 0x2e5   :  { %v2133_v60 = vadd.f32 %v2132_v50, %v6446_v56  ;;  %v2161_v15 = vadd.f32 %v2160_v35, %v6555_v3  ;;  %v5216_v39 = vpop.f32.mrb[78].mxu1  ;;  %v5382_v56 = vld [vmem:[%s7493_s3 + $0xf0] sm:$0xff]   ;;  %4956 = vmatpush3.bf16.msra.mxu1 %v5380_v19 }
 0x2e6   :  { %v2144_v10 = vadd.f32 %v5216_v39, %v6460_v41  ;;  %v2135_v4 = vpop.f32.mrb[79].mxu1  ;;  %v5387_v41 = vld [vmem:[%s7493_s3 + $0x140] sm:$0xff]   ;;  %4957 = vmatprep.subr.bf16.mxu1 %v5382_v56 }
 0x2e7   :  { %v2162_v33 = vadd.f32 %v2161_v15, %v2133_v60  ;;  %v2136_v5 = vadd.f32 %v2135_v4, %v6448_v58  ;;  %v5385_v58 = vld [vmem:[%s7493_s3 + $0xf8] sm:$0xff]   ;;  %5009 = vmatprep.subr.bf16.mxu0 %v5387_v41 }
 0x2e9   :  { %v2163_v6 = vadd.f32 %v2162_v33, %v2136_v5  ;;  %4958 = vmatpush3.bf16.msra.mxu1 %v5384_v45 }
 0x2ea   :  { %4959 = vmatprep.subr.bf16.mxu1 %v5385_v58 }
 0x2eb   :  { %v2164_v46 = vadd.f32 %v2163_v6, %v2141_v51 }
 0x2ed   :  { %v2165_v34 = vadd.f32 %v2164_v46, %v2144_v10  ;;  %4960 = vmatpush3.bf16.msra.mxu1 %v5386_v0 }
 0x2ee   :  { %5073 = vmatprep.subr.bf16.mxu1 %v5392_v36 }
 0x2ef   :  { %v2166_v17 = vrot.slane %v2165_v34, 4 }
 0x2f1   :  { %v2167_v49 = vadd.f32 %v2166_v17, %v2165_v34 }
 0x2f3   :  { %v2168_v24 = vrot.slane %v2167_v49, 2 }
 0x2f5   :  { %v2169_v47 = vadd.f32 %v2168_v24, %v2167_v49 }
 0x2f7   :  { %v2170_v25 = vrot.slane %v2169_v47, 1 }
 0x2f9   :  { %v2171_v21 = vadd.f32 %v2170_v25, %v2169_v47  ;;  %v4283_v25 = vld [vmem:[%s7491_s4 + $0x1] sm:$0x1] }
 0x2fb   :  { %v2172_v31 = vmul.f32 0.0078125, %v2171_v21 }
 0x2fd   :  { %v6608_v26 = vsub.f32 %v6472_v22, %v2172_v31  ;;  %v6611_v14 = vsub.f32 %v6481_v30, %v2172_v31  ;;  %v6614_v20 = vsub.f32 %v6466_v9, %v2172_v31  ;;  %v6617_v18 = vsub.f32 %v6478_v32, %v2172_v31 }
 0x2fe   :  { %v6620_v37 = vsub.f32 %v6508_v27, %v2172_v31  ;;  %v6623_v38 = vsub.f32 %v6522_v44, %v2172_v31  ;;  %v6626_v13 = vsub.f32 %v6502_v42, %v2172_v31  ;;  %v6629_v22 = vsub.f32 %v6515_v28, %v2172_v31 }
 0x2ff   :  { %v6632_v30 = vsub.f32 %v6548_v11, %v2172_v31  ;;  %v6634_v9 = vsub.f32 %v2120_v54, %v2172_v31  ;;  %v6637_v32 = vsub.f32 %v6542_v29, %v2172_v31  ;;  %v2184_v27 = vsub.f32 %v6555_v3, %v2172_v31 }
 0x300   :  { %v2185_v8 = vsub.f32 %v2133_v60, %v2172_v31  ;;  %v2186_v52 = vsub.f32 %v2136_v5, %v2172_v31  ;;  %v2187_v44 = vsub.f32 %v2141_v51, %v2172_v31  ;;  %v2188_v62 = vsub.f32 %v2144_v10, %v2172_v31 }
 0x301   :  { %v2189_v42 = vmul.f32 %v6608_v26, %v6608_v26  ;;  %v2190_v28 = vmul.f32 %v6611_v14, %v6611_v14  ;;  %v2191_v11 = vmul.f32 %v6614_v20, %v6614_v20  ;;  %v2192_v29 = vmul.f32 %v6617_v18, %v6617_v18 }
 0x302   :  { %v2193_v3 = vmul.f32 %v6620_v37, %v6620_v37  ;;  %v2194_v48 = vmul.f32 %v6623_v38, %v6623_v38  ;;  %v2195_v57 = vmul.f32 %v6626_v13, %v6626_v13  ;;  %v2196_v35 = vmul.f32 %v6629_v22, %v6629_v22 }
 0x303   :  { %v2205_v2 = vadd.f32 %v2190_v28, %v2189_v42  ;;  %v2197_v59 = vmul.f32 %v6632_v30, %v6632_v30  ;;  %v2198_v50 = vmul.f32 %v6634_v9, %v6634_v9  ;;  %v2199_v15 = vmul.f32 %v6637_v32, %v6637_v32  ;;  %v7535_v42 = vld [vmem:[#allocation4_spill] sm:$0xff] }
 0x304   :  { %v2200_v1 = vmul.f32 %v2184_v27, %v2184_v27  ;;  %v2201_v4 = vmul.f32 %v2185_v8, %v2185_v8  ;;  %v2202_v33 = vmul.f32 %v2186_v52, %v2186_v52  ;;  %v2203_v56 = vmul.f32 %v2187_v44, %v2187_v44 }
 0x305   :  { %v2206_v54 = vadd.f32 %v2205_v2, %v2191_v11  ;;  %v2204_v41 = vmul.f32 %v2188_v62, %v2188_v62  ;;  %v6671_v11 = vld [vmem:[%s7492_s5 + $0x1] ss:$0 sm:$0xff] }
 0x307   :  { %v2207_v55 = vadd.f32 %v2206_v54, %v2192_v29 }
 0x309   :  { %v2208_v53 = vadd.f32 %v2207_v55, %v2193_v3 }
 0x30b   :  { %v2209_v61 = vadd.f32 %v2208_v53, %v2194_v48 }
 0x30d   :  { %v2210_v23 = vadd.f32 %v2209_v61, %v2195_v57 }
 0x30f   :  { %v2211_v51 = vadd.f32 %v2210_v23, %v2196_v35 }
 0x311   :  { %v2212_v60 = vadd.f32 %v2211_v51, %v2197_v59 }
 0x313   :  { %v2213_v39 = vadd.f32 %v2212_v60, %v2198_v50 }
 0x315   :  { %v2214_v10 = vadd.f32 %v2213_v39, %v2199_v15 }
 0x317   :  { %v2215_v19 = vadd.f32 %v2214_v10, %v2200_v1 }
 0x319   :  { %v2216_v5 = vadd.f32 %v2215_v19, %v2201_v4 }
 0x31b   :  { %v2217_v6 = vadd.f32 %v2216_v5, %v2202_v33 }
 0x31d   :  { %v2218_v45 = vadd.f32 %v2217_v6, %v2203_v56 }
 0x31f   :  { %v2219_v46 = vadd.f32 %v2218_v45, %v2204_v41 }
 0x321   :  { %v2220_v58 = vrot.slane %v2219_v46, 4 }
 0x323   :  { %v2221_v34 = vadd.f32 %v2220_v58, %v2219_v46 }
 0x325   :  { %v2222_v0 = vrot.slane %v2221_v34, 2 }
 0x327   :  { %v2223_v17 = vadd.f32 %v2222_v0, %v2221_v34 }
 0x329   :  { %v2224_v36 = vrot.slane %v2223_v17, 1 }
 0x32b   :  { %v2225_v49 = vadd.f32 %v2224_v36, %v2223_v17 }
 0x32d   :  { %v2226_v24 = vmul.f32 0.0078125, %v2225_v49 }
 0x32f   :  { %v2227_v47 = vadd.f32 1e-05, %v2226_v24 }
 0x331   :  { %5429 = vrsqrt.f32 %v2227_v47 }
 0x33b   :  { %v5430_v21 = vpop.eup %5429 }
 0x33c   :  { %v2229_v31 = vmul.f32 %v5430_v21, %v4283_v25 }
 0x33e   :  { %v6666_v28 = vrot.slane %v2229_v31, %v7535_v42 }
 0x340   :  { %v6674_v2 = vmul.f32 %v6666_v28, %v2184_v27  ;;  %v6677_v29 = vmul.f32 %v6666_v28, %v2185_v8  ;;  %v2249_v54 = vmul.f32 %v6666_v28, %v2186_v52  ;;  %v6681_v3 = vmul.f32 %v6666_v28, %v2187_v44 }
 0x341   :  { %v6684_v55 = vmul.f32 %v6666_v28, %v2188_v62  ;;  %v2236_v48 = vmul.f32 %v6666_v28, %v6608_v26  ;;  %v2237_v53 = vmul.f32 %v6666_v28, %v6611_v14  ;;  %v2238_v27 = vmul.f32 %v6666_v28, %v6614_v20 }
 0x342   :  { %v6693_v8 = vadd.f32 %v6671_v11, %v2249_v54  ;;  %v2239_v52 = vmul.f32 %v6666_v28, %v6617_v18  ;;  %v2240_v44 = vmul.f32 %v6666_v28, %v6620_v37  ;;  %v2241_v62 = vmul.f32 %v6666_v28, %v6623_v38 }
 0x343   :  { %v2258_v26 = vadd.f32 %v6671_v11, %v2236_v48  ;;  %v2259_v57 = vadd.f32 %v6671_v11, %v2237_v53  ;;  %v2260_v14 = vadd.f32 %v6671_v11, %v2238_v27  ;;  %v2242_v20 = vmul.f32 %v6666_v28, %v6626_v13  ;;  %v5388_v48 = vld [vmem:[%s7493_s3 + $0x100] sm:$0xff]  }
 0x344   :  { %v2261_v61 = vadd.f32 %v6671_v11, %v2239_v52  ;;  %v2262_v35 = vadd.f32 %v6671_v11, %v2240_v44  ;;  %v2263_v18 = vadd.f32 %v6671_v11, %v2241_v62  ;;  %v2243_v38 = vmul.f32 %v6666_v28, %v6629_v22  ;;  %v5394_v52 = vld [vmem:[%s7493_s3 + $0x180] sm:$0xff]  }
 0x345   :  { %v2274_v23 = vmax.f32 %v2258_v26, 0.0  ;;  %v2275_v37 = vmax.f32 %v2259_v57, 0.0  ;;  %v2276_v59 = vmax.f32 %v2260_v14, 0.0  ;;  %v2287_v51 = vmax.f32 %v6693_v8, 0.0  ;;  %v5389_v14 = vld [vmem:[%s7493_s3 + $0x148] sm:$0xff]  }
 0x346   :  { %v2277_v50 = vmax.f32 %v2261_v61, 0.0  ;;  %v2278_v60 = vmax.f32 %v2262_v35, 0.0  ;;  %v2279_v15 = vmax.f32 %v2263_v18, 0.0  ;;  %v6713_v10 = vadd.f32 %v6671_v11, %v2242_v20  ;;  %v5396_v20 = vld [vmem:[%s7493_s3 + $0x1c8] sm:$0xff]  }
 0x347   :  { %v2290_v39 = vrot.slane %v2274_v23, 7  ;;  %v2291_v1 = vrot.slane %v2275_v37, 7  ;;  %v2292_v13 = vrot.slane %v2276_v59, 7  ;;  %v6722_v5 = vadd.f32 %v6671_v11, %v2243_v38 }
 0x348   :  { %v6715_v4 = vrot.slane %v2277_v50, 7  ;;  %v6717_v19 = vrot.slane %v2278_v60, 7  ;;  %v6719_v33 = vrot.slane %v2279_v15, 7 }
 0x349   :  { %v4518_v22 = vpack.c.bf16 %v2291_v1, %v2290_v39  ;;  %v2306_v56 = vsel %vm417_vm0, %v2290_v39, 0.0  ;;  %v2322_v6 = vsel %vm417_vm0, 0.0, %v2290_v39  ;;  %v4479_v41 = vpack.c.bf16 %v2290_v39, %v7527_v7 }
 0x34a   :  { %v2419_v45 = vrot.slane %v2322_v6, 1  ;;  %v2435_v46 = vrot.slane %v2306_v56, 1  ;;  %v2483_v58 = vrot.slane %v2322_v6, 2  ;;  %v2499_v34 = vrot.slane %v2306_v56, 2  ;;  %v5398_v56 = vld [vmem:[%s7493_s3 + $0x188] sm:$0xff]  }
 0x34b   :  { %4519 = vmatprep.mubr.msk.bf16.mxu1 %vm5739_vm4, %v4518_v22  ;;  %v4523_v0 = vpack.c.bf16 %v6715_v4, %v2292_v13  ;;  %v2307_v17 = vsel %vm417_vm0, %v2291_v1, 0.0  ;;  %v2308_v36 = vsel %vm417_vm0, %v2292_v13, 0.0  ;;  %v2323_v49 = vsel %vm417_vm0, 0.0, %v2291_v1 }
 0x34c   :  { %v6740_v24 = vsel %vm563_vm1, %v2419_v45, %v2435_v46  ;;  %v6744_v47 = vsel %vm628_vm2, %v2483_v58, %v2499_v34  ;;  %v2324_v25 = vsel %vm417_vm0, 0.0, %v2292_v13  ;;  %v2420_v21 = vrot.slane %v2323_v49, 1  ;;  %v5391_v58 = vld [vmem:[%s7493_s3 + $0x150] sm:$0xff]  }
 0x34d   :  { %v2466_v31 = vpack.c.bf16 %v6740_v24, %v5678_v40  ;;  %v2530_v54 = vpack.c.bf16 %v6744_v47, %v7534_v43  ;;  %v2421_v53 = vrot.slane %v2324_v25, 1  ;;  %v2436_v27 = vrot.slane %v2307_v17, 1  ;;  %v5400_v34 = vld [vmem:[%s7493_s3 + $0x1d0] sm:$0xff]  }
 0x34e   :  { %v2437_v44 = vrot.slane %v2308_v36, 1  ;;  %v2484_v62 = vrot.slane %v2323_v49, 2  ;;  %v2485_v26 = vrot.slane %v2324_v25, 2  ;;  %v2500_v57 = vrot.slane %v2307_v17, 2 }
 0x34f   :  { %3578 = vmatprep.mubr.bf16.mxu0 %v2466_v31  ;;  %3676 = vmatmul.mubr.bf16.vlgmr.msra.gmra.mrb[80].mxu1 %v2530_v54  ;;  %v6766_v61 = vsel %vm563_vm1, %v2420_v21, %v2436_v27  ;;  %v2501_v35 = vrot.slane %v2308_v36, 2  ;;  %v6768_v18 = vpack.c.bf16 %v2292_v13, %v2291_v1  ;;  %v4528_v23 = vpack.c.bf16 %v6719_v33, %v6717_v19  ;;  %v5390_v1 = vld [vmem:[%s7493_s3 + $0x108] sm:$0xff]  }
 0x350   :  { %4480 = vmatmul.mubr.msk.bf16.vlgmr.msra.gmra.mrb[80].mxu0 %vm5781_vm6, %v4479_v41  ;;  %4524 = vmatprep.mubr.msk.bf16.mxu1 %vm5739_vm4, %v4523_v0  ;;  %v6778_v59 = vsel %vm563_vm1, %v2421_v53, %v2437_v44  ;;  %v6784_v50 = vsel %vm628_vm2, %v2484_v62, %v2500_v57  ;;  %v2309_v60 = vsel %vm417_vm0, %v6715_v4, 0.0  ;;  %v2310_v13 = vsel %vm417_vm0, %v6717_v19, 0.0  ;;  %v5395_v62 = vld [vmem:[%s7493_s3 + $0x158] sm:$0xff]  }
 0x351   :  { %5010 = vmatpush3.bf16.msra.mxu0 %v5388_v48  ;;  %v6791_v15 = vpack.c.bf16 %v6778_v59, %v6766_v61  ;;  %v6795_v39 = vsel %vm628_vm2, %v2485_v26, %v2501_v35  ;;  %v2325_v22 = vsel %vm417_vm0, 0.0, %v6715_v4  ;;  %5074 = vmatpush3.bf16.msra.mxu1 %v5394_v52  ;;  %v2326_v41 = vsel %vm417_vm0, 0.0, %v6717_v19  ;;  %v5393_v52 = vld [vmem:[%s7493_s3 + $0x110] sm:$0xff]   ;;  %v5404_v35 = vld [vmem:[%s7493_s3 + $0x1d8] sm:$0xff]  }
 0x352   :  { %v6811_v6 = vpack.c.bf16 %v6795_v39, %v6784_v50  ;;  %5011 = vmatprep.subr.bf16.mxu0 %v5389_v14  ;;  %v2422_v45 = vrot.slane %v2325_v22, 1  ;;  %v2438_v46 = vrot.slane %v2309_v60, 1  ;;  %5075 = vmatprep.subr.bf16.mxu1 %v5396_v20  ;;  %v2423_v0 = vrot.slane %v2326_v41, 1  ;;  %v5402_v26 = vld [vmem:[%s7493_s3 + $0x190] sm:$0xff]  }
 0x353   :  { %3586 = vmatprep.mubr.bf16.mxu0 %v6791_v15  ;;  %v2439_v17 = vrot.slane %v2310_v13, 1  ;;  %v2486_v36 = vrot.slane %v2325_v22, 2  ;;  %v2487_v49 = vrot.slane %v2326_v41, 2  ;;  %v2502_v21 = vrot.slane %v2309_v60, 2 }
 0x354   :  { %7537 = vst [vmem:[#allocation7_spill] sm:$0xff] %v6811_v6  ;;  %v6825_v25 = vsel %vm563_vm1, %v2422_v45, %v2438_v46  ;;  %v2503_v31 = vrot.slane %v2310_v13, 2  ;;  %v6829_v54 = vpack.c.bf16 %v6717_v19, %v6715_v4  ;;  %v2280_v53 = vmax.f32 %v6713_v10, 0.0  ;;  %v5397_v46 = vld [vmem:[%s7493_s3 + $0x118] sm:$0xff]  }
 0x355   :  { %5012 = vmatpush3.bf16.msra.mxu0 %v5390_v1  ;;  %v6833_v48 = vsel %vm563_vm1, %v2423_v0, %v2439_v17  ;;  %v2281_v27 = vmax.f32 %v6722_v5, 0.0  ;;  %v2311_v44 = vsel %vm417_vm0, %v6719_v33, 0.0  ;;  %5076 = vmatpush3.bf16.msra.mxu1 %v5398_v56  ;;  %v6849_v19 = vsel %vm628_vm2, %v2486_v36, %v2502_v21  ;;  %v5406_v0 = vld [vmem:[%s7493_s3 + $0x198] sm:$0xff]  }
 0x356   :  { %v6845_v4 = vpack.c.bf16 %v6833_v48, %v6825_v25  ;;  %v6853_v10 = vsel %vm628_vm2, %v2487_v49, %v2503_v31  ;;  %5013 = vmatprep.subr.bf16.mxu0 %v5391_v58  ;;  %v2327_v5 = vsel %vm417_vm0, 0.0, %v6719_v33  ;;  %5077 = vmatprep.subr.bf16.mxu1 %v5400_v34  ;;  %v2296_v14 = vrot.slane %v2280_v53, 7  ;;  %v5399_v34 = vld [vmem:[%s7493_s3 + $0x160] sm:$0xff]  }
 0x357   :  { %3684 = vmatmul.mubr.bf16.gmra.mrb[84].mxu1 %v6811_v6  ;;  %v6867_v57 = vpack.c.bf16 %v6853_v10, %v6849_v19  ;;  %v2424_v20 = vrot.slane %v2327_v5, 1  ;;  %v2440_v60 = vrot.slane %v2311_v44, 1  ;;  %v2488_v1 = vrot.slane %v2327_v5, 2  ;;  %v5408_v31 = vld [vmem:[%s7493_s3 + $0x1e0] sm:$0xff]  }
 0x358   :  { %4485 = vmatmul.mubr.msk.bf16.gmra.mrb[84].mxu0 %vm5739_vm4, %v6768_v18  ;;  %4529 = vmatprep.mubr.msk.bf16.mxu1 %vm5739_vm4, %v4528_v23  ;;  %v2504_v13 = vrot.slane %v2311_v44, 2  ;;  %v2244_v22 = vmul.f32 %v6666_v28, %v6632_v30  ;;  %v6881_v56 = vrot.slane %v2287_v51, 7  ;;  %v6884_v41 = vrot.slane %v2281_v27, 7 }
 0x359   :  { %7538 = vst [vmem:[#allocation8_spill] sm:$0xff] %v6867_v57  ;;  %3594 = vmatprep.mubr.bf16.mxu0 %v6845_v4  ;;  %5014 = vmatpush3.bf16.msra.mxu0 %v5393_v52  ;;  %v2312_v45 = vsel %vm417_vm0, %v2296_v14, 0.0  ;;  %v2328_v23 = vsel %vm417_vm0, 0.0, %v2296_v14  ;;  %v6895_v8 = vsel %vm563_vm1, %v2424_v20, %v2440_v60  ;;  %v2245_v49 = vmul.f32 %v6666_v28, %v6634_v9  ;;  %v5403_v20 = vld [vmem:[%s7493_s3 + $0x168] sm:$0xff]   ;;  %v5410_v60 = vld [vmem:[%s7493_s3 + $0x1a0] sm:$0xff]  }
 0x35a   :  { %v2425_v30 = vrot.slane %v2328_v23, 1  ;;  %v2441_v58 = vrot.slane %v2312_v45, 1  ;;  %v2489_v51 = vrot.slane %v2328_v23, 2  ;;  %5015 = vmatprep.subr.bf16.mxu0 %v5395_v62  ;;  %5078 = vmatpush3.bf16.msra.mxu1 %v5402_v26  ;;  %v2505_v17 = vrot.slane %v2312_v45, 2 }
 0x35b   :  { %v6905_v36 = vsel %vm628_vm2, %v2488_v1, %v2504_v13  ;;  %v2266_v21 = vadd.f32 %v6671_v11, %v2244_v22  ;;  %5079 = vmatprep.subr.bf16.mxu1 %v5404_v35  ;;  %v2246_v27 = vmul.f32 %v6666_v28, %v6637_v32  ;;  %v2269_v52 = vadd.f32 %v6671_v11, %v6674_v2  ;;  %v5401_v32 = vld [vmem:[%s7493_s3 + $0x120] sm:$0xff]   ;;  %v5411_v22 = vld [vmem:[%s7493_s3 + $0x1e8] sm:$0xff]  }
 0x35c   :  { %v6915_v53 = vsel %vm563_vm1, %v2425_v30, %v2441_v58  ;;  %v2270_v9 = vadd.f32 %v6671_v11, %v6677_v29  ;;  %v4533_v44 = vpack.c.bf16 %v6884_v41, %v2296_v14  ;;  %v6926_v5 = vsel %vm628_vm2, %v2489_v51, %v2505_v17 }
 0x35d   :  { %v2267_v62 = vadd.f32 %v6671_v11, %v2245_v49  ;;  %v2282_v26 = vmax.f32 %v2266_v21, 0.0  ;;  %5016 = vmatpush3.bf16.msra.mxu0 %v5397_v46  ;;  %v6933_v28 = vpack.c.bf16 %v2296_v14, %v6719_v33  ;;  %v2268_v2 = vadd.f32 %v6671_v11, %v2246_v27  ;;  %v5407_v21 = vld [vmem:[%s7493_s3 + $0x170] sm:$0xff]  }
 0x35e   :  { %5017 = vmatprep.subr.bf16.mxu0 %v5399_v34  ;;  %v2285_v29 = vmax.f32 %v2269_v52, 0.0  ;;  %v2286_v35 = vmax.f32 %v2270_v9, 0.0  ;;  %5080 = vmatpush3.bf16.msra.mxu1 %v5406_v0  ;;  %v6945_v33 = vpack.c.bf16 %v6915_v53, %v6895_v8  ;;  %v6949_v14 = vpack.c.bf16 %v6926_v5, %v6905_v36 }
 0x35f   :  { %3692 = vmatmul.mubr.bf16.gmra.mrb[88].mxu1 %v6867_v57  ;;  %v2283_v1 = vmax.f32 %v2267_v62, 0.0  ;;  %v2298_v13 = vrot.slane %v2282_v26, 7  ;;  %5081 = vmatprep.subr.bf16.mxu1 %v5408_v31  ;;  %v2284_v45 = vmax.f32 %v2268_v2, 0.0  ;;  %v6963_v46 = vadd.f32 %v6671_v11, %v6681_v3  ;;  %v5405_v3 = vld [vmem:[%s7493_s3 + $0x128] sm:$0xff]   ;;  %v5414_v62 = vld [vmem:[%s7493_s3 + $0x1f0] sm:$0xff]  }
 0x360   :  { %7539 = vst [vmem:[#allocation6_spill] sm:$0xff] %v6949_v14  ;;  %4490 = vmatmul.mubr.msk.bf16.gmra.mrb[88].mxu0 %vm5739_vm4, %v6829_v54  ;;  %4534 = vmatprep.mubr.msk.bf16.mxu1 %vm5739_vm4, %v4533_v44  ;;  %v6959_v23 = vrot.slane %v2285_v29, 7  ;;  %v6967_v30 = vadd.f32 %v6671_v11, %v6684_v55  ;;  %v6976_v0 = vrot.slane %v2286_v35, 7  ;;  %v5412_v31 = vld [vmem:[%s7493_s3 + $0x1a8] sm:$0xff]   ;;  %v6998_v44 = vsel %vm417_vm0, %v6881_v56, 0.0  ;;  %v7549_v63 = vld [vmem:[#allocation8_spill] sm:$0xff] }
 0x361   :  { %3602 = vmatprep.mubr.bf16.mxu0 %v6945_v33  ;;  %v6970_v58 = vrot.slane %v2283_v1, 7  ;;  %v2314_v51 = vsel %vm417_vm0, %v2298_v13, 0.0  ;;  %v2330_v34 = vsel %vm417_vm0, 0.0, %v2298_v13  ;;  %5018 = vmatpush3.bf16.msra.mxu0 %v5401_v32  ;;  %v6987_v27 = vrot.slane %v2284_v45, 7 }
 0x362   :  { %v2427_v17 = vrot.slane %v2330_v34, 1  ;;  %v2443_v11 = vrot.slane %v2314_v51, 1  ;;  %v2491_v55 = vrot.slane %v2330_v34, 2  ;;  %v2507_v49 = vrot.slane %v2314_v51, 2  ;;  %5019 = vmatprep.subr.bf16.mxu0 %v5403_v20  ;;  %5082 = vmatpush3.bf16.msra.mxu1 %v5410_v60 }
 0x363   :  { %v2315_v52 = vsel %vm417_vm0, %v6970_v58, 0.0  ;;  %v2331_v9 = vsel %vm417_vm0, 0.0, %v6970_v58  ;;  %5083 = vmatprep.subr.bf16.mxu1 %v5411_v22  ;;  %v4538_v26 = vpack.c.bf16 %v6970_v58, %v2298_v13  ;;  %v2316_v1 = vsel %vm417_vm0, %v6987_v27, 0.0  ;;  %v5409_v22 = vld [vmem:[%s7493_s3 + $0x130] sm:$0xff]  }
 0x364   :  { %v7006_v32 = vsel %vm563_vm1, %v2427_v17, %v2443_v11  ;;  %v2428_v2 = vrot.slane %v2331_v9, 1  ;;  %v2444_v29 = vrot.slane %v2315_v52, 1  ;;  %v7012_v35 = vsel %vm628_vm2, %v2491_v55, %v2507_v49  ;;  %v5416_v11 = vld [vmem:[%s7493_s3 + $0x1b0] sm:$0xff]  }
 0x365   :  { %v2470_v20 = vpack.c.bf16 %v7006_v32, %v5678_v40  ;;  %5020 = vmatpush3.bf16.msra.mxu0 %v5405_v3  ;;  %v2332_v45 = vsel %vm417_vm0, 0.0, %v6987_v27  ;;  %v2445_v51 = vrot.slane %v2316_v1, 1  ;;  %v2492_v17 = vrot.slane %v2331_v9, 2  ;;  %v5413_v3 = vld [vmem:[%s7493_s3 + $0x178] sm:$0xff]  }
 0x366   :  { %v7027_v34 = vsel %vm563_vm1, %v2428_v2, %v2444_v29  ;;  %5021 = vmatprep.subr.bf16.mxu0 %v5407_v21  ;;  %5084 = vmatpush3.bf16.msra.mxu1 %v5412_v31  ;;  %v2429_v55 = vrot.slane %v2332_v45, 1  ;;  %v2493_v49 = vrot.slane %v2332_v45, 2  ;;  %v2508_v38 = vrot.slane %v2315_v52, 2  ;;  %v5417_v21 = vld [vmem:[%s7493_s3 + $0x1f8] sm:$0xff]  }
 0x367   :  { %3700 = vmatmul.mubr.bf16.gmra.mrb[92].mxu1 %v6949_v14  ;;  %v2509_v60 = vrot.slane %v2316_v1, 2  ;;  %5085 = vmatprep.subr.bf16.mxu1 %v5414_v62  ;;  %v4498_v31 = vpack.c.bf16 %v2298_v13, %v7527_v7  ;;  %v2317_v52 = vsel %vm417_vm0, %v6959_v23, 0.0  ;;  %v2318_v62 = vsel %vm417_vm0, %v6976_v0, 0.0 }
 0x368   :  { %4495 = vmatmul.mubr.msk.bf16.gmra.mrb[92].mxu0 %vm5739_vm4, %v6933_v28  ;;  %4539 = vmatprep.mubr.msk.bf16.mxu1 %vm5739_vm4, %v4538_v26  ;;  %v2534_v2 = vpack.c.bf16 %v7012_v35, %v7534_v43  ;;  %v7057_v26 = vsel %vm563_vm1, %v2429_v55, %v2445_v51  ;;  %v7061_v13 = vsel %vm628_vm2, %v2492_v17, %v2508_v38  ;;  %v2333_v29 = vsel %vm417_vm0, 0.0, %v6959_v23  ;;  %v7086_v17 = vld [vmem:[%s7493_s3 + $0x200] sm:$0xff]  }
 0x369   :  { %3610 = vmatprep.mubr.bf16.mxu0 %v2470_v20  ;;  %5022 = vmatpush3.bf16.msra.mxu0 %v5409_v22  ;;  %v5415_v20 = vld [vmem:[%s7493_s3 + $0x138] sm:$0xff]   ;;  %v7071_v1 = vpack.c.bf16 %v7057_v26, %v7027_v34  ;;  %v7075_v45 = vsel %vm628_vm2, %v2493_v49, %v2509_v60  ;;  %v2334_v38 = vsel %vm417_vm0, 0.0, %v6976_v0  ;;  %v2430_v51 = vrot.slane %v2333_v29, 1 }
 0x36a   :  { %5023 = vmatprep.subr.bf16.mxu0 %v5413_v3  ;;  %5086 = vmatpush3.bf16.msra.mxu1 %v5416_v11  ;;  %v5418_v22 = vld [vmem:[%s7493_s3 + $0x1b8] sm:$0xff]   ;;  %v2431_v55 = vrot.slane %v2334_v38, 1  ;;  %v2446_v9 = vrot.slane %v2317_v52, 1  ;;  %v2447_v60 = vrot.slane %v2318_v62, 1  ;;  %v2494_v49 = vrot.slane %v2333_v29, 2 }
 0x36b   :  { %5087 = vmatprep.subr.bf16.mxu1 %v5417_v21  ;;  %v2495_v42 = vrot.slane %v2334_v38, 2  ;;  %v2510_v43 = vrot.slane %v2317_v52, 2  ;;  %v2511_v14 = vrot.slane %v2318_v62, 2  ;;  %v7090_v3 = vpack.c.bf16 %v6976_v0, %v6959_v23 }
 0x36c   :  { %v7094_v11 = vsel %vm563_vm1, %v2430_v51, %v2446_v9  ;;  %v7098_v57 = vsel %vm563_vm1, %v2431_v55, %v2447_v60  ;;  %v2288_v6 = vmax.f32 %v6963_v46, 0.0  ;;  %v2289_v29 = vmax.f32 %v6967_v30, 0.0 }
 0x36d   :  { %5024 = vmatpush3.bf16.msra.mxu0 %v5415_v20  ;;  %v7104_v21 = vpack.c.bf16 %v7098_v57, %v7094_v11  ;;  %v7108_v52 = vsel %vm628_vm2, %v2494_v49, %v2510_v43  ;;  %v7112_v9 = vsel %vm628_vm2, %v2495_v42, %v2511_v14  ;;  %v2335_v62 = vsel %vm417_vm0, 0.0, %v6881_v56 }
 0x36e   :  { %5088 = vmatpush3.bf16.msra.mxu1 %v5418_v22  ;;  %5217 = vmatprep.subr.bf16.mxu0 %v7086_v17  ;;  %v7120_v46 = vpack.c.bf16 %v7112_v9, %v7108_v52  ;;  %v2304_v30 = vrot.slane %v2288_v6, 7  ;;  %v7122_v20 = vrot.slane %v2289_v29, 7  ;;  %v2432_v43 = vrot.slane %v2335_v62, 1 }
 0x36f   :  { %3708 = vmatmul.mubr.bf16.gmra.mrb[96].mxu1 %v2534_v2  ;;  %5249 = vmatprep.subr.bf16.mxu1 %v7086_v17  ;;  %v7540_v42 = vpack.c.bf16 %v6959_v23, %v6987_v27  ;;  %v2448_v14 = vrot.slane %v6998_v44, 1  ;;  %v2496_v2 = vrot.slane %v2335_v62, 2  ;;  %v2512_v38 = vrot.slane %v6998_v44, 2 }
 0x370   :  { %4499 = vmatmul.mubr.msk.bf16.gmra.mrb[96].mxu0 %vm5781_vm6, %v4498_v31  ;;  %v2706_v6 = vpack.c.bf16 %v6784_v50, %v6744_v47  ;;  %v4553_v51 = vpack.c.bf16 %v7122_v20, %v2304_v30  ;;  %v2320_v37 = vsel %vm417_vm0, %v2304_v30, 0.0  ;;  %v2336_v23 = vsel %vm417_vm0, 0.0, %v2304_v30 }
 0x371   :  { %4544 = vmatprep.mubr.msk.bf16.mxu1 %vm5739_vm4, %v7540_v42  ;;  %3618 = vmatprep.mubr.bf16.mxu0 %v7071_v1  ;;  %v7143_v31 = vpack.c.bf16 %v2304_v30, %v6881_v56  ;;  %v2433_v22 = vrot.slane %v2336_v23, 1  ;;  %v2449_v55 = vrot.slane %v2320_v37, 1  ;;  %v7147_v44 = vsel %vm563_vm1, %v2432_v43, %v2448_v14 }
 0x372   :  { %v2497_v47 = vrot.slane %v2336_v23, 2  ;;  %v2513_v50 = vrot.slane %v2320_v37, 2  ;;  %v7151_v60 = vsel %vm628_vm2, %v2496_v2, %v2512_v38  ;;  %v2707_v49 = vpack.c.bf16 %v6849_v19, %v6795_v39 }
 0x373   :  { %v2643_v29 = vpack.c.bf16 %v6825_v25, %v6778_v59  ;;  %v7159_v62 = vpack.c.bf16 %v7075_v45, %v7061_v13  ;;  %v7163_v30 = vsel %vm563_vm1, %v2433_v22, %v2449_v55  ;;  %v2644_v43 = vpack.c.bf16 %v6895_v8, %v6833_v48  ;;  %v5426_v48 = vld [vmem:[%s7493_s3 + $0x238] sm:$0xff]  }
 0x374   :  { %v7170_v42 = vsel %vm417_vm0, %v6884_v41, 0.0  ;;  %v7174_v39 = vpack.c.bf16 %v7163_v30, %v7147_v44  ;;  %v7178_v59 = vsel %vm628_vm2, %v2497_v47, %v2513_v50  ;;  %v7183_v25 = vsel %vm417_vm0, 0.0, %v6884_v41 }
 0x375   :  { %v2617_v19 = vrot.slane %v7170_v42, 1  ;;  %v7188_v14 = vpack.c.bf16 %v6987_v27, %v6970_v58  ;;  %v7192_v2 = vpack.c.bf16 %v7178_v59, %v7151_v60  ;;  %v2601_v38 = vrot.slane %v7183_v25, 1 }
 0x376   :  { %v7541_v58 = vpack.c.bf16 %v6881_v56, %v6976_v0  ;;  %v2321_v55 = vsel %vm417_vm0, %v7122_v20, 0.0  ;;  %v2337_v50 = vsel %vm417_vm0, 0.0, %v7122_v20  ;;  %v2710_v8 = vpack.c.bf16 %v7061_v13, %v7012_v35 }
 0x377   :  { %3716 = vmatmul.mubr.bf16.gmra.mrb[100].mxu1 %v7159_v62  ;;  %v7210_v27 = vsel %vm563_vm1, %v2601_v38, %v2617_v19  ;;  %v2625_v19 = vrot.slane %v2321_v55, 1  ;;  %v2689_v38 = vrot.slane %v2321_v55, 2  ;;  %v2673_v22 = vrot.slane %v2337_v50, 2 }
 0x378   :  { %4504 = vmatmul.mubr.msk.bf16.gmra.mrb[100].mxu0 %vm5739_vm4, %v7188_v14  ;;  %4549 = vmatprep.mubr.msk.bf16.mxu1 %vm5739_vm4, %v7541_v58  ;;  %v2645_v47 = vpack.c.bf16 %v7210_v27, %v6915_v53  ;;  %v2609_v58 = vrot.slane %v2337_v50, 1  ;;  %v7544_v53 = vpack.c.bf16 %v7108_v52, %v7075_v45 }
 0x379   :  { %3626 = vmatprep.mubr.bf16.mxu0 %v7104_v21  ;;  %v7233_v37 = vsel %vm628_vm2, %v2673_v22, %v2689_v38  ;;  %v5420_v22 = vld [vmem:[%s7493_s3 + $0x208] sm:$0xff]  }
 0x37a   :  { %v7229_v23 = vsel %vm563_vm1, %v2609_v58, %v2625_v19  ;;  %v2713_v56 = vpack.c.bf16 %v7233_v37, %v7178_v59 }
 0x37b   :  { %v2649_v0 = vpack.c.bf16 %v7229_v23, %v7163_v30  ;;  %v2825_v35 = vpack.c.bf16 %v5678_v40, %v7229_v23 }
 0x37f   :  { %3724 = vmatmul.mubr.bf16.gmra.mrb[104].mxu1 %v7120_v46 }
 0x380   :  { %4509 = vmatmul.mubr.msk.bf16.gmra.mrb[104].mxu0 %vm5739_vm4, %v7090_v3  ;;  %4554 = vmatprep.mubr.msk.bf16.mxu1 %vm5739_vm4, %v4553_v51  ;;  %v7542_v51 = vpack.c.bf16 %v6766_v61, %v6740_v24  ;;  %v5422_v24 = vld [vmem:[%s7493_s3 + $0x218] sm:$0xff]   ;;  %v2708_v61 = vpack.c.bf16 %v6905_v36, %v6853_v10  ;;  %v2821_v10 = vpack.c.bf16 %v5678_v40, %v7210_v27  ;;  %v5424_v36 = vld [vmem:[%s7493_s3 + $0x228] sm:$0xff]  }
 0x381   :  { %3634 = vmatprep.mubr.bf16.mxu0 %v7174_v39  ;;  %v7548_v40 = vld [vmem:[#allocation7_spill] sm:$0xff] }
 0x387   :  { %3732 = vmatmul.mubr.bf16.gmra.mrb[108].mxu1 %v7192_v2 }
 0x388   :  { %4514 = vmatmul.mubr.msk.bf16.gmra.mrb[108].mxu0 %vm5739_vm4, %v7143_v31  ;;  %3869 = vmatprep.mubr.bf16.mxu1 %v6791_v15  ;;  %v5421_v15 = vld [vmem:[%s7493_s3 + $0x210] sm:$0xff]  }
 0x389   :  { %3772 = vmatprep.mubr.bf16.mxu0 %v2706_v6 }
 0x38f   :  { %4559 = vmatmul.mubr.msk.bf16.vlgmr.msra.gmra.mrb[112].mxu1 %vm5739_vm4, %v6768_v18  ;;  %v2665_v18 = vrot.slane %v7183_v25, 2 }
 0x390   :  { %3773 = vmatmul.mubr.bf16.vlgmr.msra.gmra.mrb[112].mxu0 %v7542_v51  ;;  %3877 = vmatprep.mubr.bf16.mxu1 %v6845_v4  ;;  %v2681_v4 = vrot.slane %v7170_v42, 2 }
 0x391   :  { %5218 = vmatpush3.bf16.msra.mxu0 %v7086_v17  ;;  %3780 = vmatprep.mubr.bf16.mxu0 %v2707_v49 }
 0x392   :  { %5219 = vmatprep.subr.bf16.mxu0 %v5420_v22  ;;  %5257 = vmatpush3.bf16.msra.mxu1 %v7086_v17  ;;  %v5423_v17 = vld [vmem:[%s7493_s3 + $0x220] sm:$0xff]  }
 0x393   :  { %5250 = vmatprep.subr.bf16.mxu1 %v5420_v22 }
 0x395   :  { %5220 = vmatpush3.bf16.msra.mxu0 %v5420_v22 }
 0x396   :  { %5221 = vmatprep.subr.bf16.mxu0 %v5421_v15  ;;  %5258 = vmatpush3.bf16.msra.mxu1 %v5420_v22 }
 0x397   :  { %4564 = vmatmul.mubr.msk.bf16.gmra.mrb[116].mxu1 %vm5739_vm4, %v6829_v54  ;;  %5251 = vmatprep.subr.bf16.mxu1 %v5421_v15  ;;  %v2697_v54 = vsel %vm628_vm2, %v2665_v18, %v2681_v4 }
 0x398   :  { %3781 = vmatmul.mubr.bf16.gmra.mrb[116].mxu0 %v2643_v29  ;;  %3885 = vmatprep.mubr.bf16.mxu1 %v6945_v33  ;;  %v2709_v33 = vpack.c.bf16 %v2697_v54, %v6926_v5  ;;  %v7545_v5 = vpack.c.bf16 %v7094_v11, %v7057_v26  ;;  %v4591_v26 = vpack.c.bf16 %v7527_v7, %v7122_v20 }
 0x399   :  { %3788 = vmatprep.mubr.bf16.mxu0 %v2708_v61  ;;  %5222 = vmatpush3.bf16.msra.mxu0 %v5421_v15 }
 0x39a   :  { %5223 = vmatprep.subr.bf16.mxu0 %v5422_v24  ;;  %5259 = vmatpush3.bf16.msra.mxu1 %v5421_v15 }
 0x39b   :  { %5252 = vmatprep.subr.bf16.mxu1 %v5422_v24 }
 0x39d   :  { %5224 = vmatpush3.bf16.msra.mxu0 %v5422_v24 }
 0x39e   :  { %5225 = vmatprep.subr.bf16.mxu0 %v5423_v17  ;;  %5260 = vmatpush3.bf16.msra.mxu1 %v5422_v24 }
 0x39f   :  { %4569 = vmatmul.mubr.msk.bf16.gmra.mrb[120].mxu1 %vm5739_vm4, %v6933_v28  ;;  %5253 = vmatprep.subr.bf16.mxu1 %v5423_v17  ;;  %v4572_v28 = vpack.c.bf16 %v7527_v7, %v6884_v41  ;;  %v7543_v41 = vpack.c.bf16 %v7027_v34, %v7006_v32  ;;  %v7546_v32 = vpack.c.bf16 %v7151_v60, %v7112_v9  ;;  %v7551_v7 = vld [vmem:[#allocation5_spill] sm:$0xff] }
 0x3a0   :  { %3789 = vmatmul.mubr.bf16.gmra.mrb[120].mxu0 %v2644_v43  ;;  %3893 = vmatprep.mubr.bf16.mxu1 %v2821_v10  ;;  %v7547_v34 = vpack.c.bf16 %v7147_v44, %v7098_v57  ;;  %v7550_v57 = vld [vmem:[#allocation6_spill] sm:$0xff]  ;;  %v2889_v12 = vpack.c.bf16 %v7551_v7, %v7233_v37  ;;  %v2885_v13 = vpack.c.bf16 %v7551_v7, %v2697_v54 }
 0x3a1   :  { %3796 = vmatprep.mubr.bf16.mxu0 %v2709_v33  ;;  %5226 = vmatpush3.bf16.msra.mxu0 %v5423_v17 }
 0x3a2   :  { %5227 = vmatprep.subr.bf16.mxu0 %v5424_v36  ;;  %5261 = vmatpush3.bf16.msra.mxu1 %v5423_v17 }
 0x3a3   :  { %5254 = vmatprep.subr.bf16.mxu1 %v5424_v36 }
 0x3a5   :  { %5228 = vmatpush3.bf16.msra.mxu0 %v5424_v36 }
 0x3a6   :  { %5229 = vmatprep.subr.bf16.mxu0 %v5425_v16  ;;  %5262 = vmatpush3.bf16.msra.mxu1 %v5424_v36 }
 0x3a7   :  { %4573 = vmatmul.mubr.msk.bf16.gmra.mrb[124].mxu1 %vm6315_vm7, %v4572_v28  ;;  %5255 = vmatprep.subr.bf16.mxu1 %v5425_v16 }
 0x3a8   :  { %3797 = vmatmul.mubr.bf16.gmra.mrb[124].mxu0 %v2645_v47  ;;  %3901 = vmatprep.mubr.bf16.mxu1 %v7071_v1 }
 0x3a9   :  { %3804 = vmatprep.mubr.bf16.mxu0 %v2710_v8  ;;  %5230 = vmatpush3.bf16.msra.mxu0 %v5425_v16 }
 0x3aa   :  { %5231 = vmatprep.subr.bf16.mxu0 %v5426_v48  ;;  %5263 = vmatpush3.bf16.msra.mxu1 %v5425_v16 }
 0x3ab   :  { %5256 = vmatprep.subr.bf16.mxu1 %v5426_v48 }
 0x3ad   :  { %5232 = vmatpush3.bf16.msra.mxu0 %v5426_v48 }
 0x3ae   :  { %5264 = vmatpush3.bf16.msra.mxu1 %v5426_v48 }
 0x3af   :  { %4578 = vmatmul.mubr.msk.bf16.gmra.mrb[128].mxu1 %vm5739_vm4, %v7188_v14 }
 0x3b0   :  { %3805 = vmatmul.mubr.bf16.gmra.mrb[128].mxu0 %v7543_v41  ;;  %3909 = vmatprep.mubr.bf16.mxu1 %v7104_v21 }
 0x3b1   :  { %3812 = vmatprep.mubr.bf16.mxu0 %v7544_v53 }
 0x3b7   :  { %4583 = vmatmul.mubr.msk.bf16.gmra.mrb[132].mxu1 %vm5739_vm4, %v7090_v3 }
 0x3b8   :  { %3813 = vmatmul.mubr.bf16.gmra.mrb[132].mxu0 %v7545_v5  ;;  %3917 = vmatprep.mubr.bf16.mxu1 %v7174_v39 }
 0x3b9   :  { %3820 = vmatprep.mubr.bf16.mxu0 %v7546_v32 }
 0x3bf   :  { %4588 = vmatmul.mubr.msk.bf16.gmra.mrb[136].mxu1 %vm5739_vm4, %v7143_v31 }
 0x3c0   :  { %3821 = vmatmul.mubr.bf16.gmra.mrb[136].mxu0 %v7547_v34  ;;  %3925 = vmatprep.mubr.bf16.mxu1 %v2825_v35 }
 0x3c1   :  { %3828 = vmatprep.mubr.bf16.mxu0 %v2713_v56 }
 0x3c7   :  { %4592 = vmatmul.mubr.msk.bf16.gmra.mrb[140].mxu1 %vm6315_vm7, %v4591_v26 }
 0x3c8   :  { %3829 = vmatmul.mubr.bf16.gmra.mrb[140].mxu0 %v2649_v0  ;;  %5241 = vmatprep.mubr.bf16.mxu1 %v7159_v62 }
 0x3c9   :  { %5233 = vmatprep.mubr.bf16.mxu0 %v7548_v40 }
 0x3cf   :  { %5242 = vmatmul.mubr.bf16.vlgmr.msra.gmra.mrb[144].mxu1 %v7120_v46 }
 0x3d0   :  { %5234 = vmatmul.mubr.bf16.vlgmr.msra.gmra.mrb[144].mxu0 %v7549_v63  ;;  %5245 = vmatprep.mubr.bf16.mxu1 %v7192_v2 }
 0x3d1   :  { %5237 = vmatprep.mubr.bf16.mxu0 %v7550_v57 }
 0x3d7   :  { %5246 = vmatmul.mubr.bf16.gmra.mrb[148].mxu1 %v2889_v12 }
 0x3d8   :  { %5238 = vmatmul.mubr.bf16.gmra.mrb[148].mxu0 %v2885_v13 }
 0x422   :  { %v4961_v1 = vpop.f32.mrb[80].mxu1 }
 0x423   :  { %v4897_v45 = vpop.f32.mrb[80].mxu0  ;;  %v4962_v3 = vpop.f32.mrb[81].mxu1 }
 0x424   :  { %v4963_v11 = vadd.f32 %v4962_v3, %v4961_v1  ;;  %v4898_v21 = vpop.f32.mrb[81].mxu0  ;;  %v4964_v52 = vpop.f32.mrb[82].mxu1 }
 0x425   :  { %v4899_v9 = vadd.f32 %v4898_v21, %v4897_v45  ;;  %v4900_v46 = vpop.f32.mrb[82].mxu0  ;;  %v4965_v20 = vpop.f32.mrb[83].mxu1 }
 0x426   :  { %v4966_v6 = vadd.f32 %v4965_v20, %v4964_v52  ;;  %v4901_v31 = vpop.f32.mrb[83].mxu0 }
 0x427   :  { %v7357_v44 = vadd.f32 %v4963_v11, %v4899_v9  ;;  %v4902_v60 = vadd.f32 %v4901_v31, %v4900_v46 }
 0x429   :  { %v7359_v49 = vadd.f32 %v4966_v6, %v4902_v60 }
 0x42a   :  { %v4967_v29 = vpop.f32.mrb[84].mxu1 }
 0x42b   :  { %v4903_v62 = vpop.f32.mrb[84].mxu0  ;;  %v4968_v30 = vpop.f32.mrb[85].mxu1 }
 0x42c   :  { %v4969_v43 = vadd.f32 %v4968_v30, %v4967_v29  ;;  %v4904_v42 = vpop.f32.mrb[85].mxu0  ;;  %v4970_v39 = vpop.f32.mrb[86].mxu1 }
 0x42d   :  { %v4905_v59 = vadd.f32 %v4904_v42, %v4903_v62  ;;  %v4906_v25 = vpop.f32.mrb[86].mxu0  ;;  %v4971_v14 = vpop.f32.mrb[87].mxu1 }
 0x42e   :  { %v4972_v2 = vadd.f32 %v4971_v14, %v4970_v39  ;;  %v4907_v37 = vpop.f32.mrb[87].mxu0 }
 0x42f   :  { %v7361_v23 = vadd.f32 %v4969_v43, %v4905_v59  ;;  %v4908_v27 = vadd.f32 %v4907_v37, %v4906_v25 }
 0x431   :  { %v7363_v55 = vadd.f32 %v4972_v2, %v4908_v27 }
 0x432   :  { %v4973_v47 = vpop.f32.mrb[88].mxu1 }
 0x433   :  { %v4909_v56 = vpop.f32.mrb[88].mxu0  ;;  %v4974_v0 = vpop.f32.mrb[89].mxu1 }
 0x434   :  { %v4975_v50 = vadd.f32 %v4974_v0, %v4973_v47  ;;  %v4910_v19 = vpop.f32.mrb[89].mxu0  ;;  %v4976_v38 = vpop.f32.mrb[90].mxu1 }
 0x435   :  { %v4911_v58 = vadd.f32 %v4910_v19, %v4909_v56  ;;  %v4912_v22 = vpop.f32.mrb[90].mxu0  ;;  %v4977_v51 = vpop.f32.mrb[91].mxu1 }
 0x436   :  { %v4978_v15 = vadd.f32 %v4977_v51, %v4976_v38  ;;  %v4913_v24 = vpop.f32.mrb[91].mxu0 }
 0x437   :  { %v7365_v61 = vadd.f32 %v4975_v50, %v4911_v58  ;;  %v4914_v18 = vadd.f32 %v4913_v24, %v4912_v22 }
 0x439   :  { %v7367_v4 = vadd.f32 %v4978_v15, %v4914_v18 }
 0x43a   :  { %v4979_v17 = vpop.f32.mrb[92].mxu1 }
 0x43b   :  { %v4915_v54 = vpop.f32.mrb[92].mxu0  ;;  %v4980_v10 = vpop.f32.mrb[93].mxu1 }
 0x43c   :  { %v4981_v36 = vadd.f32 %v4980_v10, %v4979_v17  ;;  %v4916_v33 = vpop.f32.mrb[93].mxu0  ;;  %v4982_v16 = vpop.f32.mrb[94].mxu1 }
 0x43d   :  { %v4917_v28 = vadd.f32 %v4916_v33, %v4915_v54  ;;  %v4918_v48 = vpop.f32.mrb[94].mxu0  ;;  %v4983_v8 = vpop.f32.mrb[95].mxu1 }
 0x43e   :  { %v4984_v41 = vadd.f32 %v4983_v8, %v4982_v16  ;;  %v4919_v53 = vpop.f32.mrb[95].mxu0 }
 0x43f   :  { %v7369_v5 = vadd.f32 %v4981_v36, %v4917_v28  ;;  %v4920_v32 = vadd.f32 %v4919_v53, %v4918_v48 }
 0x441   :  { %v7371_v35 = vadd.f32 %v4984_v41, %v4920_v32 }
 0x442   :  { %v4985_v34 = vpop.f32.mrb[96].mxu1 }
 0x443   :  { %v4921_v26 = vpop.f32.mrb[96].mxu0  ;;  %v4986_v40 = vpop.f32.mrb[97].mxu1 }
 0x444   :  { %v4987_v63 = vadd.f32 %v4986_v40, %v4985_v34  ;;  %v4922_v57 = vpop.f32.mrb[97].mxu0  ;;  %v4988_v7 = vpop.f32.mrb[98].mxu1 }
 0x445   :  { %v4923_v12 = vadd.f32 %v4922_v57, %v4921_v26  ;;  %v4924_v13 = vpop.f32.mrb[98].mxu0  ;;  %v4989_v1 = vpop.f32.mrb[99].mxu1 }
 0x446   :  { %v4990_v45 = vadd.f32 %v4989_v1, %v4988_v7  ;;  %v4925_v3 = vpop.f32.mrb[99].mxu0 }
 0x447   :  { %v7373_v11 = vadd.f32 %v4987_v63, %v4923_v12  ;;  %v4926_v21 = vadd.f32 %v4925_v3, %v4924_v13 }
 0x449   :  { %v7375_v52 = vadd.f32 %v4990_v45, %v4926_v21 }
 0x44a   :  { %v4991_v9 = vpop.f32.mrb[100].mxu1 }
 0x44b   :  { %v4927_v46 = vpop.f32.mrb[100].mxu0  ;;  %v4992_v20 = vpop.f32.mrb[101].mxu1 }
 0x44c   :  { %v4993_v6 = vadd.f32 %v4992_v20, %v4991_v9  ;;  %v4928_v31 = vpop.f32.mrb[101].mxu0  ;;  %v4994_v60 = vpop.f32.mrb[102].mxu1 }
 0x44d   :  { %v4929_v29 = vadd.f32 %v4928_v31, %v4927_v46  ;;  %v4930_v62 = vpop.f32.mrb[102].mxu0  ;;  %v4995_v30 = vpop.f32.mrb[103].mxu1 }
 0x44e   :  { %v4996_v43 = vadd.f32 %v4995_v30, %v4994_v60  ;;  %v4931_v42 = vpop.f32.mrb[103].mxu0 }
 0x44f   :  { %v7377_v39 = vadd.f32 %v4993_v6, %v4929_v29  ;;  %v4932_v59 = vadd.f32 %v4931_v42, %v4930_v62 }
 0x451   :  { %v7379_v25 = vadd.f32 %v4996_v43, %v4932_v59 }
 0x452   :  { %v4997_v14 = vpop.f32.mrb[104].mxu1 }
 0x453   :  { %v4933_v2 = vpop.f32.mrb[104].mxu0  ;;  %v4998_v37 = vpop.f32.mrb[105].mxu1 }
 0x454   :  { %v4999_v27 = vadd.f32 %v4998_v37, %v4997_v14  ;;  %v4934_v47 = vpop.f32.mrb[105].mxu0  ;;  %v5000_v56 = vpop.f32.mrb[106].mxu1 }
 0x455   :  { %v4935_v0 = vadd.f32 %v4934_v47, %v4933_v2  ;;  %v4936_v50 = vpop.f32.mrb[106].mxu0  ;;  %v5001_v19 = vpop.f32.mrb[107].mxu1 }
 0x456   :  { %v5002_v38 = vadd.f32 %v5001_v19, %v5000_v56  ;;  %v4937_v58 = vpop.f32.mrb[107].mxu0 }
 0x457   :  { %v7381_v22 = vadd.f32 %v4999_v27, %v4935_v0  ;;  %v4938_v51 = vadd.f32 %v4937_v58, %v4936_v50 }
 0x459   :  { %v7383_v15 = vadd.f32 %v5002_v38, %v4938_v51 }
 0x45a   :  { %v5003_v24 = vpop.f32.mrb[108].mxu1 }
 0x45b   :  { %v4939_v18 = vpop.f32.mrb[108].mxu0  ;;  %v5004_v17 = vpop.f32.mrb[109].mxu1 }
 0x45c   :  { %v5005_v54 = vadd.f32 %v5004_v17, %v5003_v24  ;;  %v4940_v10 = vpop.f32.mrb[109].mxu0  ;;  %v5006_v36 = vpop.f32.mrb[110].mxu1 }
 0x45d   :  { %v4941_v33 = vadd.f32 %v4940_v10, %v4939_v18  ;;  %v4942_v16 = vpop.f32.mrb[110].mxu0  ;;  %v5007_v28 = vpop.f32.mrb[111].mxu1 }
 0x45e   :  { %v5008_v48 = vadd.f32 %v5007_v28, %v5006_v36  ;;  %v4943_v8 = vpop.f32.mrb[111].mxu0 }
 0x45f   :  { %v7385_v41 = vadd.f32 %v5005_v54, %v4941_v33  ;;  %v4944_v53 = vadd.f32 %v4943_v8, %v4942_v16 }
 0x461   :  { %v7387_v32 = vadd.f32 %v5008_v48, %v4944_v53 }
 0x462   :  { %v5089_v34 = vpop.f32.mrb[112].mxu1 }
 0x463   :  { %v5025_v26 = vpop.f32.mrb[112].mxu0  ;;  %v5090_v40 = vpop.f32.mrb[113].mxu1 }
 0x464   :  { %v5091_v63 = vadd.f32 %v5090_v40, %v5089_v34  ;;  %v5026_v57 = vpop.f32.mrb[113].mxu0  ;;  %v5092_v7 = vpop.f32.mrb[114].mxu1 }
 0x465   :  { %v5027_v12 = vadd.f32 %v5026_v57, %v5025_v26  ;;  %v5028_v13 = vpop.f32.mrb[114].mxu0  ;;  %v5093_v1 = vpop.f32.mrb[115].mxu1 }
 0x466   :  { %v5094_v45 = vadd.f32 %v5093_v1, %v5092_v7  ;;  %v5029_v3 = vpop.f32.mrb[115].mxu0 }
 0x467   :  { %v3775_v21 = vadd.f32 %v5027_v12, %v7357_v44  ;;  %v5030_v9 = vadd.f32 %v5029_v3, %v5028_v13 }
 0x469   :  { %v3778_v46 = vadd.f32 %v5030_v9, %v7359_v49  ;;  %v7391_v20 = vadd.f32 %v5091_v63, %v3775_v21 }
 0x46a   :  { %v5095_v6 = vpop.f32.mrb[116].mxu1 }
 0x46b   :  { %v5031_v31 = vpop.f32.mrb[116].mxu0  ;;  %v5096_v60 = vpop.f32.mrb[117].mxu1  ;;  %v7393_v29 = vadd.f32 %v5094_v45, %v3778_v46 }
 0x46c   :  { %v5097_v62 = vadd.f32 %v5096_v60, %v5095_v6  ;;  %v5032_v30 = vpop.f32.mrb[117].mxu0  ;;  %v5098_v43 = vpop.f32.mrb[118].mxu1 }
 0x46d   :  { %v5033_v42 = vadd.f32 %v5032_v30, %v5031_v31  ;;  %v5034_v59 = vpop.f32.mrb[118].mxu0  ;;  %v5099_v14 = vpop.f32.mrb[119].mxu1 }
 0x46e   :  { %v5100_v2 = vadd.f32 %v5099_v14, %v5098_v43  ;;  %v5035_v37 = vpop.f32.mrb[119].mxu0 }
 0x46f   :  { %v3783_v44 = vadd.f32 %v5033_v42, %v7361_v23  ;;  %v5036_v27 = vadd.f32 %v5035_v37, %v5034_v59 }
 0x471   :  { %v3786_v49 = vadd.f32 %v5036_v27, %v7363_v55  ;;  %v7397_v47 = vadd.f32 %v5097_v62, %v3783_v44 }
 0x472   :  { %v5101_v56 = vpop.f32.mrb[120].mxu1 }
 0x473   :  { %v5037_v0 = vpop.f32.mrb[120].mxu0  ;;  %v5102_v50 = vpop.f32.mrb[121].mxu1  ;;  %v7399_v19 = vadd.f32 %v5100_v2, %v3786_v49 }
 0x474   :  { %v5103_v38 = vadd.f32 %v5102_v50, %v5101_v56  ;;  %v5038_v58 = vpop.f32.mrb[121].mxu0  ;;  %v5104_v51 = vpop.f32.mrb[122].mxu1 }
 0x475   :  { %v5039_v24 = vadd.f32 %v5038_v58, %v5037_v0  ;;  %v5040_v18 = vpop.f32.mrb[122].mxu0  ;;  %v5105_v17 = vpop.f32.mrb[123].mxu1 }
 0x476   :  { %v5106_v54 = vadd.f32 %v5105_v17, %v5104_v51  ;;  %v5041_v10 = vpop.f32.mrb[123].mxu0 }
 0x477   :  { %v3791_v23 = vadd.f32 %v5039_v24, %v7365_v61  ;;  %v5042_v36 = vadd.f32 %v5041_v10, %v5040_v18 }
 0x479   :  { %v3794_v55 = vadd.f32 %v5042_v36, %v7367_v4  ;;  %v7403_v33 = vadd.f32 %v5103_v38, %v3791_v23 }
 0x47a   :  { %v5107_v16 = vpop.f32.mrb[124].mxu1 }
 0x47b   :  { %v5043_v28 = vpop.f32.mrb[124].mxu0  ;;  %v5108_v48 = vpop.f32.mrb[125].mxu1  ;;  %v7405_v8 = vadd.f32 %v5106_v54, %v3794_v55 }
 0x47c   :  { %v5109_v53 = vadd.f32 %v5108_v48, %v5107_v16  ;;  %v5044_v34 = vpop.f32.mrb[125].mxu0  ;;  %v5110_v26 = vpop.f32.mrb[126].mxu1 }
 0x47d   :  { %v5045_v40 = vadd.f32 %v5044_v34, %v5043_v28  ;;  %v5046_v63 = vpop.f32.mrb[126].mxu0  ;;  %v5111_v57 = vpop.f32.mrb[127].mxu1 }
 0x47e   :  { %v5112_v7 = vadd.f32 %v5111_v57, %v5110_v26  ;;  %v5047_v12 = vpop.f32.mrb[127].mxu0 }
 0x47f   :  { %v3799_v61 = vadd.f32 %v5045_v40, %v7369_v5  ;;  %v5048_v13 = vadd.f32 %v5047_v12, %v5046_v63 }
 0x481   :  { %v3802_v4 = vadd.f32 %v5048_v13, %v7371_v35  ;;  %v7409_v1 = vadd.f32 %v5109_v53, %v3799_v61 }
 0x482   :  { %v5113_v45 = vpop.f32.mrb[128].mxu1 }
 0x483   :  { %v5049_v3 = vpop.f32.mrb[128].mxu0  ;;  %v5114_v21 = vpop.f32.mrb[129].mxu1  ;;  %v7411_v9 = vadd.f32 %v5112_v7, %v3802_v4 }
 0x484   :  { %v5115_v46 = vadd.f32 %v5114_v21, %v5113_v45  ;;  %v5050_v6 = vpop.f32.mrb[129].mxu0  ;;  %v5116_v31 = vpop.f32.mrb[130].mxu1 }
 0x485   :  { %v5051_v60 = vadd.f32 %v5050_v6, %v5049_v3  ;;  %v5052_v62 = vpop.f32.mrb[130].mxu0  ;;  %v5117_v30 = vpop.f32.mrb[131].mxu1 }
 0x486   :  { %v5118_v43 = vadd.f32 %v5117_v30, %v5116_v31  ;;  %v5053_v42 = vpop.f32.mrb[131].mxu0 }
 0x487   :  { %v3807_v5 = vadd.f32 %v5051_v60, %v7373_v11  ;;  %v5054_v59 = vadd.f32 %v5053_v42, %v5052_v62 }
 0x489   :  { %v3810_v35 = vadd.f32 %v5054_v59, %v7375_v52  ;;  %v3904_v14 = vadd.f32 %v5115_v46, %v3807_v5 }
 0x48a   :  { %v5119_v2 = vpop.f32.mrb[132].mxu1 }
 0x48b   :  { %v5055_v37 = vpop.f32.mrb[132].mxu0  ;;  %v5120_v44 = vpop.f32.mrb[133].mxu1  ;;  %v3907_v27 = vadd.f32 %v5118_v43, %v3810_v35 }
 0x48c   :  { %v5121_v49 = vadd.f32 %v5120_v44, %v5119_v2  ;;  %v5056_v56 = vpop.f32.mrb[133].mxu0  ;;  %v5122_v0 = vpop.f32.mrb[134].mxu1 }
 0x48d   :  { %v5057_v50 = vadd.f32 %v5056_v56, %v5055_v37  ;;  %v5058_v38 = vpop.f32.mrb[134].mxu0  ;;  %v5123_v58 = vpop.f32.mrb[135].mxu1 }
 0x48e   :  { %v5124_v51 = vadd.f32 %v5123_v58, %v5122_v0  ;;  %v5059_v24 = vpop.f32.mrb[135].mxu0 }
 0x48f   :  { %v3815_v18 = vadd.f32 %v5057_v50, %v7377_v39  ;;  %v5060_v17 = vadd.f32 %v5059_v24, %v5058_v38 }
 0x491   :  { %v3818_v11 = vadd.f32 %v5060_v17, %v7379_v25  ;;  %v3912_v54 = vadd.f32 %v5121_v49, %v3815_v18 }
 0x492   :  { %v5125_v52 = vpop.f32.mrb[136].mxu1 }
 0x493   :  { %v5061_v10 = vpop.f32.mrb[136].mxu0  ;;  %v5126_v23 = vpop.f32.mrb[137].mxu1  ;;  %v3915_v36 = vadd.f32 %v5124_v51, %v3818_v11 }
 0x494   :  { %v5127_v55 = vadd.f32 %v5126_v23, %v5125_v52  ;;  %v5062_v16 = vpop.f32.mrb[137].mxu0  ;;  %v5128_v28 = vpop.f32.mrb[138].mxu1 }
 0x495   :  { %v5063_v48 = vadd.f32 %v5062_v16, %v5061_v10  ;;  %v5064_v53 = vpop.f32.mrb[138].mxu0  ;;  %v5129_v34 = vpop.f32.mrb[139].mxu1 }
 0x496   :  { %v5130_v26 = vadd.f32 %v5129_v34, %v5128_v28  ;;  %v5065_v40 = vpop.f32.mrb[139].mxu0 }
 0x497   :  { %v3823_v63 = vadd.f32 %v5063_v48, %v7381_v22  ;;  %v5066_v57 = vadd.f32 %v5065_v40, %v5064_v53 }
 0x499   :  { %v3826_v39 = vadd.f32 %v5066_v57, %v7383_v15  ;;  %v3920_v7 = vadd.f32 %v5127_v55, %v3823_v63 }
 0x49a   :  { %v5131_v25 = vpop.f32.mrb[140].mxu1 }
 0x49b   :  { %v5067_v12 = vpop.f32.mrb[140].mxu0  ;;  %v5132_v61 = vpop.f32.mrb[141].mxu1  ;;  %v3923_v13 = vadd.f32 %v5130_v26, %v3826_v39 }
 0x49c   :  { %v5133_v4 = vadd.f32 %v5132_v61, %v5131_v25  ;;  %v5068_v45 = vpop.f32.mrb[141].mxu0  ;;  %v5134_v3 = vpop.f32.mrb[142].mxu1 }
 0x49d   :  { %v5069_v21 = vadd.f32 %v5068_v45, %v5067_v12  ;;  %v5070_v46 = vpop.f32.mrb[142].mxu0  ;;  %v5135_v6 = vpop.f32.mrb[143].mxu1 }
 0x49e   :  { %v5136_v31 = vadd.f32 %v5135_v6, %v5134_v3  ;;  %v5071_v60 = vpop.f32.mrb[143].mxu0 }
 0x49f   :  { %v3831_v62 = vadd.f32 %v5069_v21, %v7385_v41  ;;  %v5072_v30 = vadd.f32 %v5071_v60, %v5070_v46 }
 0x4a1   :  { %v3834_v22 = vadd.f32 %v5072_v30, %v7387_v32  ;;  %v3928_v43 = vadd.f32 %v5133_v4, %v3831_v62 }
 0x4a2   :  { %v5243_v15 = vpop.f32.mrb[144].mxu1 }
 0x4a3   :  { %v7421_v42 = vadd.f32 %v5243_v15, %v3912_v54  ;;  %v5235_v5 = vpop.f32.mrb[144].mxu0  ;;  %v4000_v59 = vpop.f32.mrb[145].mxu1  ;;  %v3931_v35 = vadd.f32 %v5136_v31, %v3834_v22 }
 0x4a4   :  { %v3977_v2 = vadd.f32 %v5235_v5, %v7397_v47  ;;  %v4001_v37 = vadd.f32 %v4000_v59, %v3904_v14  ;;  %v3968_v44 = vpop.f32.mrb[145].mxu0  ;;  %v5244_v49 = vpop.f32.mrb[146].mxu1 }
 0x4a5   :  { %v3969_v56 = vadd.f32 %v3968_v44, %v7391_v20  ;;  %v4012_v0 = vadd.f32 %v5244_v49, %v3915_v36  ;;  %v5236_v50 = vpop.f32.mrb[146].mxu0  ;;  %v4003_v41 = vpop.f32.mrb[147].mxu1 }
 0x4a6   :  { %v3980_v38 = vadd.f32 %v5236_v50, %v7399_v19  ;;  %v4004_v32 = vadd.f32 %v4003_v41, %v3907_v27  ;;  %v3971_v58 = vpop.f32.mrb[147].mxu0 }
 0x4a7   :  { %v3972_v51 = vadd.f32 %v3971_v58, %v7393_v29 }
 0x4a9   :  { %v4035_v24 = vadd.f32 %v3972_v51, %v3969_v56 }
 0x4aa   :  { %v5247_v18 = vpop.f32.mrb[148].mxu1 }
 0x4ab   :  { %v4036_v17 = vadd.f32 %v4035_v24, %v3977_v2  ;;  %v4025_v11 = vadd.f32 %v5247_v18, %v3928_v43  ;;  %v5239_v54 = vpop.f32.mrb[148].mxu0  ;;  %v4016_v47 = vpop.f32.mrb[149].mxu1 }
 0x4ac   :  { %v3993_v14 = vadd.f32 %v5239_v54, %v7409_v1  ;;  %v4017_v52 = vadd.f32 %v4016_v47, %v3920_v7  ;;  %v3984_v10 = vpop.f32.mrb[149].mxu0  ;;  %v5248_v20 = vpop.f32.mrb[150].mxu1 }
 0x4ad   :  { %v3985_v23 = vadd.f32 %v3984_v10, %v7403_v33  ;;  %v4037_v36 = vadd.f32 %v4036_v17, %v3980_v38  ;;  %v4028_v55 = vadd.f32 %v5248_v20, %v3931_v35  ;;  %v5240_v19 = vpop.f32.mrb[150].mxu0  ;;  %v4019_v27 = vpop.f32.mrb[151].mxu1 }
 0x4ae   :  { %v3996_v16 = vadd.f32 %v5240_v19, %v7411_v9  ;;  %v4020_v29 = vadd.f32 %v4019_v27, %v3923_v13  ;;  %v3987_v28 = vpop.f32.mrb[151].mxu0 }
 0x4af   :  { %v4038_v48 = vadd.f32 %v4037_v36, %v3985_v23  ;;  %v3988_v53 = vadd.f32 %v3987_v28, %v7405_v8 }
 0x4b1   :  { %v4039_v34 = vadd.f32 %v4038_v48, %v3988_v53 }
 0x4b3   :  { %v4040_v26 = vadd.f32 %v4039_v34, %v3993_v14 }
 0x4b5   :  { %v4041_v40 = vadd.f32 %v4040_v26, %v3996_v16 }
 0x4b7   :  { %v4042_v1 = vadd.f32 %v4041_v40, %v4001_v37 }
 0x4b9   :  { %v4043_v63 = vadd.f32 %v4042_v1, %v4004_v32 }
 0x4bb   :  { %v4044_v57 = vadd.f32 %v4043_v63, %v7421_v42 }
 0x4bd   :  { %v4045_v39 = vadd.f32 %v4044_v57, %v4012_v0 }
 0x4bf   :  { %v4046_v33 = vadd.f32 %v4045_v39, %v4017_v52 }
 0x4c1   :  { %v4047_v7 = vadd.f32 %v4046_v33, %v4020_v29 }
 0x4c3   :  { %v4048_v25 = vadd.f32 %v4047_v7, %v4025_v11 }
 0x4c5   :  { %v4049_v12 = vadd.f32 %v4048_v25, %v4028_v55  ;;  %v4358_v25 = vld [vmem:[%s7491_s4 + $0x2] sm:$0x1] }
 0x4c7   :  { %v4050_v61 = vrot.slane %v4049_v12, 4 }
 0x4c9   :  { %v4051_v4 = vadd.f32 %v4050_v61, %v4049_v12 }
 0x4cb   :  { %v4052_v9 = vrot.slane %v4051_v4, 2 }
 0x4cd   :  { %v4053_v13 = vadd.f32 %v4052_v9, %v4051_v4  ;;  %v7552_v4 = vld [vmem:[#allocation4_spill] sm:$0xff] }
 0x4cf   :  { %v4054_v45 = vrot.slane %v4053_v13, 1 }
 0x4d1   :  { %v4055_v3 = vadd.f32 %v4054_v45, %v4053_v13 }
 0x4d3   :  { %v4056_v21 = vmul.f32 0.0078125, %v4055_v3 }
 0x4d5   :  { %v4057_v8 = vsub.f32 %v3969_v56, %v4056_v21  ;;  %v4058_v46 = vsub.f32 %v3972_v51, %v4056_v21  ;;  %v4059_v6 = vsub.f32 %v3977_v2, %v4056_v21  ;;  %v4060_v31 = vsub.f32 %v3980_v38, %v4056_v21 }
 0x4d6   :  { %v4061_v60 = vsub.f32 %v3985_v23, %v4056_v21  ;;  %v4062_v62 = vsub.f32 %v3988_v53, %v4056_v21  ;;  %v4063_v30 = vsub.f32 %v3993_v14, %v4056_v21  ;;  %v4064_v22 = vsub.f32 %v3996_v16, %v4056_v21 }
 0x4d7   :  { %v4065_v43 = vsub.f32 %v4001_v37, %v4056_v21  ;;  %v4066_v15 = vsub.f32 %v4004_v32, %v4056_v21  ;;  %v4067_v5 = vsub.f32 %v7421_v42, %v4056_v21  ;;  %v4068_v59 = vsub.f32 %v4012_v0, %v4056_v21 }
 0x4d8   :  { %v4069_v35 = vsub.f32 %v4017_v52, %v4056_v21  ;;  %v4070_v44 = vsub.f32 %v4020_v29, %v4056_v21  ;;  %v4071_v49 = vsub.f32 %v4025_v11, %v4056_v21  ;;  %v4072_v50 = vsub.f32 %v4028_v55, %v4056_v21 }
 0x4d9   :  { %v4073_v41 = vmul.f32 %v4057_v8, %v4057_v8  ;;  %v4074_v58 = vmul.f32 %v4058_v46, %v4058_v46  ;;  %v4075_v24 = vmul.f32 %v4059_v6, %v4059_v6  ;;  %v4076_v51 = vmul.f32 %v4060_v31, %v4060_v31 }
 0x4da   :  { %v4077_v38 = vmul.f32 %v4061_v60, %v4061_v60  ;;  %v4078_v17 = vmul.f32 %v4062_v62, %v4062_v62  ;;  %v4079_v47 = vmul.f32 %v4063_v30, %v4063_v30  ;;  %v4080_v32 = vmul.f32 %v4064_v22, %v4064_v22 }
 0x4db   :  { %v4089_v56 = vadd.f32 %v4074_v58, %v4073_v41  ;;  %v4081_v42 = vmul.f32 %v4065_v43, %v4065_v43  ;;  %v4082_v52 = vmul.f32 %v4066_v15, %v4066_v15  ;;  %v4083_v11 = vmul.f32 %v4067_v5, %v4067_v5  ;;  %v4360_v41 = vld [vmem:[%s7492_s5 + $0x2] ss:$0 sm:$0xff] }
 0x4dc   :  { %v4084_v23 = vmul.f32 %v4068_v59, %v4068_v59  ;;  %v4085_v55 = vmul.f32 %v4069_v35, %v4069_v35  ;;  %v4086_v27 = vmul.f32 %v4070_v44, %v4070_v44  ;;  %v4087_v29 = vmul.f32 %v4071_v49, %v4071_v49 }
 0x4dd   :  { %v4090_v2 = vadd.f32 %v4089_v56, %v4075_v24  ;;  %v4088_v48 = vmul.f32 %v4072_v50, %v4072_v50 }
 0x4df   :  { %v4091_v18 = vadd.f32 %v4090_v2, %v4076_v51 }
 0x4e1   :  { %v4092_v54 = vadd.f32 %v4091_v18, %v4077_v38 }
 0x4e3   :  { %v4093_v37 = vadd.f32 %v4092_v54, %v4078_v17 }
 0x4e5   :  { %v4094_v14 = vadd.f32 %v4093_v37, %v4079_v47 }
 0x4e7   :  { %v4095_v0 = vadd.f32 %v4094_v14, %v4080_v32 }
 0x4e9   :  { %v4096_v10 = vadd.f32 %v4095_v0, %v4081_v42 }
 0x4eb   :  { %v4097_v20 = vadd.f32 %v4096_v10, %v4082_v52 }
 0x4ed   :  { %v4098_v36 = vadd.f32 %v4097_v20, %v4083_v11 }
 0x4ef   :  { %v4099_v19 = vadd.f32 %v4098_v36, %v4084_v23 }
 0x4f1   :  { %v4100_v16 = vadd.f32 %v4099_v19, %v4085_v55 }
 0x4f3   :  { %v4101_v28 = vadd.f32 %v4100_v16, %v4086_v27 }
 0x4f5   :  { %v4102_v53 = vadd.f32 %v4101_v28, %v4087_v29 }
 0x4f7   :  { %v4103_v34 = vadd.f32 %v4102_v53, %v4088_v48 }
 0x4f9   :  { %v4104_v26 = vrot.slane %v4103_v34, 4 }
 0x4fb   :  { %v4105_v40 = vadd.f32 %v4104_v26, %v4103_v34 }
 0x4fd   :  { %v4106_v1 = vrot.slane %v4105_v40, 2 }
 0x4ff   :  { %v4107_v63 = vadd.f32 %v4106_v1, %v4105_v40 }
 0x501   :  { %v4108_v57 = vrot.slane %v4107_v63, 1 }
 0x503   :  { %v4109_v39 = vadd.f32 %v4108_v57, %v4107_v63 }
 0x505   :  { %v4110_v33 = vmul.f32 0.0078125, %v4109_v39 }
 0x507   :  { %v4111_v7 = vadd.f32 1e-05, %v4110_v33 }
 0x509   :  { %5431 = vrsqrt.f32 %v4111_v7 }
 0x513   :  { %v5432_v12 = vpop.eup %5431 }
 0x514   :  { %v4113_v61 = vmul.f32 %v5432_v12, %v4358_v25 }
 0x516   :  { %v4118_v9 = vrot.slane %v4113_v61, %v7552_v4 }
 0x518   :  { %v4120_v13 = vmul.f32 %v4118_v9, %v4057_v8  ;;  %v4121_v45 = vmul.f32 %v4118_v9, %v4058_v46  ;;  %v4122_v3 = vmul.f32 %v4118_v9, %v4059_v6  ;;  %v4123_v21 = vmul.f32 %v4118_v9, %v4060_v31 }
 0x519   :  { %v4124_v58 = vmul.f32 %v4118_v9, %v4061_v60  ;;  %v4125_v24 = vmul.f32 %v4118_v9, %v4062_v62  ;;  %v4126_v56 = vmul.f32 %v4118_v9, %v4063_v30  ;;  %v4127_v51 = vmul.f32 %v4118_v9, %v4064_v22 }
 0x51a   :  { %v4128_v2 = vmul.f32 %v4118_v9, %v4065_v43  ;;  %v4129_v38 = vmul.f32 %v4118_v9, %v4066_v15  ;;  %v4130_v18 = vmul.f32 %v4118_v9, %v4067_v5  ;;  %v4131_v17 = vmul.f32 %v4118_v9, %v4068_v59 }
 0x51b   :  { %v4132_v54 = vmul.f32 %v4118_v9, %v4069_v35  ;;  %v4133_v47 = vmul.f32 %v4118_v9, %v4070_v44  ;;  %v4134_v37 = vmul.f32 %v4118_v9, %v4071_v49  ;;  %v4135_v32 = vmul.f32 %v4118_v9, %v4072_v50 }
 0x51c   :  { %v4142_v8 = vadd.f32 %v4360_v41, %v4120_v13  ;;  %v4143_v46 = vadd.f32 %v4360_v41, %v4121_v45  ;;  %v4144_v6 = vadd.f32 %v4360_v41, %v4122_v3  ;;  %v4145_v31 = vadd.f32 %v4360_v41, %v4123_v21 }
 0x51d   :  { %v4146_v14 = vadd.f32 %v4360_v41, %v4124_v58  ;;  %v4147_v42 = vadd.f32 %v4360_v41, %v4125_v24  ;;  %v4148_v0 = vadd.f32 %v4360_v41, %v4126_v56  ;;  %v4149_v52 = vadd.f32 %v4360_v41, %v4127_v51 }
 0x51e   :  { %v4150_v60 = vadd.f32 %v4360_v41, %v4128_v2  ;;  %v4151_v62 = vadd.f32 %v4360_v41, %v4129_v38  ;;  %v4152_v30 = vadd.f32 %v4360_v41, %v4130_v18  ;;  %v4153_v22 = vadd.f32 %v4360_v41, %v4131_v17 }
 0x51f   :  { %v4154_v43 = vadd.f32 %v4360_v41, %v4132_v54  ;;  %v4155_v15 = vadd.f32 %v4360_v41, %v4133_v47  ;;  %v4156_v5 = vadd.f32 %v4360_v41, %v4134_v37  ;;  %v4157_v59 = vadd.f32 %v4360_v41, %v4135_v32 }
 0x520   :  { %v4158_v35 = vmax.f32 %v4142_v8, 0.0  ;;  %v4159_v44 = vmax.f32 %v4143_v46, 0.0  ;;  %v4160_v49 = vmax.f32 %v4144_v6, 0.0  ;;  %v4161_v50 = vmax.f32 %v4145_v31, 0.0 }
 0x521   :  { %v4162_v10 = vmax.f32 %v4146_v14, 0.0  ;;  %v4163_v11 = vmax.f32 %v4147_v42, 0.0  ;;  %v4164_v20 = vmax.f32 %v4148_v0, 0.0  ;;  %v4165_v23 = vmax.f32 %v4149_v52, 0.0 }
 0x522   :  { %v4166_v36 = vmax.f32 %v4150_v60, 0.0  ;;  %v4167_v55 = vmax.f32 %v4151_v62, 0.0  ;;  %v4168_v19 = vmax.f32 %v4152_v30, 0.0  ;;  %v4169_v27 = vmax.f32 %v4153_v22, 0.0  ;;  %4174 = vst [vmem:[%s7494_s6] sm:$0xff] %v4158_v35  ;;  %4175 = vst [vmem:[%s7494_s6 + $0x8] sm:$0xff] %v4159_v44 }
 0x523   :  { %4176 = vst [vmem:[%s7494_s6 + $0x10] sm:$0xff] %v4160_v49  ;;  %4177 = vst [vmem:[%s7494_s6 + $0x18] sm:$0xff] %v4161_v50  ;;  %v4170_v16 = vmax.f32 %v4154_v43, 0.0  ;;  %v4171_v29 = vmax.f32 %v4155_v15, 0.0  ;;  %v4172_v28 = vmax.f32 %v4156_v5, 0.0  ;;  %v4173_v48 = vmax.f32 %v4157_v59, 0.0 }
 0x524   :  { %4178 = vst [vmem:[%s7494_s6 + $0x20] sm:$0xff] %v4162_v10  ;;  %4179 = vst [vmem:[%s7494_s6 + $0x28] sm:$0xff] %v4163_v11 }
 0x525   :  { %4180 = vst [vmem:[%s7494_s6 + $0x30] sm:$0xff] %v4164_v20  ;;  %4181 = vst [vmem:[%s7494_s6 + $0x38] sm:$0xff] %v4165_v23 }
 0x526   :  { %4182 = vst [vmem:[%s7494_s6 + $0x40] sm:$0xff] %v4166_v36  ;;  %4183 = vst [vmem:[%s7494_s6 + $0x48] sm:$0xff] %v4167_v55 }
 0x527   :  { %4184 = vst [vmem:[%s7494_s6 + $0x50] sm:$0xff] %v4168_v19  ;;  %4185 = vst [vmem:[%s7494_s6 + $0x58] sm:$0xff] %v4169_v27 }
 0x528   :  { %4186 = vst [vmem:[%s7494_s6 + $0x60] sm:$0xff] %v4170_v16  ;;  %4187 = vst [vmem:[%s7494_s6 + $0x68] sm:$0xff] %v4171_v29 }
 0x529   :  { %4188 = vst [vmem:[%s7494_s6 + $0x70] sm:$0xff] %v4172_v28  ;;  %4189 = vst [vmem:[%s7494_s6 + $0x78] sm:$0xff] %v4173_v48 }

</bundles_post_ra>
